<compile_context>
chip_gen: v5e
topology: v5e:2x2
jax: 0.10.0
libtpu: 0.0.40
codegen_flags: <defaults>
</compile_context>

<pallas_src>
import math
import functools

import jax
import jax.numpy as jnp
from jax.experimental import pallas as pl
from jax.experimental.pallas import tpu as pltpu

LN_EPS = 1e-5


# ----------------------------------------------------------------------------- kernel ----
def _decoder_layer_kernel(
    tgt_ref, mem_ref, qpos_ref, pos_ref,
    sa_wq_ref, sa_bq_ref, sa_wk_ref, sa_bk_ref, sa_wv_ref, sa_bv_ref, sa_wo_ref, sa_bo_ref,
    ca_wq_ref, ca_bq_ref, ca_wk_ref, ca_bk_ref, ca_wv_ref, ca_bv_ref, ca_wo_ref, ca_bo_ref,
    w1_ref, b1_ref, w2_ref, b2_ref,
    g1_ref, be1_ref, g2_ref, be2_ref, g3_ref, be3_ref,
    out_ref,
    cat_ref,                      # VMEM scratch (Bt*L, E), compute dtype: head concat buffer
    *, nhead: int, compute_dtype,
):
    f32 = jnp.float32
    cdt = compute_dtype           # MXU operand dtype (bf16 by default), f32 accumulation
    Bt, L, E = tgt_ref.shape
    S = mem_ref.shape[1]
    dh = E // nhead

    # merged row slabs, pointwise math in f32 (residuals / pos adds match the reference)
    tgt32 = tgt_ref[...].astype(f32).reshape(Bt * L, E)
    qpos32 = qpos_ref[...].astype(f32).reshape(Bt * L, E)
    mem32 = mem_ref[...].astype(f32).reshape(Bt * S, E)
    pos32 = pos_ref[...].astype(f32).reshape(Bt * S, E)

    def layer_norm(x32, g_ref, b_ref):
        mu = jnp.mean(x32, axis=-1, keepdims=True)
        xc = x32 - mu
        var = jnp.mean(xc * xc, axis=-1, keepdims=True)
        return xc * jax.lax.rsqrt(var + LN_EPS) * g_ref[...] + b_ref[...]

    def mha(q32, k32, v32, Lq, Lk,
            wq_ref, bq_ref, wk_ref, bk_ref, wv_ref, bv_ref, wo_ref, bo_ref):
        # q32: (Bt*Lq, E) f32, k32/v32: (Bt*Lk, E) f32; 1/sqrt(dh) folded into wq/bq.
        qp = (jnp.dot(q32.astype(cdt), wq_ref[...], preferred_element_type=f32)
              + bq_ref[...]).astype(cdt)
        kp = (jnp.dot(k32.astype(cdt), wk_ref[...], preferred_element_type=f32)
              + bk_ref[...]).astype(cdt)
        vp = (jnp.dot(v32.astype(cdt), wv_ref[...], preferred_element_type=f32)
              + bv_ref[...]).astype(cdt)

        q3 = qp.reshape(Bt, Lq, E)
        k3 = kp.reshape(Bt, Lk, E)
        v3 = vp.reshape(Bt, Lk, E)

        # Per-head attention; each head's context is stored into its lane slot of the
        # concat scratch so the output projection becomes ONE K=E matmul below.
        # TODO(synk): batch heads into a single dot_general when dh >= 128 (no lane slices);
        # TODO(synk): S-tiled online-softmax for large memory lengths (DETR-scale S).
        for h in range(nhead):                         # static unroll, nhead is small
            lo = h * dh
            qh = q3[:, :, lo:lo + dh]                  # (Bt, Lq, dh)
            kh = k3[:, :, lo:lo + dh]                  # (Bt, Lk, dh)
            vh = v3[:, :, lo:lo + dh]                  # (Bt, Lk, dh)
            s = jnp.einsum('bqd,bkd->bqk', qh, kh,
                           preferred_element_type=f32)            # (Bt, Lq, Lk)
            s = s - jnp.max(s, axis=-1, keepdims=True)
            e = jnp.exp(s)
            p = (e * pl.reciprocal(jnp.sum(e, axis=-1, keepdims=True),
                                   approx=True)).astype(cdt)
            oh = jnp.einsum('bqk,bkd->bqd', p, vh,
                            preferred_element_type=f32)           # (Bt, Lq, dh)
            cat_ref[:, lo:lo + dh] = oh.reshape(Bt * Lq, dh).astype(cdt)

        # single output projection, full K = E contraction (review item 1)
        return (jnp.dot(cat_ref[...], wo_ref[...], preferred_element_type=f32)
                + bo_ref[...])                                     # (Bt*Lq, E) f32

    # ---------------- forward_post ----------------
    # self-attention: q = k = tgt + query_pos, value = tgt
    q_sa = tgt32 + qpos32
    sa = mha(q_sa, q_sa, tgt32, L, L,
             sa_wq_ref, sa_bq_ref, sa_wk_ref, sa_bk_ref, sa_wv_ref, sa_bv_ref,
             sa_wo_ref, sa_bo_ref)
    x32 = layer_norm(tgt32 + sa, g1_ref, be1_ref)

    # cross-attention: q = x + query_pos, k = memory + pos, value = memory
    ca = mha(x32 + qpos32, mem32 + pos32, mem32, L, S,
             ca_wq_ref, ca_bq_ref, ca_wk_ref, ca_bk_ref, ca_wv_ref, ca_bv_ref,
             ca_wo_ref, ca_bo_ref)
    x32 = layer_norm(x32 + ca, g2_ref, be2_ref)

    # FFN: linear1 -> relu -> linear2
    h1 = jnp.maximum(jnp.dot(x32.astype(cdt), w1_ref[...], preferred_element_type=f32)
                     + b1_ref[...], 0.0).astype(cdt)
    ff = jnp.dot(h1, w2_ref[...], preferred_element_type=f32) + b2_ref[...]
    x32 = layer_norm(x32 + ff, g3_ref, be3_ref)

    out_ref[...] = x32.reshape(Bt, L, E).astype(out_ref.dtype)


# ----------------------------------------------------------------------------- wrapper ---
def _prepare_params(params, *, d_model, nhead, w_dtype):
    """Split packed in-projections, transpose, fold 1/sqrt(dh) into Wq/bq (host-side, once).
    Matmul weights are cast to the MXU operand dtype; biases / LN params stay f32."""
    E = d_model
    dh = E // nhead
    scale = 1.0 / math.sqrt(dh)
    f32 = jnp.float32

    def split_attn(win, bin_, wout, bout):
        b = bin_.reshape(-1).astype(f32)
        wq = (win[0:E, :].T * scale).astype(w_dtype)     # x @ wq == (x @ Wq^T) * scale
        wk = win[E:2 * E, :].T.astype(w_dtype)
        wv = win[2 * E:3 * E, :].T.astype(w_dtype)
        bq = (b[0:E] * scale).reshape(1, E)
        bk = b[E:2 * E].reshape(1, E)
        bv = b[2 * E:3 * E].reshape(1, E)
        wo = wout.T.astype(w_dtype)                      # o @ wo == o @ Wo^T
        bo = bout.reshape(1, E).astype(f32)
        return [wq, bq, wk, bk, wv, bv, wo, bo]

    F = params["w1"].shape[0]
    prep = []
    prep += split_attn(params["sa_win"], params["sa_bin"], params["sa_wo"], params["sa_bo"])
    prep += split_attn(params["ca_win"], params["ca_bin"], params["ca_wo"], params["ca_bo"])
    prep += [params["w1"].T.astype(w_dtype), params["b1"].reshape(1, F).astype(f32),
             params["w2"].T.astype(w_dtype), params["b2"].reshape(1, E).astype(f32)]
    for k in ("g1", "be1", "g2", "be2", "g3", "be3"):
        prep.append(params[k].reshape(1, E).astype(f32))
    return prep


def _vmem_plan():
    """Generation-aware VMEM plan: (vmem_limit_bytes, activation/tile budget)."""
    cap = 64 * 1024 * 1024                    # conservative fallback (v7x per-TC VMEM)
    try:
        info = pltpu.get_tpu_info()
        cap = int(getattr(info, "vmem_capacity_bytes", cap) or cap)
    except Exception:
        pass
    # ~75% of 128 MiB on v5e/v6e (~96 MiB), ~62% of 64 MiB on v7x (~40 MiB)
    frac = 0.75 if cap >= 100 * (1 << 20) else 0.62
    vmem_limit = int(cap * frac)
    return vmem_limit, int(vmem_limit * 0.8)


def _pick_batch_tile(N, L, S, E, F, *, io_itemsize, cdt_itemsize, weight_bytes, budget):
    """Largest divisor Bt of N whose fused per-step footprint fits `budget`.

    Keeps at least 2 grid steps when N >= 2 so the 'parallel' batch axis can be
    megacore-sharded on v7x (2 TC/chip); maximizing Bt within budget also maximizes
    MXU M-dim fill for the projection / FFN matmuls (row-count floor)."""
    min_steps = 2 if N >= 2 else 1

    def step_bytes(bt):
        rows_q, rows_k = bt * L, bt * S
        act_io = 2 * io_itemsize * (3 * rows_q * E + 2 * rows_k * E)   # dbl-buffered blocks
        proj = (2 * rows_q + 2 * rows_k) * E * (4 + cdt_itemsize)      # q/k/v projections
        scores = 3 * 2 * bt * L * max(L, S) * 4                        # ~2 heads of s/e/p live
        ffn = bt * L * F * (4 + cdt_itemsize)
        resid = 4 * rows_q * E * 4                                     # f32 residual/LN temps
        cat = rows_q * E * cdt_itemsize                                # head-concat scratch
        return weight_bytes + act_io + proj + scores + ffn + resid + cat

    best = 1
    for bt in range(1, N + 1):
        if N % bt or (N // bt) < min_steps:
            continue
        if step_bytes(bt) <= budget:
            best = bt
    return best


def transformer_decoder_layer_batch_major(tgt, memory, params, *, nhead,
                                          pos=None, query_pos=None, batch_tile=None,
                                          use_bf16_matmul=True):
    """Batch-major entry point (no host transposes). tgt: (N, L, E), memory: (N, S, E)."""
    N, L, E = tgt.shape
    S = memory.shape[1]
    assert E % nhead == 0, "d_model must be divisible by nhead"

    if query_pos is None:
        query_pos = jnp.zeros_like(tgt)
    if pos is None:
        pos = jnp.zeros_like(memory)

    io_dtype = tgt.dtype
    # MXU operand dtype: bf16 runs at full MXU rate on v5e/v6e/v7x; f32 accumulation kept.
    cdt = jnp.bfloat16 if use_bf16_matmul else jnp.dtype(io_dtype)

    prep = _prepare_params(params, d_model=E, nhead=nhead, w_dtype=cdt)
    F_ff = params["w1"].shape[0]
    weight_bytes = sum(int(a.size) * a.dtype.itemsize for a in prep)

    vmem_limit, tile_budget = _vmem_plan()
    if batch_tile is None:
        batch_tile = _pick_batch_tile(
            N, L, S, E, F_ff,
            io_itemsize=jnp.dtype(io_dtype).itemsize,
            cdt_itemsize=jnp.dtype(cdt).itemsize,
            weight_bytes=weight_bytes, budget=tile_budget)
    assert N % batch_tile == 0, "batch_tile must divide the batch size"
    Bt = batch_tile

    kernel = functools.partial(_decoder_layer_kernel, nhead=nhead, compute_dtype=cdt)

    def run(single_buffer_weights):
        def act_spec(seqlen):
            return pl.BlockSpec((Bt, seqlen, E), lambda b: (b, 0, 0))

        def const_spec(a):
            nd = a.ndim
            idx = lambda b, _nd=nd: (0,) * _nd            # grid-invariant whole array
            if single_buffer_weights:
                # weights are fetched once; single-buffer them to halve their VMEM footprint
                return pl.BlockSpec(a.shape, idx, pipeline_mode=pl.Buffered(1))
            return pl.BlockSpec(a.shape, idx)

        # NOTE: output last dim E < 128 (demo) => masked partial stores; lane-dense for real E.
        return pl.pallas_call(
            kernel,
            out_shape=jax.ShapeDtypeStruct((N, L, E), io_dtype),
            grid_spec=pltpu.PrefetchScalarGridSpec(
                num_scalar_prefetch=0,
                grid=(N // Bt,),
                in_specs=[act_spec(L), act_spec(S), act_spec(L), act_spec(S)]
                         + [const_spec(a) for a in prep],
                out_specs=pl.BlockSpec((Bt, L, E), lambda b: (b, 0, 0)),
                scratch_shapes=[pltpu.VMEM((Bt * L, E), cdt)],
            ),
            compiler_params=pltpu.CompilerParams(
                dimension_semantics=("parallel",),      # independent batch tiles -> megacore
                vmem_limit_bytes=vmem_limit,
            ),
        )(tgt, memory, query_pos, pos, *prep)

    try:
        return run(True)
    except Exception:
        # TODO(synk): pl.Buffered(1) single-buffering not accepted by this JAX build; the
        # fallback uses default (double) buffering for the grid-invariant weights.
        return run(False)


def transformer_decoder_layer(tgt, memory, params, *, nhead, pos=None, query_pos=None,
                              batch_tile=None, use_bf16_matmul=True):
    """PyTorch-layout wrapper: tgt (L, N, E), memory (S, N, E) -> (L, N, E).
    Prefer transformer_decoder_layer_batch_major in production to skip the transposes."""
    tgt_b = jnp.transpose(tgt, (1, 0, 2))
    mem_b = jnp.transpose(memory, (1, 0, 2))
    qpos_b = None if query_pos is None else jnp.transpose(query_pos, (1, 0, 2))
    pos_b = None if pos is None else jnp.transpose(pos, (1, 0, 2))
    out_b = transformer_decoder_layer_batch_major(
        tgt_b, mem_b, params, nhead=nhead, pos=pos_b, query_pos=qpos_b,
        batch_tile=batch_tile, use_bf16_matmul=use_bf16_matmul)
    return jnp.transpose(out_b, (1, 0, 2))


# ----------------------------------------------------------------------------- reference -
def _reference_forward_post(tgt, memory, params, *, nhead, pos, query_pos):
    """Pure-JAX forward_post in seq-major layout, used only to sanity-check the kernel."""
    E = tgt.shape[-1]
    dh = E // nhead
    hp = jax.lax.Precision.HIGHEST

    def mha(q, k, v, win, bin_, wo, bo):
        Lq, N, _ = q.shape
        Lk = k.shape[0]
        b = bin_.reshape(-1)
        qp = jnp.einsum('lne,fe->lnf', q, win[0:E], precision=hp) + b[0:E]
        kp = jnp.einsum('lne,fe->lnf', k, win[E:2 * E], precision=hp) + b[E:2 * E]
        vp = jnp.einsum('lne,fe->lnf', v, win[2 * E:3 * E], precision=hp) + b[2 * E:3 * E]
        qh = qp.reshape(Lq, N, nhead, dh).transpose(1, 2, 0, 3)
        kh = kp.reshape(Lk, N, nhead, dh).transpose(1, 2, 0, 3)
        vh = vp.reshape(Lk, N, nhead, dh).transpose(1, 2, 0, 3)
        s = jnp.einsum('nhqd,nhkd->nhqk', qh, kh, precision=hp) / math.sqrt(dh)
        a = jax.nn.softmax(s, axis=-1)
        o = jnp.einsum('nhqk,nhkd->nhqd', a, vh, precision=hp)
        o = o.transpose(2, 0, 1, 3).reshape(Lq, N, E)
        return jnp.einsum('lne,fe->lnf', o, wo, precision=hp) + bo.reshape(-1)

    def ln(x, g, b):
        mu = x.mean(-1, keepdims=True)
        var = ((x - mu) ** 2).mean(-1, keepdims=True)
        return (x - mu) / jnp.sqrt(var + LN_EPS) * g.reshape(-1) + b.reshape(-1)

    q = tgt + query_pos
    t2 = mha(q, q, tgt, params["sa_win"], params["sa_bin"], params["sa_wo"], params["sa_bo"])
    x = ln(tgt + t2, params["g1"], params["be1"])
    t2 = mha(x + query_pos, memory + pos, memory,
             params["ca_win"], params["ca_bin"], params["ca_wo"], params["ca_bo"])
    x = ln(x + t2, params["g2"], params["be2"])
    h = jax.nn.relu(jnp.dot(x, params["w1"].T, precision=hp) + params["b1"].reshape(-1))
    t2 = jnp.dot(h, params["w2"].T, precision=hp) + params["b2"].reshape(-1)
    x = ln(x + t2, params["g3"], params["be3"])
    return x


# ----------------------------------------------------------------------------- params ----
def init_params(key, d_model, nhead, dim_feedforward):
    """Deterministic synthetic parameters matching the PyTorch module's shapes."""
    E, F = d_model, dim_feedforward
    ks = jax.random.split(key, 20)
    s = 0.02

    def rnd(k, shape, scale=s):
        return (scale * jax.random.normal(k, shape)).astype(jnp.float32)

    return {
        # self-attention: packed in-proj (3E, E), out-proj (E, E) — PyTorch convention
        "sa_win": rnd(ks[0], (3 * E, E)), "sa_bin": rnd(ks[1], (1, 3 * E), 0.01),
        "sa_wo": rnd(ks[2], (E, E)), "sa_bo": rnd(ks[3], (1, E), 0.01),
        # cross-attention
        "ca_win": rnd(ks[4], (3 * E, E)), "ca_bin": rnd(ks[5], (1, 3 * E), 0.01),
        "ca_wo": rnd(ks[6], (E, E)), "ca_bo": rnd(ks[7], (1, E), 0.01),
        # FFN
        "w1": rnd(ks[8], (F, E)), "b1": rnd(ks[9], (1, F), 0.01),
        "w2": rnd(ks[10], (E, F)), "b2": rnd(ks[11], (1, E), 0.01),
        # LayerNorms
        "g1": 1.0 + rnd(ks[12], (1, E), 0.1), "be1": rnd(ks[13], (1, E), 0.1),
        "g2": 1.0 + rnd(ks[14], (1, E), 0.1), "be2": rnd(ks[15], (1, E), 0.1),
        "g3": 1.0 + rnd(ks[16], (1, E), 0.1), "be3": rnd(ks[17], (1, E), 0.1),
    }


# ----------------------------------------------------------------------------- main ------
if __name__ == "__main__":
    d_model = 32
    nhead = 4
    dim_feedforward = 64
    L = 8     # target sequence length (num queries)
    S = 16    # memory sequence length
    N = 2     # batch

    key = jax.random.PRNGKey(0)
    k_tgt, k_mem, k_qp, k_pos, k_par = jax.random.split(key, 5)

    tgt = jax.random.normal(k_tgt, (L, N, d_model), jnp.float32)
    memory = jax.random.normal(k_mem, (S, N, d_model), jnp.float32)
    query_pos = jax.random.normal(k_qp, (L, N, d_model), jnp.float32)
    pos = jax.random.normal(k_pos, (S, N, d_model), jnp.float32)

    params = init_params(k_par, d_model, nhead, dim_feedforward)

    out = transformer_decoder_layer(
        tgt, memory, params, nhead=nhead, pos=pos, query_pos=query_pos)
    out = jax.block_until_ready(out)
    assert out.shape == (L, N, d_model)

    ref = _reference_forward_post(
        tgt, memory, params, nhead=nhead, pos=pos, query_pos=query_pos)
    # bf16 MXU operands + approx-reciprocal softmax vs. HIGHEST-precision f32 reference
    max_err = float(jnp.max(jnp.abs(out - ref)))
    assert max_err < 3e-2, f"kernel/reference mismatch: max abs err = {max_err}"

    print("KERNEL_OK")
</pallas_src>

<mosaic_0001>
module attributes {stable_mosaic.version = 11 : i64} {
  func.func @_decoder_layer_kernel(%arg0: i32, %arg1: memref<1x8x32xf32, #tpu.memory_space<vmem>>, %arg2: memref<1x16x32xf32, #tpu.memory_space<vmem>>, %arg3: memref<1x8x32xf32, #tpu.memory_space<vmem>>, %arg4: memref<1x16x32xf32, #tpu.memory_space<vmem>>, %arg5: memref<32x32xbf16, #tpu.memory_space<vmem>>, %arg6: memref<1x32xf32, #tpu.memory_space<vmem>>, %arg7: memref<32x32xbf16, #tpu.memory_space<vmem>>, %arg8: memref<1x32xf32, #tpu.memory_space<vmem>>, %arg9: memref<32x32xbf16, #tpu.memory_space<vmem>>, %arg10: memref<1x32xf32, #tpu.memory_space<vmem>>, %arg11: memref<32x32xbf16, #tpu.memory_space<vmem>>, %arg12: memref<1x32xf32, #tpu.memory_space<vmem>>, %arg13: memref<32x32xbf16, #tpu.memory_space<vmem>>, %arg14: memref<1x32xf32, #tpu.memory_space<vmem>>, %arg15: memref<32x32xbf16, #tpu.memory_space<vmem>>, %arg16: memref<1x32xf32, #tpu.memory_space<vmem>>, %arg17: memref<32x32xbf16, #tpu.memory_space<vmem>>, %arg18: memref<1x32xf32, #tpu.memory_space<vmem>>, %arg19: memref<32x32xbf16, #tpu.memory_space<vmem>>, %arg20: memref<1x32xf32, #tpu.memory_space<vmem>>, %arg21: memref<32x64xbf16, #tpu.memory_space<vmem>>, %arg22: memref<1x64xf32, #tpu.memory_space<vmem>>, %arg23: memref<64x32xbf16, #tpu.memory_space<vmem>>, %arg24: memref<1x32xf32, #tpu.memory_space<vmem>>, %arg25: memref<1x32xf32, #tpu.memory_space<vmem>>, %arg26: memref<1x32xf32, #tpu.memory_space<vmem>>, %arg27: memref<1x32xf32, #tpu.memory_space<vmem>>, %arg28: memref<1x32xf32, #tpu.memory_space<vmem>>, %arg29: memref<1x32xf32, #tpu.memory_space<vmem>>, %arg30: memref<1x32xf32, #tpu.memory_space<vmem>>, %arg31: memref<1x8x32xf32, #tpu.memory_space<vmem>>, %arg32: memref<8x32xbf16, #tpu.memory_space<vmem>>) attributes {dimension_semantics = [#tpu.dimension_semantics<parallel>], iteration_bounds = array<i64: 2>, scalar_prefetch = 0 : i64, scratch_operands = 1 : i64, tpu.core_type = #tpu.core_type<tc>, window_params = [{transform_indices = @transform_0, window_bounds = array<i64: 1, 8, 32>}, {transform_indices = @transform_1, window_bounds = array<i64: 1, 16, 32>}, {transform_indices = @transform_2, window_bounds = array<i64: 1, 8, 32>}, {transform_indices = @transform_3, window_bounds = array<i64: 1, 16, 32>}, {pipeline_mode = #tpu.pipeline_mode<synchronous>, transform_indices = @transform_4, window_bounds = array<i64: 32, 32>}, {pipeline_mode = #tpu.pipeline_mode<synchronous>, transform_indices = @transform_5, window_bounds = array<i64: 1, 32>}, {pipeline_mode = #tpu.pipeline_mode<synchronous>, transform_indices = @transform_6, window_bounds = array<i64: 32, 32>}, {pipeline_mode = #tpu.pipeline_mode<synchronous>, transform_indices = @transform_7, window_bounds = array<i64: 1, 32>}, {pipeline_mode = #tpu.pipeline_mode<synchronous>, transform_indices = @transform_8, window_bounds = array<i64: 32, 32>}, {pipeline_mode = #tpu.pipeline_mode<synchronous>, transform_indices = @transform_9, window_bounds = array<i64: 1, 32>}, {pipeline_mode = #tpu.pipeline_mode<synchronous>, transform_indices = @transform_10, window_bounds = array<i64: 32, 32>}, {pipeline_mode = #tpu.pipeline_mode<synchronous>, transform_indices = @transform_11, window_bounds = array<i64: 1, 32>}, {pipeline_mode = #tpu.pipeline_mode<synchronous>, transform_indices = @transform_12, window_bounds = array<i64: 32, 32>}, {pipeline_mode = #tpu.pipeline_mode<synchronous>, transform_indices = @transform_13, window_bounds = array<i64: 1, 32>}, {pipeline_mode = #tpu.pipeline_mode<synchronous>, transform_indices = @transform_14, window_bounds = array<i64: 32, 32>}, {pipeline_mode = #tpu.pipeline_mode<synchronous>, transform_indices = @transform_15, window_bounds = array<i64: 1, 32>}, {pipeline_mode = #tpu.pipeline_mode<synchronous>, transform_indices = @transform_16, window_bounds = array<i64: 32, 32>}, {pipeline_mode = #tpu.pipeline_mode<synchronous>, transform_indices = @transform_17, window_bounds = array<i64: 1, 32>}, {pipeline_mode = #tpu.pipeline_mode<synchronous>, transform_indices = @transform_18, window_bounds = array<i64: 32, 32>}, {pipeline_mode = #tpu.pipeline_mode<synchronous>, transform_indices = @transform_19, window_bounds = array<i64: 1, 32>}, {pipeline_mode = #tpu.pipeline_mode<synchronous>, transform_indices = @transform_20, window_bounds = array<i64: 32, 64>}, {pipeline_mode = #tpu.pipeline_mode<synchronous>, transform_indices = @transform_21, window_bounds = array<i64: 1, 64>}, {pipeline_mode = #tpu.pipeline_mode<synchronous>, transform_indices = @transform_22, window_bounds = array<i64: 64, 32>}, {pipeline_mode = #tpu.pipeline_mode<synchronous>, transform_indices = @transform_23, window_bounds = array<i64: 1, 32>}, {pipeline_mode = #tpu.pipeline_mode<synchronous>, transform_indices = @transform_24, window_bounds = array<i64: 1, 32>}, {pipeline_mode = #tpu.pipeline_mode<synchronous>, transform_indices = @transform_25, window_bounds = array<i64: 1, 32>}, {pipeline_mode = #tpu.pipeline_mode<synchronous>, transform_indices = @transform_26, window_bounds = array<i64: 1, 32>}, {pipeline_mode = #tpu.pipeline_mode<synchronous>, transform_indices = @transform_27, window_bounds = array<i64: 1, 32>}, {pipeline_mode = #tpu.pipeline_mode<synchronous>, transform_indices = @transform_28, window_bounds = array<i64: 1, 32>}, {pipeline_mode = #tpu.pipeline_mode<synchronous>, transform_indices = @transform_29, window_bounds = array<i64: 1, 32>}, {transform_indices = @transform_30, window_bounds = array<i64: 1, 8, 32>}]} {
    %c0 = arith.constant 0 : index
    %c0_0 = arith.constant 0 : index
    %c0_1 = arith.constant 0 : index
    %0 = vector.load %arg1[%c0, %c0_0, %c0_1] : memref<1x8x32xf32, #tpu.memory_space<vmem>>, vector<1x8x32xf32>
    %1 = vector.shape_cast %0 : vector<1x8x32xf32> to vector<8x32xf32>
    %c0_2 = arith.constant 0 : index
    %c0_3 = arith.constant 0 : index
    %c0_4 = arith.constant 0 : index
    %2 = vector.load %arg3[%c0_2, %c0_3, %c0_4] : memref<1x8x32xf32, #tpu.memory_space<vmem>>, vector<1x8x32xf32>
    %3 = vector.shape_cast %2 : vector<1x8x32xf32> to vector<8x32xf32>
    %c0_5 = arith.constant 0 : index
    %c0_6 = arith.constant 0 : index
    %c0_7 = arith.constant 0 : index
    %4 = vector.load %arg2[%c0_5, %c0_6, %c0_7] : memref<1x16x32xf32, #tpu.memory_space<vmem>>, vector<1x16x32xf32>
    %5 = vector.shape_cast %4 : vector<1x16x32xf32> to vector<16x32xf32>
    %c0_8 = arith.constant 0 : index
    %c0_9 = arith.constant 0 : index
    %c0_10 = arith.constant 0 : index
    %6 = vector.load %arg4[%c0_8, %c0_9, %c0_10] : memref<1x16x32xf32, #tpu.memory_space<vmem>>, vector<1x16x32xf32>
    %7 = vector.shape_cast %6 : vector<1x16x32xf32> to vector<16x32xf32>
    %8 = arith.addf %1, %3 : vector<8x32xf32>
    %9 = arith.truncf %8 : vector<8x32xf32> to vector<8x32xbf16>
    %c0_11 = arith.constant 0 : index
    %c0_12 = arith.constant 0 : index
    %10 = vector.load %arg5[%c0_11, %c0_12] : memref<32x32xbf16, #tpu.memory_space<vmem>>, vector<32x32xbf16>
    %cst = arith.constant dense<0.000000e+00> : vector<8x32xf32>
    %11 = tpu.matmul %9, %10, %cst {dimension_numbers = #tpu.dot_dimension_numbers<[1], [0], [0], [1], [0, 0, 1, 1], [], []>} : vector<8x32xbf16>, vector<32x32xbf16>, vector<8x32xf32> -> vector<8x32xf32>
    %c0_13 = arith.constant 0 : index
    %c0_14 = arith.constant 0 : index
    %12 = vector.load %arg6[%c0_13, %c0_14] : memref<1x32xf32, #tpu.memory_space<vmem>>, vector<1x32xf32>
    %13 = vector.broadcast %12 : vector<1x32xf32> to vector<8x32xf32>
    %14 = arith.addf %11, %13 : vector<8x32xf32>
    %15 = arith.truncf %14 : vector<8x32xf32> to vector<8x32xbf16>
    %16 = arith.truncf %8 : vector<8x32xf32> to vector<8x32xbf16>
    %c0_15 = arith.constant 0 : index
    %c0_16 = arith.constant 0 : index
    %17 = vector.load %arg7[%c0_15, %c0_16] : memref<32x32xbf16, #tpu.memory_space<vmem>>, vector<32x32xbf16>
    %cst_17 = arith.constant dense<0.000000e+00> : vector<8x32xf32>
    %18 = tpu.matmul %16, %17, %cst_17 {dimension_numbers = #tpu.dot_dimension_numbers<[1], [0], [0], [1], [0, 0, 1, 1], [], []>} : vector<8x32xbf16>, vector<32x32xbf16>, vector<8x32xf32> -> vector<8x32xf32>
    %c0_18 = arith.constant 0 : index
    %c0_19 = arith.constant 0 : index
    %19 = vector.load %arg8[%c0_18, %c0_19] : memref<1x32xf32, #tpu.memory_space<vmem>>, vector<1x32xf32>
    %20 = vector.broadcast %19 : vector<1x32xf32> to vector<8x32xf32>
    %21 = arith.addf %18, %20 : vector<8x32xf32>
    %22 = arith.truncf %21 : vector<8x32xf32> to vector<8x32xbf16>
    %23 = arith.truncf %1 : vector<8x32xf32> to vector<8x32xbf16>
    %c0_20 = arith.constant 0 : index
    %c0_21 = arith.constant 0 : index
    %24 = vector.load %arg9[%c0_20, %c0_21] : memref<32x32xbf16, #tpu.memory_space<vmem>>, vector<32x32xbf16>
    %cst_22 = arith.constant dense<0.000000e+00> : vector<8x32xf32>
    %25 = tpu.matmul %23, %24, %cst_22 {dimension_numbers = #tpu.dot_dimension_numbers<[1], [0], [0], [1], [0, 0, 1, 1], [], []>} : vector<8x32xbf16>, vector<32x32xbf16>, vector<8x32xf32> -> vector<8x32xf32>
    %c0_23 = arith.constant 0 : index
    %c0_24 = arith.constant 0 : index
    %26 = vector.load %arg10[%c0_23, %c0_24] : memref<1x32xf32, #tpu.memory_space<vmem>>, vector<1x32xf32>
    %27 = vector.broadcast %26 : vector<1x32xf32> to vector<8x32xf32>
    %28 = arith.addf %25, %27 : vector<8x32xf32>
    %29 = arith.truncf %28 : vector<8x32xf32> to vector<8x32xbf16>
    %30 = vector.shape_cast %15 : vector<8x32xbf16> to vector<1x8x32xbf16>
    %31 = vector.shape_cast %22 : vector<8x32xbf16> to vector<1x8x32xbf16>
    %32 = vector.shape_cast %29 : vector<8x32xbf16> to vector<1x8x32xbf16>
    %33 = vector.extract_strided_slice %30 {offsets = [0, 0, 0], sizes = [1, 8, 8], strides = [1, 1, 1]} : vector<1x8x32xbf16> to vector<1x8x8xbf16>
    %34 = vector.extract_strided_slice %31 {offsets = [0, 0, 0], sizes = [1, 8, 8], strides = [1, 1, 1]} : vector<1x8x32xbf16> to vector<1x8x8xbf16>
    %35 = vector.extract_strided_slice %32 {offsets = [0, 0, 0], sizes = [1, 8, 8], strides = [1, 1, 1]} : vector<1x8x32xbf16> to vector<1x8x8xbf16>
    "tpu.trace_start"() <{level = 10 : i32, message = "bqd,bkd->bqk"}> : () -> ()
    %cst_25 = arith.constant dense<0.000000e+00> : vector<1x8x8xf32>
    %36 = tpu.matmul %33, %34, %cst_25 {dimension_numbers = #tpu.dot_dimension_numbers<[2], [2], [1], [1], [0, 0, 0, 1, 1, 1], [0], [0]>} : vector<1x8x8xbf16>, vector<1x8x8xbf16>, vector<1x8x8xf32> -> vector<1x8x8xf32>
    "tpu.trace_stop"() : () -> ()
    %cst_26 = arith.constant dense<0xFF800000> : vector<1x8xf32>
    %37 = vector.multi_reduction <maximumf>, %36, %cst_26 [2] : vector<1x8x8xf32> to vector<1x8xf32>
    %38 = vector.shape_cast %37 : vector<1x8xf32> to vector<1x8x1xf32>
    %39 = vector.broadcast %38 : vector<1x8x1xf32> to vector<1x8x8xf32>
    %40 = arith.subf %36, %39 : vector<1x8x8xf32>
    %41 = math.exp %40 : vector<1x8x8xf32>
    %cst_27 = arith.constant dense<0.000000e+00> : vector<1x8xf32>
    %42 = vector.multi_reduction <add>, %41, %cst_27 [2] : vector<1x8x8xf32> to vector<1x8xf32>
    %43 = vector.shape_cast %42 : vector<1x8xf32> to vector<1x8x1xf32>
    %44 = tpu.reciprocal %43 {approx = true} : vector<1x8x1xf32> -> vector<1x8x1xf32>
    %45 = vector.broadcast %44 : vector<1x8x1xf32> to vector<1x8x8xf32>
    %46 = arith.mulf %41, %45 : vector<1x8x8xf32>
    %47 = arith.truncf %46 : vector<1x8x8xf32> to vector<1x8x8xbf16>
    "tpu.trace_start"() <{level = 10 : i32, message = "bqk,bkd->bqd"}> : () -> ()
    %cst_28 = arith.constant dense<0.000000e+00> : vector<1x8x8xf32>
    %48 = tpu.matmul %47, %35, %cst_28 {dimension_numbers = #tpu.dot_dimension_numbers<[2], [1], [1], [2], [0, 0, 0, 1, 1, 2], [0], [0]>} : vector<1x8x8xbf16>, vector<1x8x8xbf16>, vector<1x8x8xf32> -> vector<1x8x8xf32>
    "tpu.trace_stop"() : () -> ()
    %49 = vector.shape_cast %48 : vector<1x8x8xf32> to vector<8x8xf32>
    %50 = arith.truncf %49 : vector<8x8xf32> to vector<8x8xbf16>
    %c0_29 = arith.constant 0 : index
    %c0_30 = arith.constant 0 : index
    %51 = vector.load %arg32[%c0_29, %c0_30] : memref<8x32xbf16, #tpu.memory_space<vmem>>, vector<8x8xbf16>
    tpu.vector_store %arg32[%c0_29, %c0_30], %50 {strides = array<i32>} : memref<8x32xbf16, #tpu.memory_space<vmem>>, vector<8x8xbf16>,
    %52 = vector.extract_strided_slice %30 {offsets = [0, 0, 8], sizes = [1, 8, 8], strides = [1, 1, 1]} : vector<1x8x32xbf16> to vector<1x8x8xbf16>
    %53 = vector.extract_strided_slice %31 {offsets = [0, 0, 8], sizes = [1, 8, 8], strides = [1, 1, 1]} : vector<1x8x32xbf16> to vector<1x8x8xbf16>
    %54 = vector.extract_strided_slice %32 {offsets = [0, 0, 8], sizes = [1, 8, 8], strides = [1, 1, 1]} : vector<1x8x32xbf16> to vector<1x8x8xbf16>
    "tpu.trace_start"() <{level = 10 : i32, message = "bqd,bkd->bqk"}> : () -> ()
    %cst_31 = arith.constant dense<0.000000e+00> : vector<1x8x8xf32>
    %55 = tpu.matmul %52, %53, %cst_31 {dimension_numbers = #tpu.dot_dimension_numbers<[2], [2], [1], [1], [0, 0, 0, 1, 1, 1], [0], [0]>} : vector<1x8x8xbf16>, vector<1x8x8xbf16>, vector<1x8x8xf32> -> vector<1x8x8xf32>
    "tpu.trace_stop"() : () -> ()
    %cst_32 = arith.constant dense<0xFF800000> : vector<1x8xf32>
    %56 = vector.multi_reduction <maximumf>, %55, %cst_32 [2] : vector<1x8x8xf32> to vector<1x8xf32>
    %57 = vector.shape_cast %56 : vector<1x8xf32> to vector<1x8x1xf32>
    %58 = vector.broadcast %57 : vector<1x8x1xf32> to vector<1x8x8xf32>
    %59 = arith.subf %55, %58 : vector<1x8x8xf32>
    %60 = math.exp %59 : vector<1x8x8xf32>
    %cst_33 = arith.constant dense<0.000000e+00> : vector<1x8xf32>
    %61 = vector.multi_reduction <add>, %60, %cst_33 [2] : vector<1x8x8xf32> to vector<1x8xf32>
    %62 = vector.shape_cast %61 : vector<1x8xf32> to vector<1x8x1xf32>
    %63 = tpu.reciprocal %62 {approx = true} : vector<1x8x1xf32> -> vector<1x8x1xf32>
    %64 = vector.broadcast %63 : vector<1x8x1xf32> to vector<1x8x8xf32>
    %65 = arith.mulf %60, %64 : vector<1x8x8xf32>
    %66 = arith.truncf %65 : vector<1x8x8xf32> to vector<1x8x8xbf16>
    "tpu.trace_start"() <{level = 10 : i32, message = "bqk,bkd->bqd"}> : () -> ()
    %cst_34 = arith.constant dense<0.000000e+00> : vector<1x8x8xf32>
    %67 = tpu.matmul %66, %54, %cst_34 {dimension_numbers = #tpu.dot_dimension_numbers<[2], [1], [1], [2], [0, 0, 0, 1, 1, 2], [0], [0]>} : vector<1x8x8xbf16>, vector<1x8x8xbf16>, vector<1x8x8xf32> -> vector<1x8x8xf32>
    "tpu.trace_stop"() : () -> ()
    %68 = vector.shape_cast %67 : vector<1x8x8xf32> to vector<8x8xf32>
    %69 = arith.truncf %68 : vector<8x8xf32> to vector<8x8xbf16>
    %c0_35 = arith.constant 0 : index
    %c8 = arith.constant 8 : index
    %70 = vector.load %arg32[%c0_35, %c8] : memref<8x32xbf16, #tpu.memory_space<vmem>>, vector<8x8xbf16>
    tpu.vector_store %arg32[%c0_35, %c8], %69 {strides = array<i32>} : memref<8x32xbf16, #tpu.memory_space<vmem>>, vector<8x8xbf16>,
    %71 = vector.extract_strided_slice %30 {offsets = [0, 0, 16], sizes = [1, 8, 8], strides = [1, 1, 1]} : vector<1x8x32xbf16> to vector<1x8x8xbf16>
    %72 = vector.extract_strided_slice %31 {offsets = [0, 0, 16], sizes = [1, 8, 8], strides = [1, 1, 1]} : vector<1x8x32xbf16> to vector<1x8x8xbf16>
    %73 = vector.extract_strided_slice %32 {offsets = [0, 0, 16], sizes = [1, 8, 8], strides = [1, 1, 1]} : vector<1x8x32xbf16> to vector<1x8x8xbf16>
    "tpu.trace_start"() <{level = 10 : i32, message = "bqd,bkd->bqk"}> : () -> ()
    %cst_36 = arith.constant dense<0.000000e+00> : vector<1x8x8xf32>
    %74 = tpu.matmul %71, %72, %cst_36 {dimension_numbers = #tpu.dot_dimension_numbers<[2], [2], [1], [1], [0, 0, 0, 1, 1, 1], [0], [0]>} : vector<1x8x8xbf16>, vector<1x8x8xbf16>, vector<1x8x8xf32> -> vector<1x8x8xf32>
    "tpu.trace_stop"() : () -> ()
    %cst_37 = arith.constant dense<0xFF800000> : vector<1x8xf32>
    %75 = vector.multi_reduction <maximumf>, %74, %cst_37 [2] : vector<1x8x8xf32> to vector<1x8xf32>
    %76 = vector.shape_cast %75 : vector<1x8xf32> to vector<1x8x1xf32>
    %77 = vector.broadcast %76 : vector<1x8x1xf32> to vector<1x8x8xf32>
    %78 = arith.subf %74, %77 : vector<1x8x8xf32>
    %79 = math.exp %78 : vector<1x8x8xf32>
    %cst_38 = arith.constant dense<0.000000e+00> : vector<1x8xf32>
    %80 = vector.multi_reduction <add>, %79, %cst_38 [2] : vector<1x8x8xf32> to vector<1x8xf32>
    %81 = vector.shape_cast %80 : vector<1x8xf32> to vector<1x8x1xf32>
    %82 = tpu.reciprocal %81 {approx = true} : vector<1x8x1xf32> -> vector<1x8x1xf32>
    %83 = vector.broadcast %82 : vector<1x8x1xf32> to vector<1x8x8xf32>
    %84 = arith.mulf %79, %83 : vector<1x8x8xf32>
    %85 = arith.truncf %84 : vector<1x8x8xf32> to vector<1x8x8xbf16>
    "tpu.trace_start"() <{level = 10 : i32, message = "bqk,bkd->bqd"}> : () -> ()
    %cst_39 = arith.constant dense<0.000000e+00> : vector<1x8x8xf32>
    %86 = tpu.matmul %85, %73, %cst_39 {dimension_numbers = #tpu.dot_dimension_numbers<[2], [1], [1], [2], [0, 0, 0, 1, 1, 2], [0], [0]>} : vector<1x8x8xbf16>, vector<1x8x8xbf16>, vector<1x8x8xf32> -> vector<1x8x8xf32>
    "tpu.trace_stop"() : () -> ()
    %87 = vector.shape_cast %86 : vector<1x8x8xf32> to vector<8x8xf32>
    %88 = arith.truncf %87 : vector<8x8xf32> to vector<8x8xbf16>
    %c0_40 = arith.constant 0 : index
    %c16 = arith.constant 16 : index
    %89 = vector.load %arg32[%c0_40, %c16] : memref<8x32xbf16, #tpu.memory_space<vmem>>, vector<8x8xbf16>
    tpu.vector_store %arg32[%c0_40, %c16], %88 {strides = array<i32>} : memref<8x32xbf16, #tpu.memory_space<vmem>>, vector<8x8xbf16>,
    %90 = vector.extract_strided_slice %30 {offsets = [0, 0, 24], sizes = [1, 8, 8], strides = [1, 1, 1]} : vector<1x8x32xbf16> to vector<1x8x8xbf16>
    %91 = vector.extract_strided_slice %31 {offsets = [0, 0, 24], sizes = [1, 8, 8], strides = [1, 1, 1]} : vector<1x8x32xbf16> to vector<1x8x8xbf16>
    %92 = vector.extract_strided_slice %32 {offsets = [0, 0, 24], sizes = [1, 8, 8], strides = [1, 1, 1]} : vector<1x8x32xbf16> to vector<1x8x8xbf16>
    "tpu.trace_start"() <{level = 10 : i32, message = "bqd,bkd->bqk"}> : () -> ()
    %cst_41 = arith.constant dense<0.000000e+00> : vector<1x8x8xf32>
    %93 = tpu.matmul %90, %91, %cst_41 {dimension_numbers = #tpu.dot_dimension_numbers<[2], [2], [1], [1], [0, 0, 0, 1, 1, 1], [0], [0]>} : vector<1x8x8xbf16>, vector<1x8x8xbf16>, vector<1x8x8xf32> -> vector<1x8x8xf32>
    "tpu.trace_stop"() : () -> ()
    %cst_42 = arith.constant dense<0xFF800000> : vector<1x8xf32>
    %94 = vector.multi_reduction <maximumf>, %93, %cst_42 [2] : vector<1x8x8xf32> to vector<1x8xf32>
    %95 = vector.shape_cast %94 : vector<1x8xf32> to vector<1x8x1xf32>
    %96 = vector.broadcast %95 : vector<1x8x1xf32> to vector<1x8x8xf32>
    %97 = arith.subf %93, %96 : vector<1x8x8xf32>
    %98 = math.exp %97 : vector<1x8x8xf32>
    %cst_43 = arith.constant dense<0.000000e+00> : vector<1x8xf32>
    %99 = vector.multi_reduction <add>, %98, %cst_43 [2] : vector<1x8x8xf32> to vector<1x8xf32>
    %100 = vector.shape_cast %99 : vector<1x8xf32> to vector<1x8x1xf32>
    %101 = tpu.reciprocal %100 {approx = true} : vector<1x8x1xf32> -> vector<1x8x1xf32>
    %102 = vector.broadcast %101 : vector<1x8x1xf32> to vector<1x8x8xf32>
    %103 = arith.mulf %98, %102 : vector<1x8x8xf32>
    %104 = arith.truncf %103 : vector<1x8x8xf32> to vector<1x8x8xbf16>
    "tpu.trace_start"() <{level = 10 : i32, message = "bqk,bkd->bqd"}> : () -> ()
    %cst_44 = arith.constant dense<0.000000e+00> : vector<1x8x8xf32>
    %105 = tpu.matmul %104, %92, %cst_44 {dimension_numbers = #tpu.dot_dimension_numbers<[2], [1], [1], [2], [0, 0, 0, 1, 1, 2], [0], [0]>} : vector<1x8x8xbf16>, vector<1x8x8xbf16>, vector<1x8x8xf32> -> vector<1x8x8xf32>
    "tpu.trace_stop"() : () -> ()
    %106 = vector.shape_cast %105 : vector<1x8x8xf32> to vector<8x8xf32>
    %107 = arith.truncf %106 : vector<8x8xf32> to vector<8x8xbf16>
    %c0_45 = arith.constant 0 : index
    %c24 = arith.constant 24 : index
    %108 = vector.load %arg32[%c0_45, %c24] : memref<8x32xbf16, #tpu.memory_space<vmem>>, vector<8x8xbf16>
    tpu.vector_store %arg32[%c0_45, %c24], %107 {strides = array<i32>} : memref<8x32xbf16, #tpu.memory_space<vmem>>, vector<8x8xbf16>,
    %c0_46 = arith.constant 0 : index
    %c0_47 = arith.constant 0 : index
    %109 = vector.load %arg32[%c0_46, %c0_47] : memref<8x32xbf16, #tpu.memory_space<vmem>>, vector<8x32xbf16>
    %c0_48 = arith.constant 0 : index
    %c0_49 = arith.constant 0 : index
    %110 = vector.load %arg11[%c0_48, %c0_49] : memref<32x32xbf16, #tpu.memory_space<vmem>>, vector<32x32xbf16>
    %cst_50 = arith.constant dense<0.000000e+00> : vector<8x32xf32>
    %111 = tpu.matmul %109, %110, %cst_50 {dimension_numbers = #tpu.dot_dimension_numbers<[1], [0], [0], [1], [0, 0, 1, 1], [], []>} : vector<8x32xbf16>, vector<32x32xbf16>, vector<8x32xf32> -> vector<8x32xf32>
    %c0_51 = arith.constant 0 : index
    %c0_52 = arith.constant 0 : index
    %112 = vector.load %arg12[%c0_51, %c0_52] : memref<1x32xf32, #tpu.memory_space<vmem>>, vector<1x32xf32>
    %113 = vector.broadcast %112 : vector<1x32xf32> to vector<8x32xf32>
    %114 = arith.addf %111, %113 : vector<8x32xf32>
    %115 = arith.addf %1, %114 : vector<8x32xf32>
    %cst_53 = arith.constant dense<0.000000e+00> : vector<8xf32>
    %116 = vector.multi_reduction <add>, %115, %cst_53 [1] : vector<8x32xf32> to vector<8xf32>
    %117 = vector.shape_cast %116 : vector<8xf32> to vector<8x1xf32>
    %cst_54 = arith.constant 3.200000e+01 : f32
    %118 = vector.broadcast %cst_54 : f32 to vector<8x1xf32>
    %119 = arith.divf %117, %118 : vector<8x1xf32>
    %120 = vector.broadcast %119 : vector<8x1xf32> to vector<8x32xf32>
    %121 = arith.subf %115, %120 : vector<8x32xf32>
    %122 = arith.mulf %121, %121 : vector<8x32xf32>
    %cst_55 = arith.constant dense<0.000000e+00> : vector<8xf32>
    %123 = vector.multi_reduction <add>, %122, %cst_55 [1] : vector<8x32xf32> to vector<8xf32>
    %124 = vector.shape_cast %123 : vector<8xf32> to vector<8x1xf32>
    %cst_56 = arith.constant 3.200000e+01 : f32
    %125 = vector.broadcast %cst_56 : f32 to vector<8x1xf32>
    %126 = arith.divf %124, %125 : vector<8x1xf32>
    %cst_57 = arith.constant 9.99999974E-6 : f32
    %127 = vector.broadcast %cst_57 : f32 to vector<8x1xf32>
    %128 = arith.addf %126, %127 : vector<8x1xf32>
    %129 = math.rsqrt %128 : vector<8x1xf32>
    %130 = vector.broadcast %129 : vector<8x1xf32> to vector<8x32xf32>
    %131 = arith.mulf %121, %130 : vector<8x32xf32>
    %c0_58 = arith.constant 0 : index
    %c0_59 = arith.constant 0 : index
    %132 = vector.load %arg25[%c0_58, %c0_59] : memref<1x32xf32, #tpu.memory_space<vmem>>, vector<1x32xf32>
    %133 = vector.broadcast %132 : vector<1x32xf32> to vector<8x32xf32>
    %134 = arith.mulf %131, %133 : vector<8x32xf32>
    %c0_60 = arith.constant 0 : index
    %c0_61 = arith.constant 0 : index
    %135 = vector.load %arg26[%c0_60, %c0_61] : memref<1x32xf32, #tpu.memory_space<vmem>>, vector<1x32xf32>
    %136 = vector.broadcast %135 : vector<1x32xf32> to vector<8x32xf32>
    %137 = arith.addf %134, %136 : vector<8x32xf32>
    %138 = arith.addf %137, %3 : vector<8x32xf32>
    %139 = arith.addf %5, %7 : vector<16x32xf32>
    %140 = arith.truncf %138 : vector<8x32xf32> to vector<8x32xbf16>
    %c0_62 = arith.constant 0 : index
    %c0_63 = arith.constant 0 : index
    %141 = vector.load %arg13[%c0_62, %c0_63] : memref<32x32xbf16, #tpu.memory_space<vmem>>, vector<32x32xbf16>
    %cst_64 = arith.constant dense<0.000000e+00> : vector<8x32xf32>
    %142 = tpu.matmul %140, %141, %cst_64 {dimension_numbers = #tpu.dot_dimension_numbers<[1], [0], [0], [1], [0, 0, 1, 1], [], []>} : vector<8x32xbf16>, vector<32x32xbf16>, vector<8x32xf32> -> vector<8x32xf32>
    %c0_65 = arith.constant 0 : index
    %c0_66 = arith.constant 0 : index
    %143 = vector.load %arg14[%c0_65, %c0_66] : memref<1x32xf32, #tpu.memory_space<vmem>>, vector<1x32xf32>
    %144 = vector.broadcast %143 : vector<1x32xf32> to vector<8x32xf32>
    %145 = arith.addf %142, %144 : vector<8x32xf32>
    %146 = arith.truncf %145 : vector<8x32xf32> to vector<8x32xbf16>
    %147 = arith.truncf %139 : vector<16x32xf32> to vector<16x32xbf16>
    %c0_67 = arith.constant 0 : index
    %c0_68 = arith.constant 0 : index
    %148 = vector.load %arg15[%c0_67, %c0_68] : memref<32x32xbf16, #tpu.memory_space<vmem>>, vector<32x32xbf16>
    %cst_69 = arith.constant dense<0.000000e+00> : vector<16x32xf32>
    %149 = tpu.matmul %147, %148, %cst_69 {dimension_numbers = #tpu.dot_dimension_numbers<[1], [0], [0], [1], [0, 0, 1, 1], [], []>} : vector<16x32xbf16>, vector<32x32xbf16>, vector<16x32xf32> -> vector<16x32xf32>
    %c0_70 = arith.constant 0 : index
    %c0_71 = arith.constant 0 : index
    %150 = vector.load %arg16[%c0_70, %c0_71] : memref<1x32xf32, #tpu.memory_space<vmem>>, vector<1x32xf32>
    %151 = vector.broadcast %150 : vector<1x32xf32> to vector<16x32xf32>
    %152 = arith.addf %149, %151 : vector<16x32xf32>
    %153 = arith.truncf %152 : vector<16x32xf32> to vector<16x32xbf16>
    %154 = arith.truncf %5 : vector<16x32xf32> to vector<16x32xbf16>
    %c0_72 = arith.constant 0 : index
    %c0_73 = arith.constant 0 : index
    %155 = vector.load %arg17[%c0_72, %c0_73] : memref<32x32xbf16, #tpu.memory_space<vmem>>, vector<32x32xbf16>
    %cst_74 = arith.constant dense<0.000000e+00> : vector<16x32xf32>
    %156 = tpu.matmul %154, %155, %cst_74 {dimension_numbers = #tpu.dot_dimension_numbers<[1], [0], [0], [1], [0, 0, 1, 1], [], []>} : vector<16x32xbf16>, vector<32x32xbf16>, vector<16x32xf32> -> vector<16x32xf32>
    %c0_75 = arith.constant 0 : index
    %c0_76 = arith.constant 0 : index
    %157 = vector.load %arg18[%c0_75, %c0_76] : memref<1x32xf32, #tpu.memory_space<vmem>>, vector<1x32xf32>
    %158 = vector.broadcast %157 : vector<1x32xf32> to vector<16x32xf32>
    %159 = arith.addf %156, %158 : vector<16x32xf32>
    %160 = arith.truncf %159 : vector<16x32xf32> to vector<16x32xbf16>
    %161 = vector.shape_cast %146 : vector<8x32xbf16> to vector<1x8x32xbf16>
    %162 = vector.shape_cast %153 : vector<16x32xbf16> to vector<1x16x32xbf16>
    %163 = vector.shape_cast %160 : vector<16x32xbf16> to vector<1x16x32xbf16>
    %164 = vector.extract_strided_slice %161 {offsets = [0, 0, 0], sizes = [1, 8, 8], strides = [1, 1, 1]} : vector<1x8x32xbf16> to vector<1x8x8xbf16>
    %165 = vector.extract_strided_slice %162 {offsets = [0, 0, 0], sizes = [1, 16, 8], strides = [1, 1, 1]} : vector<1x16x32xbf16> to vector<1x16x8xbf16>
    %166 = vector.extract_strided_slice %163 {offsets = [0, 0, 0], sizes = [1, 16, 8], strides = [1, 1, 1]} : vector<1x16x32xbf16> to vector<1x16x8xbf16>
    "tpu.trace_start"() <{level = 10 : i32, message = "bqd,bkd->bqk"}> : () -> ()
    %cst_77 = arith.constant dense<0.000000e+00> : vector<1x8x16xf32>
    %167 = tpu.matmul %164, %165, %cst_77 {dimension_numbers = #tpu.dot_dimension_numbers<[2], [2], [1], [1], [0, 0, 0, 1, 1, 1], [0], [0]>} : vector<1x8x8xbf16>, vector<1x16x8xbf16>, vector<1x8x16xf32> -> vector<1x8x16xf32>
    "tpu.trace_stop"() : () -> ()
    %cst_78 = arith.constant dense<0xFF800000> : vector<1x8xf32>
    %168 = vector.multi_reduction <maximumf>, %167, %cst_78 [2] : vector<1x8x16xf32> to vector<1x8xf32>
    %169 = vector.shape_cast %168 : vector<1x8xf32> to vector<1x8x1xf32>
    %170 = vector.broadcast %169 : vector<1x8x1xf32> to vector<1x8x16xf32>
    %171 = arith.subf %167, %170 : vector<1x8x16xf32>
    %172 = math.exp %171 : vector<1x8x16xf32>
    %cst_79 = arith.constant dense<0.000000e+00> : vector<1x8xf32>
    %173 = vector.multi_reduction <add>, %172, %cst_79 [2] : vector<1x8x16xf32> to vector<1x8xf32>
    %174 = vector.shape_cast %173 : vector<1x8xf32> to vector<1x8x1xf32>
    %175 = tpu.reciprocal %174 {approx = true} : vector<1x8x1xf32> -> vector<1x8x1xf32>
    %176 = vector.broadcast %175 : vector<1x8x1xf32> to vector<1x8x16xf32>
    %177 = arith.mulf %172, %176 : vector<1x8x16xf32>
    %178 = arith.truncf %177 : vector<1x8x16xf32> to vector<1x8x16xbf16>
    "tpu.trace_start"() <{level = 10 : i32, message = "bqk,bkd->bqd"}> : () -> ()
    %cst_80 = arith.constant dense<0.000000e+00> : vector<1x8x8xf32>
    %179 = tpu.matmul %178, %166, %cst_80 {dimension_numbers = #tpu.dot_dimension_numbers<[2], [1], [1], [2], [0, 0, 0, 1, 1, 2], [0], [0]>} : vector<1x8x16xbf16>, vector<1x16x8xbf16>, vector<1x8x8xf32> -> vector<1x8x8xf32>
    "tpu.trace_stop"() : () -> ()
    %180 = vector.shape_cast %179 : vector<1x8x8xf32> to vector<8x8xf32>
    %181 = arith.truncf %180 : vector<8x8xf32> to vector<8x8xbf16>
    %c0_81 = arith.constant 0 : index
    %c0_82 = arith.constant 0 : index
    %182 = vector.load %arg32[%c0_81, %c0_82] : memref<8x32xbf16, #tpu.memory_space<vmem>>, vector<8x8xbf16>
    tpu.vector_store %arg32[%c0_81, %c0_82], %181 {strides = array<i32>} : memref<8x32xbf16, #tpu.memory_space<vmem>>, vector<8x8xbf16>,
    %183 = vector.extract_strided_slice %161 {offsets = [0, 0, 8], sizes = [1, 8, 8], strides = [1, 1, 1]} : vector<1x8x32xbf16> to vector<1x8x8xbf16>
    %184 = vector.extract_strided_slice %162 {offsets = [0, 0, 8], sizes = [1, 16, 8], strides = [1, 1, 1]} : vector<1x16x32xbf16> to vector<1x16x8xbf16>
    %185 = vector.extract_strided_slice %163 {offsets = [0, 0, 8], sizes = [1, 16, 8], strides = [1, 1, 1]} : vector<1x16x32xbf16> to vector<1x16x8xbf16>
    "tpu.trace_start"() <{level = 10 : i32, message = "bqd,bkd->bqk"}> : () -> ()
    %cst_83 = arith.constant dense<0.000000e+00> : vector<1x8x16xf32>
    %186 = tpu.matmul %183, %184, %cst_83 {dimension_numbers = #tpu.dot_dimension_numbers<[2], [2], [1], [1], [0, 0, 0, 1, 1, 1], [0], [0]>} : vector<1x8x8xbf16>, vector<1x16x8xbf16>, vector<1x8x16xf32> -> vector<1x8x16xf32>
    "tpu.trace_stop"() : () -> ()
    %cst_84 = arith.constant dense<0xFF800000> : vector<1x8xf32>
    %187 = vector.multi_reduction <maximumf>, %186, %cst_84 [2] : vector<1x8x16xf32> to vector<1x8xf32>
    %188 = vector.shape_cast %187 : vector<1x8xf32> to vector<1x8x1xf32>
    %189 = vector.broadcast %188 : vector<1x8x1xf32> to vector<1x8x16xf32>
    %190 = arith.subf %186, %189 : vector<1x8x16xf32>
    %191 = math.exp %190 : vector<1x8x16xf32>
    %cst_85 = arith.constant dense<0.000000e+00> : vector<1x8xf32>
    %192 = vector.multi_reduction <add>, %191, %cst_85 [2] : vector<1x8x16xf32> to vector<1x8xf32>
    %193 = vector.shape_cast %192 : vector<1x8xf32> to vector<1x8x1xf32>
    %194 = tpu.reciprocal %193 {approx = true} : vector<1x8x1xf32> -> vector<1x8x1xf32>
    %195 = vector.broadcast %194 : vector<1x8x1xf32> to vector<1x8x16xf32>
    %196 = arith.mulf %191, %195 : vector<1x8x16xf32>
    %197 = arith.truncf %196 : vector<1x8x16xf32> to vector<1x8x16xbf16>
    "tpu.trace_start"() <{level = 10 : i32, message = "bqk,bkd->bqd"}> : () -> ()
    %cst_86 = arith.constant dense<0.000000e+00> : vector<1x8x8xf32>
    %198 = tpu.matmul %197, %185, %cst_86 {dimension_numbers = #tpu.dot_dimension_numbers<[2], [1], [1], [2], [0, 0, 0, 1, 1, 2], [0], [0]>} : vector<1x8x16xbf16>, vector<1x16x8xbf16>, vector<1x8x8xf32> -> vector<1x8x8xf32>
    "tpu.trace_stop"() : () -> ()
    %199 = vector.shape_cast %198 : vector<1x8x8xf32> to vector<8x8xf32>
    %200 = arith.truncf %199 : vector<8x8xf32> to vector<8x8xbf16>
    %c0_87 = arith.constant 0 : index
    %c8_88 = arith.constant 8 : index
    %201 = vector.load %arg32[%c0_87, %c8_88] : memref<8x32xbf16, #tpu.memory_space<vmem>>, vector<8x8xbf16>
    tpu.vector_store %arg32[%c0_87, %c8_88], %200 {strides = array<i32>} : memref<8x32xbf16, #tpu.memory_space<vmem>>, vector<8x8xbf16>,
    %202 = vector.extract_strided_slice %161 {offsets = [0, 0, 16], sizes = [1, 8, 8], strides = [1, 1, 1]} : vector<1x8x32xbf16> to vector<1x8x8xbf16>
    %203 = vector.extract_strided_slice %162 {offsets = [0, 0, 16], sizes = [1, 16, 8], strides = [1, 1, 1]} : vector<1x16x32xbf16> to vector<1x16x8xbf16>
    %204 = vector.extract_strided_slice %163 {offsets = [0, 0, 16], sizes = [1, 16, 8], strides = [1, 1, 1]} : vector<1x16x32xbf16> to vector<1x16x8xbf16>
    "tpu.trace_start"() <{level = 10 : i32, message = "bqd,bkd->bqk"}> : () -> ()
    %cst_89 = arith.constant dense<0.000000e+00> : vector<1x8x16xf32>
    %205 = tpu.matmul %202, %203, %cst_89 {dimension_numbers = #tpu.dot_dimension_numbers<[2], [2], [1], [1], [0, 0, 0, 1, 1, 1], [0], [0]>} : vector<1x8x8xbf16>, vector<1x16x8xbf16>, vector<1x8x16xf32> -> vector<1x8x16xf32>
    "tpu.trace_stop"() : () -> ()
    %cst_90 = arith.constant dense<0xFF800000> : vector<1x8xf32>
    %206 = vector.multi_reduction <maximumf>, %205, %cst_90 [2] : vector<1x8x16xf32> to vector<1x8xf32>
    %207 = vector.shape_cast %206 : vector<1x8xf32> to vector<1x8x1xf32>
    %208 = vector.broadcast %207 : vector<1x8x1xf32> to vector<1x8x16xf32>
    %209 = arith.subf %205, %208 : vector<1x8x16xf32>
    %210 = math.exp %209 : vector<1x8x16xf32>
    %cst_91 = arith.constant dense<0.000000e+00> : vector<1x8xf32>
    %211 = vector.multi_reduction <add>, %210, %cst_91 [2] : vector<1x8x16xf32> to vector<1x8xf32>
    %212 = vector.shape_cast %211 : vector<1x8xf32> to vector<1x8x1xf32>
    %213 = tpu.reciprocal %212 {approx = true} : vector<1x8x1xf32> -> vector<1x8x1xf32>
    %214 = vector.broadcast %213 : vector<1x8x1xf32> to vector<1x8x16xf32>
    %215 = arith.mulf %210, %214 : vector<1x8x16xf32>
    %216 = arith.truncf %215 : vector<1x8x16xf32> to vector<1x8x16xbf16>
    "tpu.trace_start"() <{level = 10 : i32, message = "bqk,bkd->bqd"}> : () -> ()
    %cst_92 = arith.constant dense<0.000000e+00> : vector<1x8x8xf32>
    %217 = tpu.matmul %216, %204, %cst_92 {dimension_numbers = #tpu.dot_dimension_numbers<[2], [1], [1], [2], [0, 0, 0, 1, 1, 2], [0], [0]>} : vector<1x8x16xbf16>, vector<1x16x8xbf16>, vector<1x8x8xf32> -> vector<1x8x8xf32>
    "tpu.trace_stop"() : () -> ()
    %218 = vector.shape_cast %217 : vector<1x8x8xf32> to vector<8x8xf32>
    %219 = arith.truncf %218 : vector<8x8xf32> to vector<8x8xbf16>
    %c0_93 = arith.constant 0 : index
    %c16_94 = arith.constant 16 : index
    %220 = vector.load %arg32[%c0_93, %c16_94] : memref<8x32xbf16, #tpu.memory_space<vmem>>, vector<8x8xbf16>
    tpu.vector_store %arg32[%c0_93, %c16_94], %219 {strides = array<i32>} : memref<8x32xbf16, #tpu.memory_space<vmem>>, vector<8x8xbf16>,
    %221 = vector.extract_strided_slice %161 {offsets = [0, 0, 24], sizes = [1, 8, 8], strides = [1, 1, 1]} : vector<1x8x32xbf16> to vector<1x8x8xbf16>
    %222 = vector.extract_strided_slice %162 {offsets = [0, 0, 24], sizes = [1, 16, 8], strides = [1, 1, 1]} : vector<1x16x32xbf16> to vector<1x16x8xbf16>
    %223 = vector.extract_strided_slice %163 {offsets = [0, 0, 24], sizes = [1, 16, 8], strides = [1, 1, 1]} : vector<1x16x32xbf16> to vector<1x16x8xbf16>
    "tpu.trace_start"() <{level = 10 : i32, message = "bqd,bkd->bqk"}> : () -> ()
    %cst_95 = arith.constant dense<0.000000e+00> : vector<1x8x16xf32>
    %224 = tpu.matmul %221, %222, %cst_95 {dimension_numbers = #tpu.dot_dimension_numbers<[2], [2], [1], [1], [0, 0, 0, 1, 1, 1], [0], [0]>} : vector<1x8x8xbf16>, vector<1x16x8xbf16>, vector<1x8x16xf32> -> vector<1x8x16xf32>
    "tpu.trace_stop"() : () -> ()
    %cst_96 = arith.constant dense<0xFF800000> : vector<1x8xf32>
    %225 = vector.multi_reduction <maximumf>, %224, %cst_96 [2] : vector<1x8x16xf32> to vector<1x8xf32>
    %226 = vector.shape_cast %225 : vector<1x8xf32> to vector<1x8x1xf32>
    %227 = vector.broadcast %226 : vector<1x8x1xf32> to vector<1x8x16xf32>
    %228 = arith.subf %224, %227 : vector<1x8x16xf32>
    %229 = math.exp %228 : vector<1x8x16xf32>
    %cst_97 = arith.constant dense<0.000000e+00> : vector<1x8xf32>
    %230 = vector.multi_reduction <add>, %229, %cst_97 [2] : vector<1x8x16xf32> to vector<1x8xf32>
    %231 = vector.shape_cast %230 : vector<1x8xf32> to vector<1x8x1xf32>
    %232 = tpu.reciprocal %231 {approx = true} : vector<1x8x1xf32> -> vector<1x8x1xf32>
    %233 = vector.broadcast %232 : vector<1x8x1xf32> to vector<1x8x16xf32>
    %234 = arith.mulf %229, %233 : vector<1x8x16xf32>
    %235 = arith.truncf %234 : vector<1x8x16xf32> to vector<1x8x16xbf16>
    "tpu.trace_start"() <{level = 10 : i32, message = "bqk,bkd->bqd"}> : () -> ()
    %cst_98 = arith.constant dense<0.000000e+00> : vector<1x8x8xf32>
    %236 = tpu.matmul %235, %223, %cst_98 {dimension_numbers = #tpu.dot_dimension_numbers<[2], [1], [1], [2], [0, 0, 0, 1, 1, 2], [0], [0]>} : vector<1x8x16xbf16>, vector<1x16x8xbf16>, vector<1x8x8xf32> -> vector<1x8x8xf32>
    "tpu.trace_stop"() : () -> ()
    %237 = vector.shape_cast %236 : vector<1x8x8xf32> to vector<8x8xf32>
    %238 = arith.truncf %237 : vector<8x8xf32> to vector<8x8xbf16>
    %c0_99 = arith.constant 0 : index
    %c24_100 = arith.constant 24 : index
    %239 = vector.load %arg32[%c0_99, %c24_100] : memref<8x32xbf16, #tpu.memory_space<vmem>>, vector<8x8xbf16>
    tpu.vector_store %arg32[%c0_99, %c24_100], %238 {strides = array<i32>} : memref<8x32xbf16, #tpu.memory_space<vmem>>, vector<8x8xbf16>,
    %c0_101 = arith.constant 0 : index
    %c0_102 = arith.constant 0 : index
    %240 = vector.load %arg32[%c0_101, %c0_102] : memref<8x32xbf16, #tpu.memory_space<vmem>>, vector<8x32xbf16>
    %c0_103 = arith.constant 0 : index
    %c0_104 = arith.constant 0 : index
    %241 = vector.load %arg19[%c0_103, %c0_104] : memref<32x32xbf16, #tpu.memory_space<vmem>>, vector<32x32xbf16>
    %cst_105 = arith.constant dense<0.000000e+00> : vector<8x32xf32>
    %242 = tpu.matmul %240, %241, %cst_105 {dimension_numbers = #tpu.dot_dimension_numbers<[1], [0], [0], [1], [0, 0, 1, 1], [], []>} : vector<8x32xbf16>, vector<32x32xbf16>, vector<8x32xf32> -> vector<8x32xf32>
    %c0_106 = arith.constant 0 : index
    %c0_107 = arith.constant 0 : index
    %243 = vector.load %arg20[%c0_106, %c0_107] : memref<1x32xf32, #tpu.memory_space<vmem>>, vector<1x32xf32>
    %244 = vector.broadcast %243 : vector<1x32xf32> to vector<8x32xf32>
    %245 = arith.addf %242, %244 : vector<8x32xf32>
    %246 = arith.addf %137, %245 : vector<8x32xf32>
    %cst_108 = arith.constant dense<0.000000e+00> : vector<8xf32>
    %247 = vector.multi_reduction <add>, %246, %cst_108 [1] : vector<8x32xf32> to vector<8xf32>
    %248 = vector.shape_cast %247 : vector<8xf32> to vector<8x1xf32>
    %cst_109 = arith.constant 3.200000e+01 : f32
    %249 = vector.broadcast %cst_109 : f32 to vector<8x1xf32>
    %250 = arith.divf %248, %249 : vector<8x1xf32>
    %251 = vector.broadcast %250 : vector<8x1xf32> to vector<8x32xf32>
    %252 = arith.subf %246, %251 : vector<8x32xf32>
    %253 = arith.mulf %252, %252 : vector<8x32xf32>
    %cst_110 = arith.constant dense<0.000000e+00> : vector<8xf32>
    %254 = vector.multi_reduction <add>, %253, %cst_110 [1] : vector<8x32xf32> to vector<8xf32>
    %255 = vector.shape_cast %254 : vector<8xf32> to vector<8x1xf32>
    %cst_111 = arith.constant 3.200000e+01 : f32
    %256 = vector.broadcast %cst_111 : f32 to vector<8x1xf32>
    %257 = arith.divf %255, %256 : vector<8x1xf32>
    %cst_112 = arith.constant 9.99999974E-6 : f32
    %258 = vector.broadcast %cst_112 : f32 to vector<8x1xf32>
    %259 = arith.addf %257, %258 : vector<8x1xf32>
    %260 = math.rsqrt %259 : vector<8x1xf32>
    %261 = vector.broadcast %260 : vector<8x1xf32> to vector<8x32xf32>
    %262 = arith.mulf %252, %261 : vector<8x32xf32>
    %c0_113 = arith.constant 0 : index
    %c0_114 = arith.constant 0 : index
    %263 = vector.load %arg27[%c0_113, %c0_114] : memref<1x32xf32, #tpu.memory_space<vmem>>, vector<1x32xf32>
    %264 = vector.broadcast %263 : vector<1x32xf32> to vector<8x32xf32>
    %265 = arith.mulf %262, %264 : vector<8x32xf32>
    %c0_115 = arith.constant 0 : index
    %c0_116 = arith.constant 0 : index
    %266 = vector.load %arg28[%c0_115, %c0_116] : memref<1x32xf32, #tpu.memory_space<vmem>>, vector<1x32xf32>
    %267 = vector.broadcast %266 : vector<1x32xf32> to vector<8x32xf32>
    %268 = arith.addf %265, %267 : vector<8x32xf32>
    %269 = arith.truncf %268 : vector<8x32xf32> to vector<8x32xbf16>
    %c0_117 = arith.constant 0 : index
    %c0_118 = arith.constant 0 : index
    %270 = vector.load %arg21[%c0_117, %c0_118] : memref<32x64xbf16, #tpu.memory_space<vmem>>, vector<32x64xbf16>
    %cst_119 = arith.constant dense<0.000000e+00> : vector<8x64xf32>
    %271 = tpu.matmul %269, %270, %cst_119 {dimension_numbers = #tpu.dot_dimension_numbers<[1], [0], [0], [1], [0, 0, 1, 1], [], []>} : vector<8x32xbf16>, vector<32x64xbf16>, vector<8x64xf32> -> vector<8x64xf32>
    %c0_120 = arith.constant 0 : index
    %c0_121 = arith.constant 0 : index
    %272 = vector.load %arg22[%c0_120, %c0_121] : memref<1x64xf32, #tpu.memory_space<vmem>>, vector<1x64xf32>
    %273 = vector.broadcast %272 : vector<1x64xf32> to vector<8x64xf32>
    %274 = arith.addf %271, %273 : vector<8x64xf32>
    %cst_122 = arith.constant 0.000000e+00 : f32
    %275 = vector.broadcast %cst_122 : f32 to vector<8x64xf32>
    %276 = arith.maximumf %274, %275 : vector<8x64xf32>
    %277 = arith.truncf %276 : vector<8x64xf32> to vector<8x64xbf16>
    %c0_123 = arith.constant 0 : index
    %c0_124 = arith.constant 0 : index
    %278 = vector.load %arg23[%c0_123, %c0_124] : memref<64x32xbf16, #tpu.memory_space<vmem>>, vector<64x32xbf16>
    %cst_125 = arith.constant dense<0.000000e+00> : vector<8x32xf32>
    %279 = tpu.matmul %277, %278, %cst_125 {dimension_numbers = #tpu.dot_dimension_numbers<[1], [0], [0], [1], [0, 0, 1, 1], [], []>} : vector<8x64xbf16>, vector<64x32xbf16>, vector<8x32xf32> -> vector<8x32xf32>
    %c0_126 = arith.constant 0 : index
    %c0_127 = arith.constant 0 : index
    %280 = vector.load %arg24[%c0_126, %c0_127] : memref<1x32xf32, #tpu.memory_space<vmem>>, vector<1x32xf32>
    %281 = vector.broadcast %280 : vector<1x32xf32> to vector<8x32xf32>
    %282 = arith.addf %279, %281 : vector<8x32xf32>
    %283 = arith.addf %268, %282 : vector<8x32xf32>
    %cst_128 = arith.constant dense<0.000000e+00> : vector<8xf32>
    %284 = vector.multi_reduction <add>, %283, %cst_128 [1] : vector<8x32xf32> to vector<8xf32>
    %285 = vector.shape_cast %284 : vector<8xf32> to vector<8x1xf32>
    %cst_129 = arith.constant 3.200000e+01 : f32
    %286 = vector.broadcast %cst_129 : f32 to vector<8x1xf32>
    %287 = arith.divf %285, %286 : vector<8x1xf32>
    %288 = vector.broadcast %287 : vector<8x1xf32> to vector<8x32xf32>
    %289 = arith.subf %283, %288 : vector<8x32xf32>
    %290 = arith.mulf %289, %289 : vector<8x32xf32>
    %cst_130 = arith.constant dense<0.000000e+00> : vector<8xf32>
    %291 = vector.multi_reduction <add>, %290, %cst_130 [1] : vector<8x32xf32> to vector<8xf32>
    %292 = vector.shape_cast %291 : vector<8xf32> to vector<8x1xf32>
    %cst_131 = arith.constant 3.200000e+01 : f32
    %293 = vector.broadcast %cst_131 : f32 to vector<8x1xf32>
    %294 = arith.divf %292, %293 : vector<8x1xf32>
    %cst_132 = arith.constant 9.99999974E-6 : f32
    %295 = vector.broadcast %cst_132 : f32 to vector<8x1xf32>
    %296 = arith.addf %294, %295 : vector<8x1xf32>
    %297 = math.rsqrt %296 : vector<8x1xf32>
    %298 = vector.broadcast %297 : vector<8x1xf32> to vector<8x32xf32>
    %299 = arith.mulf %289, %298 : vector<8x32xf32>
    %c0_133 = arith.constant 0 : index
    %c0_134 = arith.constant 0 : index
    %300 = vector.load %arg29[%c0_133, %c0_134] : memref<1x32xf32, #tpu.memory_space<vmem>>, vector<1x32xf32>
    %301 = vector.broadcast %300 : vector<1x32xf32> to vector<8x32xf32>
    %302 = arith.mulf %299, %301 : vector<8x32xf32>
    %c0_135 = arith.constant 0 : index
    %c0_136 = arith.constant 0 : index
    %303 = vector.load %arg30[%c0_135, %c0_136] : memref<1x32xf32, #tpu.memory_space<vmem>>, vector<1x32xf32>
    %304 = vector.broadcast %303 : vector<1x32xf32> to vector<8x32xf32>
    %305 = arith.addf %302, %304 : vector<8x32xf32>
    %306 = vector.shape_cast %305 : vector<8x32xf32> to vector<1x8x32xf32>
    %c0_137 = arith.constant 0 : index
    %c0_138 = arith.constant 0 : index
    %c0_139 = arith.constant 0 : index
    %307 = vector.load %arg31[%c0_137, %c0_138, %c0_139] : memref<1x8x32xf32, #tpu.memory_space<vmem>>, vector<1x8x32xf32>
    tpu.vector_store %arg31[%c0_137, %c0_138, %c0_139], %306 {strides = array<i32>} : memref<1x8x32xf32, #tpu.memory_space<vmem>>, vector<1x8x32xf32>,
    return
  }
  func.func @transform_0(%arg0: i32) -> (i32, i32, i32) {
    %c0_i32 = arith.constant 0 : i32
    %c0_i32_0 = arith.constant 0 : i32
    %c0_i32_1 = arith.constant 0 : i32
    return %arg0, %c0_i32, %c0_i32_0 : i32, i32, i32
  }
  func.func @transform_1(%arg0: i32) -> (i32, i32, i32) {
    %c0_i32 = arith.constant 0 : i32
    %c0_i32_0 = arith.constant 0 : i32
    %c0_i32_1 = arith.constant 0 : i32
    return %arg0, %c0_i32, %c0_i32_0 : i32, i32, i32
  }
  func.func @transform_2(%arg0: i32) -> (i32, i32, i32) {
    %c0_i32 = arith.constant 0 : i32
    %c0_i32_0 = arith.constant 0 : i32
    %c0_i32_1 = arith.constant 0 : i32
    return %arg0, %c0_i32, %c0_i32_0 : i32, i32, i32
  }
  func.func @transform_3(%arg0: i32) -> (i32, i32, i32) {
    %c0_i32 = arith.constant 0 : i32
    %c0_i32_0 = arith.constant 0 : i32
    %c0_i32_1 = arith.constant 0 : i32
    return %arg0, %c0_i32, %c0_i32_0 : i32, i32, i32
  }
  func.func @transform_4(%arg0: i32) -> (i32, i32) {
    %c0_i32 = arith.constant 0 : i32
    %c0_i32_0 = arith.constant 0 : i32
    %c0_i32_1 = arith.constant 0 : i32
    return %c0_i32, %c0_i32_0 : i32, i32
  }
  func.func @transform_5(%arg0: i32) -> (i32, i32) {
    %c0_i32 = arith.constant 0 : i32
    %c0_i32_0 = arith.constant 0 : i32
    %c0_i32_1 = arith.constant 0 : i32
    return %c0_i32, %c0_i32_0 : i32, i32
  }
  func.func @transform_6(%arg0: i32) -> (i32, i32) {
    %c0_i32 = arith.constant 0 : i32
    %c0_i32_0 = arith.constant 0 : i32
    %c0_i32_1 = arith.constant 0 : i32
    return %c0_i32, %c0_i32_0 : i32, i32
  }
  func.func @transform_7(%arg0: i32) -> (i32, i32) {
    %c0_i32 = arith.constant 0 : i32
    %c0_i32_0 = arith.constant 0 : i32
    %c0_i32_1 = arith.constant 0 : i32
    return %c0_i32, %c0_i32_0 : i32, i32
  }
  func.func @transform_8(%arg0: i32) -> (i32, i32) {
    %c0_i32 = arith.constant 0 : i32
    %c0_i32_0 = arith.constant 0 : i32
    %c0_i32_1 = arith.constant 0 : i32
    return %c0_i32, %c0_i32_0 : i32, i32
  }
  func.func @transform_9(%arg0: i32) -> (i32, i32) {
    %c0_i32 = arith.constant 0 : i32
    %c0_i32_0 = arith.constant 0 : i32
    %c0_i32_1 = arith.constant 0 : i32
    return %c0_i32, %c0_i32_0 : i32, i32
  }
  func.func @transform_10(%arg0: i32) -> (i32, i32) {
    %c0_i32 = arith.constant 0 : i32
    %c0_i32_0 = arith.constant 0 : i32
    %c0_i32_1 = arith.constant 0 : i32
    return %c0_i32, %c0_i32_0 : i32, i32
  }
  func.func @transform_11(%arg0: i32) -> (i32, i32) {
    %c0_i32 = arith.constant 0 : i32
    %c0_i32_0 = arith.constant 0 : i32
    %c0_i32_1 = arith.constant 0 : i32
    return %c0_i32, %c0_i32_0 : i32, i32
  }
  func.func @transform_12(%arg0: i32) -> (i32, i32) {
    %c0_i32 = arith.constant 0 : i32
    %c0_i32_0 = arith.constant 0 : i32
    %c0_i32_1 = arith.constant 0 : i32
    return %c0_i32, %c0_i32_0 : i32, i32
  }
  func.func @transform_13(%arg0: i32) -> (i32, i32) {
    %c0_i32 = arith.constant 0 : i32
    %c0_i32_0 = arith.constant 0 : i32
    %c0_i32_1 = arith.constant 0 : i32
    return %c0_i32, %c0_i32_0 : i32, i32
  }
  func.func @transform_14(%arg0: i32) -> (i32, i32) {
    %c0_i32 = arith.constant 0 : i32
    %c0_i32_0 = arith.constant 0 : i32
    %c0_i32_1 = arith.constant 0 : i32
    return %c0_i32, %c0_i32_0 : i32, i32
  }
  func.func @transform_15(%arg0: i32) -> (i32, i32) {
    %c0_i32 = arith.constant 0 : i32
    %c0_i32_0 = arith.constant 0 : i32
    %c0_i32_1 = arith.constant 0 : i32
    return %c0_i32, %c0_i32_0 : i32, i32
  }
  func.func @transform_16(%arg0: i32) -> (i32, i32) {
    %c0_i32 = arith.constant 0 : i32
    %c0_i32_0 = arith.constant 0 : i32
    %c0_i32_1 = arith.constant 0 : i32
    return %c0_i32, %c0_i32_0 : i32, i32
  }
  func.func @transform_17(%arg0: i32) -> (i32, i32) {
    %c0_i32 = arith.constant 0 : i32
    %c0_i32_0 = arith.constant 0 : i32
    %c0_i32_1 = arith.constant 0 : i32
    return %c0_i32, %c0_i32_0 : i32, i32
  }
  func.func @transform_18(%arg0: i32) -> (i32, i32) {
    %c0_i32 = arith.constant 0 : i32
    %c0_i32_0 = arith.constant 0 : i32
    %c0_i32_1 = arith.constant 0 : i32
    return %c0_i32, %c0_i32_0 : i32, i32
  }
  func.func @transform_19(%arg0: i32) -> (i32, i32) {
    %c0_i32 = arith.constant 0 : i32
    %c0_i32_0 = arith.constant 0 : i32
    %c0_i32_1 = arith.constant 0 : i32
    return %c0_i32, %c0_i32_0 : i32, i32
  }
  func.func @transform_20(%arg0: i32) -> (i32, i32) {
    %c0_i32 = arith.constant 0 : i32
    %c0_i32_0 = arith.constant 0 : i32
    %c0_i32_1 = arith.constant 0 : i32
    return %c0_i32, %c0_i32_0 : i32, i32
  }
  func.func @transform_21(%arg0: i32) -> (i32, i32) {
    %c0_i32 = arith.constant 0 : i32
    %c0_i32_0 = arith.constant 0 : i32
    %c0_i32_1 = arith.constant 0 : i32
    return %c0_i32, %c0_i32_0 : i32, i32
  }
  func.func @transform_22(%arg0: i32) -> (i32, i32) {
    %c0_i32 = arith.constant 0 : i32
    %c0_i32_0 = arith.constant 0 : i32
    %c0_i32_1 = arith.constant 0 : i32
    return %c0_i32, %c0_i32_0 : i32, i32
  }
  func.func @transform_23(%arg0: i32) -> (i32, i32) {
    %c0_i32 = arith.constant 0 : i32
    %c0_i32_0 = arith.constant 0 : i32
    %c0_i32_1 = arith.constant 0 : i32
    return %c0_i32, %c0_i32_0 : i32, i32
  }
  func.func @transform_24(%arg0: i32) -> (i32, i32) {
    %c0_i32 = arith.constant 0 : i32
    %c0_i32_0 = arith.constant 0 : i32
    %c0_i32_1 = arith.constant 0 : i32
    return %c0_i32, %c0_i32_0 : i32, i32
  }
  func.func @transform_25(%arg0: i32) -> (i32, i32) {
    %c0_i32 = arith.constant 0 : i32
    %c0_i32_0 = arith.constant 0 : i32
    %c0_i32_1 = arith.constant 0 : i32
    return %c0_i32, %c0_i32_0 : i32, i32
  }
  func.func @transform_26(%arg0: i32) -> (i32, i32) {
    %c0_i32 = arith.constant 0 : i32
    %c0_i32_0 = arith.constant 0 : i32
    %c0_i32_1 = arith.constant 0 : i32
    return %c0_i32, %c0_i32_0 : i32, i32
  }
  func.func @transform_27(%arg0: i32) -> (i32, i32) {
    %c0_i32 = arith.constant 0 : i32
    %c0_i32_0 = arith.constant 0 : i32
    %c0_i32_1 = arith.constant 0 : i32
    return %c0_i32, %c0_i32_0 : i32, i32
  }
  func.func @transform_28(%arg0: i32) -> (i32, i32) {
    %c0_i32 = arith.constant 0 : i32
    %c0_i32_0 = arith.constant 0 : i32
    %c0_i32_1 = arith.constant 0 : i32
    return %c0_i32, %c0_i32_0 : i32, i32
  }
  func.func @transform_29(%arg0: i32) -> (i32, i32) {
    %c0_i32 = arith.constant 0 : i32
    %c0_i32_0 = arith.constant 0 : i32
    %c0_i32_1 = arith.constant 0 : i32
    return %c0_i32, %c0_i32_0 : i32, i32
  }
  func.func @transform_30(%arg0: i32) -> (i32, i32, i32) {
    %c0_i32 = arith.constant 0 : i32
    %c0_i32_0 = arith.constant 0 : i32
    %c0_i32_1 = arith.constant 0 : i32
    return %arg0, %c0_i32, %c0_i32_0 : i32, i32, i32
  }
}

module attributes {stable_mosaic.version = 11 : i64} {
  func.func @_decoder_layer_kernel(%arg0: i32, %arg1: memref<1x8x32xf32, #tpu.memory_space<vmem>>, %arg2: memref<1x16x32xf32, #tpu.memory_space<vmem>>, %arg3: memref<1x8x32xf32, #tpu.memory_space<vmem>>, %arg4: memref<1x16x32xf32, #tpu.memory_space<vmem>>, %arg5: memref<32x32xbf16, #tpu.memory_space<vmem>>, %arg6: memref<1x32xf32, #tpu.memory_space<vmem>>, %arg7: memref<32x32xbf16, #tpu.memory_space<vmem>>, %arg8: memref<1x32xf32, #tpu.memory_space<vmem>>, %arg9: memref<32x32xbf16, #tpu.memory_space<vmem>>, %arg10: memref<1x32xf32, #tpu.memory_space<vmem>>, %arg11: memref<32x32xbf16, #tpu.memory_space<vmem>>, %arg12: memref<1x32xf32, #tpu.memory_space<vmem>>, %arg13: memref<32x32xbf16, #tpu.memory_space<vmem>>, %arg14: memref<1x32xf32, #tpu.memory_space<vmem>>, %arg15: memref<32x32xbf16, #tpu.memory_space<vmem>>, %arg16: memref<1x32xf32, #tpu.memory_space<vmem>>, %arg17: memref<32x32xbf16, #tpu.memory_space<vmem>>, %arg18: memref<1x32xf32, #tpu.memory_space<vmem>>, %arg19: memref<32x32xbf16, #tpu.memory_space<vmem>>, %arg20: memref<1x32xf32, #tpu.memory_space<vmem>>, %arg21: memref<32x64xbf16, #tpu.memory_space<vmem>>, %arg22: memref<1x64xf32, #tpu.memory_space<vmem>>, %arg23: memref<64x32xbf16, #tpu.memory_space<vmem>>, %arg24: memref<1x32xf32, #tpu.memory_space<vmem>>, %arg25: memref<1x32xf32, #tpu.memory_space<vmem>>, %arg26: memref<1x32xf32, #tpu.memory_space<vmem>>, %arg27: memref<1x32xf32, #tpu.memory_space<vmem>>, %arg28: memref<1x32xf32, #tpu.memory_space<vmem>>, %arg29: memref<1x32xf32, #tpu.memory_space<vmem>>, %arg30: memref<1x32xf32, #tpu.memory_space<vmem>>, %arg31: memref<1x8x32xf32, #tpu.memory_space<vmem>>, %arg32: memref<8x32xbf16, #tpu.memory_space<vmem>>) attributes {dimension_semantics = [#tpu.dimension_semantics<parallel>], iteration_bounds = array<i64: 2>, scalar_prefetch = 0 : i64, scratch_operands = 1 : i64, tpu.core_type = #tpu.core_type<tc>, window_params = [{transform_indices = @transform_0, window_bounds = array<i64: 1, 8, 32>}, {transform_indices = @transform_1, window_bounds = array<i64: 1, 16, 32>}, {transform_indices = @transform_2, window_bounds = array<i64: 1, 8, 32>}, {transform_indices = @transform_3, window_bounds = array<i64: 1, 16, 32>}, {pipeline_mode = #tpu.pipeline_mode<synchronous>, transform_indices = @transform_4, window_bounds = array<i64: 32, 32>}, {pipeline_mode = #tpu.pipeline_mode<synchronous>, transform_indices = @transform_5, window_bounds = array<i64: 1, 32>}, {pipeline_mode = #tpu.pipeline_mode<synchronous>, transform_indices = @transform_6, window_bounds = array<i64: 32, 32>}, {pipeline_mode = #tpu.pipeline_mode<synchronous>, transform_indices = @transform_7, window_bounds = array<i64: 1, 32>}, {pipeline_mode = #tpu.pipeline_mode<synchronous>, transform_indices = @transform_8, window_bounds = array<i64: 32, 32>}, {pipeline_mode = #tpu.pipeline_mode<synchronous>, transform_indices = @transform_9, window_bounds = array<i64: 1, 32>}, {pipeline_mode = #tpu.pipeline_mode<synchronous>, transform_indices = @transform_10, window_bounds = array<i64: 32, 32>}, {pipeline_mode = #tpu.pipeline_mode<synchronous>, transform_indices = @transform_11, window_bounds = array<i64: 1, 32>}, {pipeline_mode = #tpu.pipeline_mode<synchronous>, transform_indices = @transform_12, window_bounds = array<i64: 32, 32>}, {pipeline_mode = #tpu.pipeline_mode<synchronous>, transform_indices = @transform_13, window_bounds = array<i64: 1, 32>}, {pipeline_mode = #tpu.pipeline_mode<synchronous>, transform_indices = @transform_14, window_bounds = array<i64: 32, 32>}, {pipeline_mode = #tpu.pipeline_mode<synchronous>, transform_indices = @transform_15, window_bounds = array<i64: 1, 32>}, {pipeline_mode = #tpu.pipeline_mode<synchronous>, transform_indices = @transform_16, window_bounds = array<i64: 32, 32>}, {pipeline_mode = #tpu.pipeline_mode<synchronous>, transform_indices = @transform_17, window_bounds = array<i64: 1, 32>}, {pipeline_mode = #tpu.pipeline_mode<synchronous>, transform_indices = @transform_18, window_bounds = array<i64: 32, 32>}, {pipeline_mode = #tpu.pipeline_mode<synchronous>, transform_indices = @transform_19, window_bounds = array<i64: 1, 32>}, {pipeline_mode = #tpu.pipeline_mode<synchronous>, transform_indices = @transform_20, window_bounds = array<i64: 32, 64>}, {pipeline_mode = #tpu.pipeline_mode<synchronous>, transform_indices = @transform_21, window_bounds = array<i64: 1, 64>}, {pipeline_mode = #tpu.pipeline_mode<synchronous>, transform_indices = @transform_22, window_bounds = array<i64: 64, 32>}, {pipeline_mode = #tpu.pipeline_mode<synchronous>, transform_indices = @transform_23, window_bounds = array<i64: 1, 32>}, {pipeline_mode = #tpu.pipeline_mode<synchronous>, transform_indices = @transform_24, window_bounds = array<i64: 1, 32>}, {pipeline_mode = #tpu.pipeline_mode<synchronous>, transform_indices = @transform_25, window_bounds = array<i64: 1, 32>}, {pipeline_mode = #tpu.pipeline_mode<synchronous>, transform_indices = @transform_26, window_bounds = array<i64: 1, 32>}, {pipeline_mode = #tpu.pipeline_mode<synchronous>, transform_indices = @transform_27, window_bounds = array<i64: 1, 32>}, {pipeline_mode = #tpu.pipeline_mode<synchronous>, transform_indices = @transform_28, window_bounds = array<i64: 1, 32>}, {pipeline_mode = #tpu.pipeline_mode<synchronous>, transform_indices = @transform_29, window_bounds = array<i64: 1, 32>}, {transform_indices = @transform_30, window_bounds = array<i64: 1, 8, 32>}]} {
    %c0 = arith.constant 0 : index
    %c0_0 = arith.constant 0 : index
    %c0_1 = arith.constant 0 : index
    %0 = vector.load %arg1[%c0, %c0_0, %c0_1] : memref<1x8x32xf32, #tpu.memory_space<vmem>>, vector<1x8x32xf32>
    %1 = vector.shape_cast %0 : vector<1x8x32xf32> to vector<8x32xf32>
    %c0_2 = arith.constant 0 : index
    %c0_3 = arith.constant 0 : index
    %c0_4 = arith.constant 0 : index
    %2 = vector.load %arg3[%c0_2, %c0_3, %c0_4] : memref<1x8x32xf32, #tpu.memory_space<vmem>>, vector<1x8x32xf32>
    %3 = vector.shape_cast %2 : vector<1x8x32xf32> to vector<8x32xf32>
    %c0_5 = arith.constant 0 : index
    %c0_6 = arith.constant 0 : index
    %c0_7 = arith.constant 0 : index
    %4 = vector.load %arg2[%c0_5, %c0_6, %c0_7] : memref<1x16x32xf32, #tpu.memory_space<vmem>>, vector<1x16x32xf32>
    %5 = vector.shape_cast %4 : vector<1x16x32xf32> to vector<16x32xf32>
    %c0_8 = arith.constant 0 : index
    %c0_9 = arith.constant 0 : index
    %c0_10 = arith.constant 0 : index
    %6 = vector.load %arg4[%c0_8, %c0_9, %c0_10] : memref<1x16x32xf32, #tpu.memory_space<vmem>>, vector<1x16x32xf32>
    %7 = vector.shape_cast %6 : vector<1x16x32xf32> to vector<16x32xf32>
    %8 = arith.addf %1, %3 : vector<8x32xf32>
    %9 = arith.truncf %8 : vector<8x32xf32> to vector<8x32xbf16>
    %c0_11 = arith.constant 0 : index
    %c0_12 = arith.constant 0 : index
    %10 = vector.load %arg5[%c0_11, %c0_12] : memref<32x32xbf16, #tpu.memory_space<vmem>>, vector<32x32xbf16>
    %cst = arith.constant dense<0.000000e+00> : vector<8x32xf32>
    %11 = tpu.matmul %9, %10, %cst {dimension_numbers = #tpu.dot_dimension_numbers<[1], [0], [0], [1], [0, 0, 1, 1], [], []>} : vector<8x32xbf16>, vector<32x32xbf16>, vector<8x32xf32> -> vector<8x32xf32>
    %c0_13 = arith.constant 0 : index
    %c0_14 = arith.constant 0 : index
    %12 = vector.load %arg6[%c0_13, %c0_14] : memref<1x32xf32, #tpu.memory_space<vmem>>, vector<1x32xf32>
    %13 = vector.broadcast %12 : vector<1x32xf32> to vector<8x32xf32>
    %14 = arith.addf %11, %13 : vector<8x32xf32>
    %15 = arith.truncf %14 : vector<8x32xf32> to vector<8x32xbf16>
    %16 = arith.truncf %8 : vector<8x32xf32> to vector<8x32xbf16>
    %c0_15 = arith.constant 0 : index
    %c0_16 = arith.constant 0 : index
    %17 = vector.load %arg7[%c0_15, %c0_16] : memref<32x32xbf16, #tpu.memory_space<vmem>>, vector<32x32xbf16>
    %cst_17 = arith.constant dense<0.000000e+00> : vector<8x32xf32>
    %18 = tpu.matmul %16, %17, %cst_17 {dimension_numbers = #tpu.dot_dimension_numbers<[1], [0], [0], [1], [0, 0, 1, 1], [], []>} : vector<8x32xbf16>, vector<32x32xbf16>, vector<8x32xf32> -> vector<8x32xf32>
    %c0_18 = arith.constant 0 : index
    %c0_19 = arith.constant 0 : index
    %19 = vector.load %arg8[%c0_18, %c0_19] : memref<1x32xf32, #tpu.memory_space<vmem>>, vector<1x32xf32>
    %20 = vector.broadcast %19 : vector<1x32xf32> to vector<8x32xf32>
    %21 = arith.addf %18, %20 : vector<8x32xf32>
    %22 = arith.truncf %21 : vector<8x32xf32> to vector<8x32xbf16>
    %23 = arith.truncf %1 : vector<8x32xf32> to vector<8x32xbf16>
    %c0_20 = arith.constant 0 : index
    %c0_21 = arith.constant 0 : index
    %24 = vector.load %arg9[%c0_20, %c0_21] : memref<32x32xbf16, #tpu.memory_space<vmem>>, vector<32x32xbf16>
    %cst_22 = arith.constant dense<0.000000e+00> : vector<8x32xf32>
    %25 = tpu.matmul %23, %24, %cst_22 {dimension_numbers = #tpu.dot_dimension_numbers<[1], [0], [0], [1], [0, 0, 1, 1], [], []>} : vector<8x32xbf16>, vector<32x32xbf16>, vector<8x32xf32> -> vector<8x32xf32>
    %c0_23 = arith.constant 0 : index
    %c0_24 = arith.constant 0 : index
    %26 = vector.load %arg10[%c0_23, %c0_24] : memref<1x32xf32, #tpu.memory_space<vmem>>, vector<1x32xf32>
    %27 = vector.broadcast %26 : vector<1x32xf32> to vector<8x32xf32>
    %28 = arith.addf %25, %27 : vector<8x32xf32>
    %29 = arith.truncf %28 : vector<8x32xf32> to vector<8x32xbf16>
    %30 = vector.shape_cast %15 : vector<8x32xbf16> to vector<1x8x32xbf16>
    %31 = vector.shape_cast %22 : vector<8x32xbf16> to vector<1x8x32xbf16>
    %32 = vector.shape_cast %29 : vector<8x32xbf16> to vector<1x8x32xbf16>
    %33 = vector.extract_strided_slice %30 {offsets = [0, 0, 0], sizes = [1, 8, 8], strides = [1, 1, 1]} : vector<1x8x32xbf16> to vector<1x8x8xbf16>
    %34 = vector.extract_strided_slice %31 {offsets = [0, 0, 0], sizes = [1, 8, 8], strides = [1, 1, 1]} : vector<1x8x32xbf16> to vector<1x8x8xbf16>
    %35 = vector.extract_strided_slice %32 {offsets = [0, 0, 0], sizes = [1, 8, 8], strides = [1, 1, 1]} : vector<1x8x32xbf16> to vector<1x8x8xbf16>
    "tpu.trace_start"() <{level = 10 : i32, message = "bqd,bkd->bqk"}> : () -> ()
    %cst_25 = arith.constant dense<0.000000e+00> : vector<1x8x8xf32>
    %36 = tpu.matmul %33, %34, %cst_25 {dimension_numbers = #tpu.dot_dimension_numbers<[2], [2], [1], [1], [0, 0, 0, 1, 1, 1], [0], [0]>} : vector<1x8x8xbf16>, vector<1x8x8xbf16>, vector<1x8x8xf32> -> vector<1x8x8xf32>
    "tpu.trace_stop"() : () -> ()
    %cst_26 = arith.constant dense<0xFF800000> : vector<1x8xf32>
    %37 = vector.multi_reduction <maximumf>, %36, %cst_26 [2] : vector<1x8x8xf32> to vector<1x8xf32>
    %38 = vector.shape_cast %37 : vector<1x8xf32> to vector<1x8x1xf32>
    %39 = vector.broadcast %38 : vector<1x8x1xf32> to vector<1x8x8xf32>
    %40 = arith.subf %36, %39 : vector<1x8x8xf32>
    %41 = math.exp %40 : vector<1x8x8xf32>
    %cst_27 = arith.constant dense<0.000000e+00> : vector<1x8xf32>
    %42 = vector.multi_reduction <add>, %41, %cst_27 [2] : vector<1x8x8xf32> to vector<1x8xf32>
    %43 = vector.shape_cast %42 : vector<1x8xf32> to vector<1x8x1xf32>
    %44 = tpu.reciprocal %43 {approx = true} : vector<1x8x1xf32> -> vector<1x8x1xf32>
    %45 = vector.broadcast %44 : vector<1x8x1xf32> to vector<1x8x8xf32>
    %46 = arith.mulf %41, %45 : vector<1x8x8xf32>
    %47 = arith.truncf %46 : vector<1x8x8xf32> to vector<1x8x8xbf16>
    "tpu.trace_start"() <{level = 10 : i32, message = "bqk,bkd->bqd"}> : () -> ()
    %cst_28 = arith.constant dense<0.000000e+00> : vector<1x8x8xf32>
    %48 = tpu.matmul %47, %35, %cst_28 {dimension_numbers = #tpu.dot_dimension_numbers<[2], [1], [1], [2], [0, 0, 0, 1, 1, 2], [0], [0]>} : vector<1x8x8xbf16>, vector<1x8x8xbf16>, vector<1x8x8xf32> -> vector<1x8x8xf32>
    "tpu.trace_stop"() : () -> ()
    %49 = vector.shape_cast %48 : vector<1x8x8xf32> to vector<8x8xf32>
    %50 = arith.truncf %49 : vector<8x8xf32> to vector<8x8xbf16>
    %c0_29 = arith.constant 0 : index
    %c0_30 = arith.constant 0 : index
    %51 = vector.load %arg32[%c0_29, %c0_30] : memref<8x32xbf16, #tpu.memory_space<vmem>>, vector<8x8xbf16>
    tpu.vector_store %arg32[%c0_29, %c0_30], %50 {strides = array<i32>} : memref<8x32xbf16, #tpu.memory_space<vmem>>, vector<8x8xbf16>,
    %52 = vector.extract_strided_slice %30 {offsets = [0, 0, 8], sizes = [1, 8, 8], strides = [1, 1, 1]} : vector<1x8x32xbf16> to vector<1x8x8xbf16>
    %53 = vector.extract_strided_slice %31 {offsets = [0, 0, 8], sizes = [1, 8, 8], strides = [1, 1, 1]} : vector<1x8x32xbf16> to vector<1x8x8xbf16>
    %54 = vector.extract_strided_slice %32 {offsets = [0, 0, 8], sizes = [1, 8, 8], strides = [1, 1, 1]} : vector<1x8x32xbf16> to vector<1x8x8xbf16>
    "tpu.trace_start"() <{level = 10 : i32, message = "bqd,bkd->bqk"}> : () -> ()
    %cst_31 = arith.constant dense<0.000000e+00> : vector<1x8x8xf32>
    %55 = tpu.matmul %52, %53, %cst_31 {dimension_numbers = #tpu.dot_dimension_numbers<[2], [2], [1], [1], [0, 0, 0, 1, 1, 1], [0], [0]>} : vector<1x8x8xbf16>, vector<1x8x8xbf16>, vector<1x8x8xf32> -> vector<1x8x8xf32>
    "tpu.trace_stop"() : () -> ()
    %cst_32 = arith.constant dense<0xFF800000> : vector<1x8xf32>
    %56 = vector.multi_reduction <maximumf>, %55, %cst_32 [2] : vector<1x8x8xf32> to vector<1x8xf32>
    %57 = vector.shape_cast %56 : vector<1x8xf32> to vector<1x8x1xf32>
    %58 = vector.broadcast %57 : vector<1x8x1xf32> to vector<1x8x8xf32>
    %59 = arith.subf %55, %58 : vector<1x8x8xf32>
    %60 = math.exp %59 : vector<1x8x8xf32>
    %cst_33 = arith.constant dense<0.000000e+00> : vector<1x8xf32>
    %61 = vector.multi_reduction <add>, %60, %cst_33 [2] : vector<1x8x8xf32> to vector<1x8xf32>
    %62 = vector.shape_cast %61 : vector<1x8xf32> to vector<1x8x1xf32>
    %63 = tpu.reciprocal %62 {approx = true} : vector<1x8x1xf32> -> vector<1x8x1xf32>
    %64 = vector.broadcast %63 : vector<1x8x1xf32> to vector<1x8x8xf32>
    %65 = arith.mulf %60, %64 : vector<1x8x8xf32>
    %66 = arith.truncf %65 : vector<1x8x8xf32> to vector<1x8x8xbf16>
    "tpu.trace_start"() <{level = 10 : i32, message = "bqk,bkd->bqd"}> : () -> ()
    %cst_34 = arith.constant dense<0.000000e+00> : vector<1x8x8xf32>
    %67 = tpu.matmul %66, %54, %cst_34 {dimension_numbers = #tpu.dot_dimension_numbers<[2], [1], [1], [2], [0, 0, 0, 1, 1, 2], [0], [0]>} : vector<1x8x8xbf16>, vector<1x8x8xbf16>, vector<1x8x8xf32> -> vector<1x8x8xf32>
    "tpu.trace_stop"() : () -> ()
    %68 = vector.shape_cast %67 : vector<1x8x8xf32> to vector<8x8xf32>
    %69 = arith.truncf %68 : vector<8x8xf32> to vector<8x8xbf16>
    %c0_35 = arith.constant 0 : index
    %c8 = arith.constant 8 : index
    %70 = vector.load %arg32[%c0_35, %c8] : memref<8x32xbf16, #tpu.memory_space<vmem>>, vector<8x8xbf16>
    tpu.vector_store %arg32[%c0_35, %c8], %69 {strides = array<i32>} : memref<8x32xbf16, #tpu.memory_space<vmem>>, vector<8x8xbf16>,
    %71 = vector.extract_strided_slice %30 {offsets = [0, 0, 16], sizes = [1, 8, 8], strides = [1, 1, 1]} : vector<1x8x32xbf16> to vector<1x8x8xbf16>
    %72 = vector.extract_strided_slice %31 {offsets = [0, 0, 16], sizes = [1, 8, 8], strides = [1, 1, 1]} : vector<1x8x32xbf16> to vector<1x8x8xbf16>
    %73 = vector.extract_strided_slice %32 {offsets = [0, 0, 16], sizes = [1, 8, 8], strides = [1, 1, 1]} : vector<1x8x32xbf16> to vector<1x8x8xbf16>
    "tpu.trace_start"() <{level = 10 : i32, message = "bqd,bkd->bqk"}> : () -> ()
    %cst_36 = arith.constant dense<0.000000e+00> : vector<1x8x8xf32>
    %74 = tpu.matmul %71, %72, %cst_36 {dimension_numbers = #tpu.dot_dimension_numbers<[2], [2], [1], [1], [0, 0, 0, 1, 1, 1], [0], [0]>} : vector<1x8x8xbf16>, vector<1x8x8xbf16>, vector<1x8x8xf32> -> vector<1x8x8xf32>
    "tpu.trace_stop"() : () -> ()
    %cst_37 = arith.constant dense<0xFF800000> : vector<1x8xf32>
    %75 = vector.multi_reduction <maximumf>, %74, %cst_37 [2] : vector<1x8x8xf32> to vector<1x8xf32>
    %76 = vector.shape_cast %75 : vector<1x8xf32> to vector<1x8x1xf32>
    %77 = vector.broadcast %76 : vector<1x8x1xf32> to vector<1x8x8xf32>
    %78 = arith.subf %74, %77 : vector<1x8x8xf32>
    %79 = math.exp %78 : vector<1x8x8xf32>
    %cst_38 = arith.constant dense<0.000000e+00> : vector<1x8xf32>
    %80 = vector.multi_reduction <add>, %79, %cst_38 [2] : vector<1x8x8xf32> to vector<1x8xf32>
    %81 = vector.shape_cast %80 : vector<1x8xf32> to vector<1x8x1xf32>
    %82 = tpu.reciprocal %81 {approx = true} : vector<1x8x1xf32> -> vector<1x8x1xf32>
    %83 = vector.broadcast %82 : vector<1x8x1xf32> to vector<1x8x8xf32>
    %84 = arith.mulf %79, %83 : vector<1x8x8xf32>
    %85 = arith.truncf %84 : vector<1x8x8xf32> to vector<1x8x8xbf16>
    "tpu.trace_start"() <{level = 10 : i32, message = "bqk,bkd->bqd"}> : () -> ()
    %cst_39 = arith.constant dense<0.000000e+00> : vector<1x8x8xf32>
    %86 = tpu.matmul %85, %73, %cst_39 {dimension_numbers = #tpu.dot_dimension_numbers<[2], [1], [1], [2], [0, 0, 0, 1, 1, 2], [0], [0]>} : vector<1x8x8xbf16>, vector<1x8x8xbf16>, vector<1x8x8xf32> -> vector<1x8x8xf32>
    "tpu.trace_stop"() : () -> ()
    %87 = vector.shape_cast %86 : vector<1x8x8xf32> to vector<8x8xf32>
    %88 = arith.truncf %87 : vector<8x8xf32> to vector<8x8xbf16>
    %c0_40 = arith.constant 0 : index
    %c16 = arith.constant 16 : index
    %89 = vector.load %arg32[%c0_40, %c16] : memref<8x32xbf16, #tpu.memory_space<vmem>>, vector<8x8xbf16>
    tpu.vector_store %arg32[%c0_40, %c16], %88 {strides = array<i32>} : memref<8x32xbf16, #tpu.memory_space<vmem>>, vector<8x8xbf16>,
    %90 = vector.extract_strided_slice %30 {offsets = [0, 0, 24], sizes = [1, 8, 8], strides = [1, 1, 1]} : vector<1x8x32xbf16> to vector<1x8x8xbf16>
    %91 = vector.extract_strided_slice %31 {offsets = [0, 0, 24], sizes = [1, 8, 8], strides = [1, 1, 1]} : vector<1x8x32xbf16> to vector<1x8x8xbf16>
    %92 = vector.extract_strided_slice %32 {offsets = [0, 0, 24], sizes = [1, 8, 8], strides = [1, 1, 1]} : vector<1x8x32xbf16> to vector<1x8x8xbf16>
    "tpu.trace_start"() <{level = 10 : i32, message = "bqd,bkd->bqk"}> : () -> ()
    %cst_41 = arith.constant dense<0.000000e+00> : vector<1x8x8xf32>
    %93 = tpu.matmul %90, %91, %cst_41 {dimension_numbers = #tpu.dot_dimension_numbers<[2], [2], [1], [1], [0, 0, 0, 1, 1, 1], [0], [0]>} : vector<1x8x8xbf16>, vector<1x8x8xbf16>, vector<1x8x8xf32> -> vector<1x8x8xf32>
    "tpu.trace_stop"() : () -> ()
    %cst_42 = arith.constant dense<0xFF800000> : vector<1x8xf32>
    %94 = vector.multi_reduction <maximumf>, %93, %cst_42 [2] : vector<1x8x8xf32> to vector<1x8xf32>
    %95 = vector.shape_cast %94 : vector<1x8xf32> to vector<1x8x1xf32>
    %96 = vector.broadcast %95 : vector<1x8x1xf32> to vector<1x8x8xf32>
    %97 = arith.subf %93, %96 : vector<1x8x8xf32>
    %98 = math.exp %97 : vector<1x8x8xf32>
    %cst_43 = arith.constant dense<0.000000e+00> : vector<1x8xf32>
    %99 = vector.multi_reduction <add>, %98, %cst_43 [2] : vector<1x8x8xf32> to vector<1x8xf32>
    %100 = vector.shape_cast %99 : vector<1x8xf32> to vector<1x8x1xf32>
    %101 = tpu.reciprocal %100 {approx = true} : vector<1x8x1xf32> -> vector<1x8x1xf32>
    %102 = vector.broadcast %101 : vector<1x8x1xf32> to vector<1x8x8xf32>
    %103 = arith.mulf %98, %102 : vector<1x8x8xf32>
    %104 = arith.truncf %103 : vector<1x8x8xf32> to vector<1x8x8xbf16>
    "tpu.trace_start"() <{level = 10 : i32, message = "bqk,bkd->bqd"}> : () -> ()
    %cst_44 = arith.constant dense<0.000000e+00> : vector<1x8x8xf32>
    %105 = tpu.matmul %104, %92, %cst_44 {dimension_numbers = #tpu.dot_dimension_numbers<[2], [1], [1], [2], [0, 0, 0, 1, 1, 2], [0], [0]>} : vector<1x8x8xbf16>, vector<1x8x8xbf16>, vector<1x8x8xf32> -> vector<1x8x8xf32>
    "tpu.trace_stop"() : () -> ()
    %106 = vector.shape_cast %105 : vector<1x8x8xf32> to vector<8x8xf32>
    %107 = arith.truncf %106 : vector<8x8xf32> to vector<8x8xbf16>
    %c0_45 = arith.constant 0 : index
    %c24 = arith.constant 24 : index
    %108 = vector.load %arg32[%c0_45, %c24] : memref<8x32xbf16, #tpu.memory_space<vmem>>, vector<8x8xbf16>
    tpu.vector_store %arg32[%c0_45, %c24], %107 {strides = array<i32>} : memref<8x32xbf16, #tpu.memory_space<vmem>>, vector<8x8xbf16>,
    %c0_46 = arith.constant 0 : index
    %c0_47 = arith.constant 0 : index
    %109 = vector.load %arg32[%c0_46, %c0_47] : memref<8x32xbf16, #tpu.memory_space<vmem>>, vector<8x32xbf16>
    %c0_48 = arith.constant 0 : index
    %c0_49 = arith.constant 0 : index
    %110 = vector.load %arg11[%c0_48, %c0_49] : memref<32x32xbf16, #tpu.memory_space<vmem>>, vector<32x32xbf16>
    %cst_50 = arith.constant dense<0.000000e+00> : vector<8x32xf32>
    %111 = tpu.matmul %109, %110, %cst_50 {dimension_numbers = #tpu.dot_dimension_numbers<[1], [0], [0], [1], [0, 0, 1, 1], [], []>} : vector<8x32xbf16>, vector<32x32xbf16>, vector<8x32xf32> -> vector<8x32xf32>
    %c0_51 = arith.constant 0 : index
    %c0_52 = arith.constant 0 : index
    %112 = vector.load %arg12[%c0_51, %c0_52] : memref<1x32xf32, #tpu.memory_space<vmem>>, vector<1x32xf32>
    %113 = vector.broadcast %112 : vector<1x32xf32> to vector<8x32xf32>
    %114 = arith.addf %111, %113 : vector<8x32xf32>
    %115 = arith.addf %1, %114 : vector<8x32xf32>
    %cst_53 = arith.constant dense<0.000000e+00> : vector<8xf32>
    %116 = vector.multi_reduction <add>, %115, %cst_53 [1] : vector<8x32xf32> to vector<8xf32>
    %117 = vector.shape_cast %116 : vector<8xf32> to vector<8x1xf32>
    %cst_54 = arith.constant 3.200000e+01 : f32
    %118 = vector.broadcast %cst_54 : f32 to vector<8x1xf32>
    %119 = arith.divf %117, %118 : vector<8x1xf32>
    %120 = vector.broadcast %119 : vector<8x1xf32> to vector<8x32xf32>
    %121 = arith.subf %115, %120 : vector<8x32xf32>
    %122 = arith.mulf %121, %121 : vector<8x32xf32>
    %cst_55 = arith.constant dense<0.000000e+00> : vector<8xf32>
    %123 = vector.multi_reduction <add>, %122, %cst_55 [1] : vector<8x32xf32> to vector<8xf32>
    %124 = vector.shape_cast %123 : vector<8xf32> to vector<8x1xf32>
    %cst_56 = arith.constant 3.200000e+01 : f32
    %125 = vector.broadcast %cst_56 : f32 to vector<8x1xf32>
    %126 = arith.divf %124, %125 : vector<8x1xf32>
    %cst_57 = arith.constant 9.99999974E-6 : f32
    %127 = vector.broadcast %cst_57 : f32 to vector<8x1xf32>
    %128 = arith.addf %126, %127 : vector<8x1xf32>
    %129 = math.rsqrt %128 : vector<8x1xf32>
    %130 = vector.broadcast %129 : vector<8x1xf32> to vector<8x32xf32>
    %131 = arith.mulf %121, %130 : vector<8x32xf32>
    %c0_58 = arith.constant 0 : index
    %c0_59 = arith.constant 0 : index
    %132 = vector.load %arg25[%c0_58, %c0_59] : memref<1x32xf32, #tpu.memory_space<vmem>>, vector<1x32xf32>
    %133 = vector.broadcast %132 : vector<1x32xf32> to vector<8x32xf32>
    %134 = arith.mulf %131, %133 : vector<8x32xf32>
    %c0_60 = arith.constant 0 : index
    %c0_61 = arith.constant 0 : index
    %135 = vector.load %arg26[%c0_60, %c0_61] : memref<1x32xf32, #tpu.memory_space<vmem>>, vector<1x32xf32>
    %136 = vector.broadcast %135 : vector<1x32xf32> to vector<8x32xf32>
    %137 = arith.addf %134, %136 : vector<8x32xf32>
    %138 = arith.addf %137, %3 : vector<8x32xf32>
    %139 = arith.addf %5, %7 : vector<16x32xf32>
    %140 = arith.truncf %138 : vector<8x32xf32> to vector<8x32xbf16>
    %c0_62 = arith.constant 0 : index
    %c0_63 = arith.constant 0 : index
    %141 = vector.load %arg13[%c0_62, %c0_63] : memref<32x32xbf16, #tpu.memory_space<vmem>>, vector<32x32xbf16>
    %cst_64 = arith.constant dense<0.000000e+00> : vector<8x32xf32>
    %142 = tpu.matmul %140, %141, %cst_64 {dimension_numbers = #tpu.dot_dimension_numbers<[1], [0], [0], [1], [0, 0, 1, 1], [], []>} : vector<8x32xbf16>, vector<32x32xbf16>, vector<8x32xf32> -> vector<8x32xf32>
    %c0_65 = arith.constant 0 : index
    %c0_66 = arith.constant 0 : index
    %143 = vector.load %arg14[%c0_65, %c0_66] : memref<1x32xf32, #tpu.memory_space<vmem>>, vector<1x32xf32>
    %144 = vector.broadcast %143 : vector<1x32xf32> to vector<8x32xf32>
    %145 = arith.addf %142, %144 : vector<8x32xf32>
    %146 = arith.truncf %145 : vector<8x32xf32> to vector<8x32xbf16>
    %147 = arith.truncf %139 : vector<16x32xf32> to vector<16x32xbf16>
    %c0_67 = arith.constant 0 : index
    %c0_68 = arith.constant 0 : index
    %148 = vector.load %arg15[%c0_67, %c0_68] : memref<32x32xbf16, #tpu.memory_space<vmem>>, vector<32x32xbf16>
    %cst_69 = arith.constant dense<0.000000e+00> : vector<16x32xf32>
    %149 = tpu.matmul %147, %148, %cst_69 {dimension_numbers = #tpu.dot_dimension_numbers<[1], [0], [0], [1], [0, 0, 1, 1], [], []>} : vector<16x32xbf16>, vector<32x32xbf16>, vector<16x32xf32> -> vector<16x32xf32>
    %c0_70 = arith.constant 0 : index
    %c0_71 = arith.constant 0 : index
    %150 = vector.load %arg16[%c0_70, %c0_71] : memref<1x32xf32, #tpu.memory_space<vmem>>, vector<1x32xf32>
    %151 = vector.broadcast %150 : vector<1x32xf32> to vector<16x32xf32>
    %152 = arith.addf %149, %151 : vector<16x32xf32>
    %153 = arith.truncf %152 : vector<16x32xf32> to vector<16x32xbf16>
    %154 = arith.truncf %5 : vector<16x32xf32> to vector<16x32xbf16>
    %c0_72 = arith.constant 0 : index
    %c0_73 = arith.constant 0 : index
    %155 = vector.load %arg17[%c0_72, %c0_73] : memref<32x32xbf16, #tpu.memory_space<vmem>>, vector<32x32xbf16>
    %cst_74 = arith.constant dense<0.000000e+00> : vector<16x32xf32>
    %156 = tpu.matmul %154, %155, %cst_74 {dimension_numbers = #tpu.dot_dimension_numbers<[1], [0], [0], [1], [0, 0, 1, 1], [], []>} : vector<16x32xbf16>, vector<32x32xbf16>, vector<16x32xf32> -> vector<16x32xf32>
    %c0_75 = arith.constant 0 : index
    %c0_76 = arith.constant 0 : index
    %157 = vector.load %arg18[%c0_75, %c0_76] : memref<1x32xf32, #tpu.memory_space<vmem>>, vector<1x32xf32>
    %158 = vector.broadcast %157 : vector<1x32xf32> to vector<16x32xf32>
    %159 = arith.addf %156, %158 : vector<16x32xf32>
    %160 = arith.truncf %159 : vector<16x32xf32> to vector<16x32xbf16>
    %161 = vector.shape_cast %146 : vector<8x32xbf16> to vector<1x8x32xbf16>
    %162 = vector.shape_cast %153 : vector<16x32xbf16> to vector<1x16x32xbf16>
    %163 = vector.shape_cast %160 : vector<16x32xbf16> to vector<1x16x32xbf16>
    %164 = vector.extract_strided_slice %161 {offsets = [0, 0, 0], sizes = [1, 8, 8], strides = [1, 1, 1]} : vector<1x8x32xbf16> to vector<1x8x8xbf16>
    %165 = vector.extract_strided_slice %162 {offsets = [0, 0, 0], sizes = [1, 16, 8], strides = [1, 1, 1]} : vector<1x16x32xbf16> to vector<1x16x8xbf16>
    %166 = vector.extract_strided_slice %163 {offsets = [0, 0, 0], sizes = [1, 16, 8], strides = [1, 1, 1]} : vector<1x16x32xbf16> to vector<1x16x8xbf16>
    "tpu.trace_start"() <{level = 10 : i32, message = "bqd,bkd->bqk"}> : () -> ()
    %cst_77 = arith.constant dense<0.000000e+00> : vector<1x8x16xf32>
    %167 = tpu.matmul %164, %165, %cst_77 {dimension_numbers = #tpu.dot_dimension_numbers<[2], [2], [1], [1], [0, 0, 0, 1, 1, 1], [0], [0]>} : vector<1x8x8xbf16>, vector<1x16x8xbf16>, vector<1x8x16xf32> -> vector<1x8x16xf32>
    "tpu.trace_stop"() : () -> ()
    %cst_78 = arith.constant dense<0xFF800000> : vector<1x8xf32>
    %168 = vector.multi_reduction <maximumf>, %167, %cst_78 [2] : vector<1x8x16xf32> to vector<1x8xf32>
    %169 = vector.shape_cast %168 : vector<1x8xf32> to vector<1x8x1xf32>
    %170 = vector.broadcast %169 : vector<1x8x1xf32> to vector<1x8x16xf32>
    %171 = arith.subf %167, %170 : vector<1x8x16xf32>
    %172 = math.exp %171 : vector<1x8x16xf32>
    %cst_79 = arith.constant dense<0.000000e+00> : vector<1x8xf32>
    %173 = vector.multi_reduction <add>, %172, %cst_79 [2] : vector<1x8x16xf32> to vector<1x8xf32>
    %174 = vector.shape_cast %173 : vector<1x8xf32> to vector<1x8x1xf32>
    %175 = tpu.reciprocal %174 {approx = true} : vector<1x8x1xf32> -> vector<1x8x1xf32>
    %176 = vector.broadcast %175 : vector<1x8x1xf32> to vector<1x8x16xf32>
    %177 = arith.mulf %172, %176 : vector<1x8x16xf32>
    %178 = arith.truncf %177 : vector<1x8x16xf32> to vector<1x8x16xbf16>
    "tpu.trace_start"() <{level = 10 : i32, message = "bqk,bkd->bqd"}> : () -> ()
    %cst_80 = arith.constant dense<0.000000e+00> : vector<1x8x8xf32>
    %179 = tpu.matmul %178, %166, %cst_80 {dimension_numbers = #tpu.dot_dimension_numbers<[2], [1], [1], [2], [0, 0, 0, 1, 1, 2], [0], [0]>} : vector<1x8x16xbf16>, vector<1x16x8xbf16>, vector<1x8x8xf32> -> vector<1x8x8xf32>
    "tpu.trace_stop"() : () -> ()
    %180 = vector.shape_cast %179 : vector<1x8x8xf32> to vector<8x8xf32>
    %181 = arith.truncf %180 : vector<8x8xf32> to vector<8x8xbf16>
    %c0_81 = arith.constant 0 : index
    %c0_82 = arith.constant 0 : index
    %182 = vector.load %arg32[%c0_81, %c0_82] : memref<8x32xbf16, #tpu.memory_space<vmem>>, vector<8x8xbf16>
    tpu.vector_store %arg32[%c0_81, %c0_82], %181 {strides = array<i32>} : memref<8x32xbf16, #tpu.memory_space<vmem>>, vector<8x8xbf16>,
    %183 = vector.extract_strided_slice %161 {offsets = [0, 0, 8], sizes = [1, 8, 8], strides = [1, 1, 1]} : vector<1x8x32xbf16> to vector<1x8x8xbf16>
    %184 = vector.extract_strided_slice %162 {offsets = [0, 0, 8], sizes = [1, 16, 8], strides = [1, 1, 1]} : vector<1x16x32xbf16> to vector<1x16x8xbf16>
    %185 = vector.extract_strided_slice %163 {offsets = [0, 0, 8], sizes = [1, 16, 8], strides = [1, 1, 1]} : vector<1x16x32xbf16> to vector<1x16x8xbf16>
    "tpu.trace_start"() <{level = 10 : i32, message = "bqd,bkd->bqk"}> : () -> ()
    %cst_83 = arith.constant dense<0.000000e+00> : vector<1x8x16xf32>
    %186 = tpu.matmul %183, %184, %cst_83 {dimension_numbers = #tpu.dot_dimension_numbers<[2], [2], [1], [1], [0, 0, 0, 1, 1, 1], [0], [0]>} : vector<1x8x8xbf16>, vector<1x16x8xbf16>, vector<1x8x16xf32> -> vector<1x8x16xf32>
    "tpu.trace_stop"() : () -> ()
    %cst_84 = arith.constant dense<0xFF800000> : vector<1x8xf32>
    %187 = vector.multi_reduction <maximumf>, %186, %cst_84 [2] : vector<1x8x16xf32> to vector<1x8xf32>
    %188 = vector.shape_cast %187 : vector<1x8xf32> to vector<1x8x1xf32>
    %189 = vector.broadcast %188 : vector<1x8x1xf32> to vector<1x8x16xf32>
    %190 = arith.subf %186, %189 : vector<1x8x16xf32>
    %191 = math.exp %190 : vector<1x8x16xf32>
    %cst_85 = arith.constant dense<0.000000e+00> : vector<1x8xf32>
    %192 = vector.multi_reduction <add>, %191, %cst_85 [2] : vector<1x8x16xf32> to vector<1x8xf32>
    %193 = vector.shape_cast %192 : vector<1x8xf32> to vector<1x8x1xf32>
    %194 = tpu.reciprocal %193 {approx = true} : vector<1x8x1xf32> -> vector<1x8x1xf32>
    %195 = vector.broadcast %194 : vector<1x8x1xf32> to vector<1x8x16xf32>
    %196 = arith.mulf %191, %195 : vector<1x8x16xf32>
    %197 = arith.truncf %196 : vector<1x8x16xf32> to vector<1x8x16xbf16>
    "tpu.trace_start"() <{level = 10 : i32, message = "bqk,bkd->bqd"}> : () -> ()
    %cst_86 = arith.constant dense<0.000000e+00> : vector<1x8x8xf32>
    %198 = tpu.matmul %197, %185, %cst_86 {dimension_numbers = #tpu.dot_dimension_numbers<[2], [1], [1], [2], [0, 0, 0, 1, 1, 2], [0], [0]>} : vector<1x8x16xbf16>, vector<1x16x8xbf16>, vector<1x8x8xf32> -> vector<1x8x8xf32>
    "tpu.trace_stop"() : () -> ()
    %199 = vector.shape_cast %198 : vector<1x8x8xf32> to vector<8x8xf32>
    %200 = arith.truncf %199 : vector<8x8xf32> to vector<8x8xbf16>
    %c0_87 = arith.constant 0 : index
    %c8_88 = arith.constant 8 : index
    %201 = vector.load %arg32[%c0_87, %c8_88] : memref<8x32xbf16, #tpu.memory_space<vmem>>, vector<8x8xbf16>
    tpu.vector_store %arg32[%c0_87, %c8_88], %200 {strides = array<i32>} : memref<8x32xbf16, #tpu.memory_space<vmem>>, vector<8x8xbf16>,
    %202 = vector.extract_strided_slice %161 {offsets = [0, 0, 16], sizes = [1, 8, 8], strides = [1, 1, 1]} : vector<1x8x32xbf16> to vector<1x8x8xbf16>
    %203 = vector.extract_strided_slice %162 {offsets = [0, 0, 16], sizes = [1, 16, 8], strides = [1, 1, 1]} : vector<1x16x32xbf16> to vector<1x16x8xbf16>
    %204 = vector.extract_strided_slice %163 {offsets = [0, 0, 16], sizes = [1, 16, 8], strides = [1, 1, 1]} : vector<1x16x32xbf16> to vector<1x16x8xbf16>
    "tpu.trace_start"() <{level = 10 : i32, message = "bqd,bkd->bqk"}> : () -> ()
    %cst_89 = arith.constant dense<0.000000e+00> : vector<1x8x16xf32>
    %205 = tpu.matmul %202, %203, %cst_89 {dimension_numbers = #tpu.dot_dimension_numbers<[2], [2], [1], [1], [0, 0, 0, 1, 1, 1], [0], [0]>} : vector<1x8x8xbf16>, vector<1x16x8xbf16>, vector<1x8x16xf32> -> vector<1x8x16xf32>
    "tpu.trace_stop"() : () -> ()
    %cst_90 = arith.constant dense<0xFF800000> : vector<1x8xf32>
    %206 = vector.multi_reduction <maximumf>, %205, %cst_90 [2] : vector<1x8x16xf32> to vector<1x8xf32>
    %207 = vector.shape_cast %206 : vector<1x8xf32> to vector<1x8x1xf32>
    %208 = vector.broadcast %207 : vector<1x8x1xf32> to vector<1x8x16xf32>
    %209 = arith.subf %205, %208 : vector<1x8x16xf32>
    %210 = math.exp %209 : vector<1x8x16xf32>
    %cst_91 = arith.constant dense<0.000000e+00> : vector<1x8xf32>
    %211 = vector.multi_reduction <add>, %210, %cst_91 [2] : vector<1x8x16xf32> to vector<1x8xf32>
    %212 = vector.shape_cast %211 : vector<1x8xf32> to vector<1x8x1xf32>
    %213 = tpu.reciprocal %212 {approx = true} : vector<1x8x1xf32> -> vector<1x8x1xf32>
    %214 = vector.broadcast %213 : vector<1x8x1xf32> to vector<1x8x16xf32>
    %215 = arith.mulf %210, %214 : vector<1x8x16xf32>
    %216 = arith.truncf %215 : vector<1x8x16xf32> to vector<1x8x16xbf16>
    "tpu.trace_start"() <{level = 10 : i32, message = "bqk,bkd->bqd"}> : () -> ()
    %cst_92 = arith.constant dense<0.000000e+00> : vector<1x8x8xf32>
    %217 = tpu.matmul %216, %204, %cst_92 {dimension_numbers = #tpu.dot_dimension_numbers<[2], [1], [1], [2], [0, 0, 0, 1, 1, 2], [0], [0]>} : vector<1x8x16xbf16>, vector<1x16x8xbf16>, vector<1x8x8xf32> -> vector<1x8x8xf32>
    "tpu.trace_stop"() : () -> ()
    %218 = vector.shape_cast %217 : vector<1x8x8xf32> to vector<8x8xf32>
    %219 = arith.truncf %218 : vector<8x8xf32> to vector<8x8xbf16>
    %c0_93 = arith.constant 0 : index
    %c16_94 = arith.constant 16 : index
    %220 = vector.load %arg32[%c0_93, %c16_94] : memref<8x32xbf16, #tpu.memory_space<vmem>>, vector<8x8xbf16>
    tpu.vector_store %arg32[%c0_93, %c16_94], %219 {strides = array<i32>} : memref<8x32xbf16, #tpu.memory_space<vmem>>, vector<8x8xbf16>,
    %221 = vector.extract_strided_slice %161 {offsets = [0, 0, 24], sizes = [1, 8, 8], strides = [1, 1, 1]} : vector<1x8x32xbf16> to vector<1x8x8xbf16>
    %222 = vector.extract_strided_slice %162 {offsets = [0, 0, 24], sizes = [1, 16, 8], strides = [1, 1, 1]} : vector<1x16x32xbf16> to vector<1x16x8xbf16>
    %223 = vector.extract_strided_slice %163 {offsets = [0, 0, 24], sizes = [1, 16, 8], strides = [1, 1, 1]} : vector<1x16x32xbf16> to vector<1x16x8xbf16>
    "tpu.trace_start"() <{level = 10 : i32, message = "bqd,bkd->bqk"}> : () -> ()
    %cst_95 = arith.constant dense<0.000000e+00> : vector<1x8x16xf32>
    %224 = tpu.matmul %221, %222, %cst_95 {dimension_numbers = #tpu.dot_dimension_numbers<[2], [2], [1], [1], [0, 0, 0, 1, 1, 1], [0], [0]>} : vector<1x8x8xbf16>, vector<1x16x8xbf16>, vector<1x8x16xf32> -> vector<1x8x16xf32>
    "tpu.trace_stop"() : () -> ()
    %cst_96 = arith.constant dense<0xFF800000> : vector<1x8xf32>
    %225 = vector.multi_reduction <maximumf>, %224, %cst_96 [2] : vector<1x8x16xf32> to vector<1x8xf32>
    %226 = vector.shape_cast %225 : vector<1x8xf32> to vector<1x8x1xf32>
    %227 = vector.broadcast %226 : vector<1x8x1xf32> to vector<1x8x16xf32>
    %228 = arith.subf %224, %227 : vector<1x8x16xf32>
    %229 = math.exp %228 : vector<1x8x16xf32>
    %cst_97 = arith.constant dense<0.000000e+00> : vector<1x8xf32>
    %230 = vector.multi_reduction <add>, %229, %cst_97 [2] : vector<1x8x16xf32> to vector<1x8xf32>
    %231 = vector.shape_cast %230 : vector<1x8xf32> to vector<1x8x1xf32>
    %232 = tpu.reciprocal %231 {approx = true} : vector<1x8x1xf32> -> vector<1x8x1xf32>
    %233 = vector.broadcast %232 : vector<1x8x1xf32> to vector<1x8x16xf32>
    %234 = arith.mulf %229, %233 : vector<1x8x16xf32>
    %235 = arith.truncf %234 : vector<1x8x16xf32> to vector<1x8x16xbf16>
    "tpu.trace_start"() <{level = 10 : i32, message = "bqk,bkd->bqd"}> : () -> ()
    %cst_98 = arith.constant dense<0.000000e+00> : vector<1x8x8xf32>
    %236 = tpu.matmul %235, %223, %cst_98 {dimension_numbers = #tpu.dot_dimension_numbers<[2], [1], [1], [2], [0, 0, 0, 1, 1, 2], [0], [0]>} : vector<1x8x16xbf16>, vector<1x16x8xbf16>, vector<1x8x8xf32> -> vector<1x8x8xf32>
    "tpu.trace_stop"() : () -> ()
    %237 = vector.shape_cast %236 : vector<1x8x8xf32> to vector<8x8xf32>
    %238 = arith.truncf %237 : vector<8x8xf32> to vector<8x8xbf16>
    %c0_99 = arith.constant 0 : index
    %c24_100 = arith.constant 24 : index
    %239 = vector.load %arg32[%c0_99, %c24_100] : memref<8x32xbf16, #tpu.memory_space<vmem>>, vector<8x8xbf16>
    tpu.vector_store %arg32[%c0_99, %c24_100], %238 {strides = array<i32>} : memref<8x32xbf16, #tpu.memory_space<vmem>>, vector<8x8xbf16>,
    %c0_101 = arith.constant 0 : index
    %c0_102 = arith.constant 0 : index
    %240 = vector.load %arg32[%c0_101, %c0_102] : memref<8x32xbf16, #tpu.memory_space<vmem>>, vector<8x32xbf16>
    %c0_103 = arith.constant 0 : index
    %c0_104 = arith.constant 0 : index
    %241 = vector.load %arg19[%c0_103, %c0_104] : memref<32x32xbf16, #tpu.memory_space<vmem>>, vector<32x32xbf16>
    %cst_105 = arith.constant dense<0.000000e+00> : vector<8x32xf32>
    %242 = tpu.matmul %240, %241, %cst_105 {dimension_numbers = #tpu.dot_dimension_numbers<[1], [0], [0], [1], [0, 0, 1, 1], [], []>} : vector<8x32xbf16>, vector<32x32xbf16>, vector<8x32xf32> -> vector<8x32xf32>
    %c0_106 = arith.constant 0 : index
    %c0_107 = arith.constant 0 : index
    %243 = vector.load %arg20[%c0_106, %c0_107] : memref<1x32xf32, #tpu.memory_space<vmem>>, vector<1x32xf32>
    %244 = vector.broadcast %243 : vector<1x32xf32> to vector<8x32xf32>
    %245 = arith.addf %242, %244 : vector<8x32xf32>
    %246 = arith.addf %137, %245 : vector<8x32xf32>
    %cst_108 = arith.constant dense<0.000000e+00> : vector<8xf32>
    %247 = vector.multi_reduction <add>, %246, %cst_108 [1] : vector<8x32xf32> to vector<8xf32>
    %248 = vector.shape_cast %247 : vector<8xf32> to vector<8x1xf32>
    %cst_109 = arith.constant 3.200000e+01 : f32
    %249 = vector.broadcast %cst_109 : f32 to vector<8x1xf32>
    %250 = arith.divf %248, %249 : vector<8x1xf32>
    %251 = vector.broadcast %250 : vector<8x1xf32> to vector<8x32xf32>
    %252 = arith.subf %246, %251 : vector<8x32xf32>
    %253 = arith.mulf %252, %252 : vector<8x32xf32>
    %cst_110 = arith.constant dense<0.000000e+00> : vector<8xf32>
    %254 = vector.multi_reduction <add>, %253, %cst_110 [1] : vector<8x32xf32> to vector<8xf32>
    %255 = vector.shape_cast %254 : vector<8xf32> to vector<8x1xf32>
    %cst_111 = arith.constant 3.200000e+01 : f32
    %256 = vector.broadcast %cst_111 : f32 to vector<8x1xf32>
    %257 = arith.divf %255, %256 : vector<8x1xf32>
    %cst_112 = arith.constant 9.99999974E-6 : f32
    %258 = vector.broadcast %cst_112 : f32 to vector<8x1xf32>
    %259 = arith.addf %257, %258 : vector<8x1xf32>
    %260 = math.rsqrt %259 : vector<8x1xf32>
    %261 = vector.broadcast %260 : vector<8x1xf32> to vector<8x32xf32>
    %262 = arith.mulf %252, %261 : vector<8x32xf32>
    %c0_113 = arith.constant 0 : index
    %c0_114 = arith.constant 0 : index
    %263 = vector.load %arg27[%c0_113, %c0_114] : memref<1x32xf32, #tpu.memory_space<vmem>>, vector<1x32xf32>
    %264 = vector.broadcast %263 : vector<1x32xf32> to vector<8x32xf32>
    %265 = arith.mulf %262, %264 : vector<8x32xf32>
    %c0_115 = arith.constant 0 : index
    %c0_116 = arith.constant 0 : index
    %266 = vector.load %arg28[%c0_115, %c0_116] : memref<1x32xf32, #tpu.memory_space<vmem>>, vector<1x32xf32>
    %267 = vector.broadcast %266 : vector<1x32xf32> to vector<8x32xf32>
    %268 = arith.addf %265, %267 : vector<8x32xf32>
    %269 = arith.truncf %268 : vector<8x32xf32> to vector<8x32xbf16>
    %c0_117 = arith.constant 0 : index
    %c0_118 = arith.constant 0 : index
    %270 = vector.load %arg21[%c0_117, %c0_118] : memref<32x64xbf16, #tpu.memory_space<vmem>>, vector<32x64xbf16>
    %cst_119 = arith.constant dense<0.000000e+00> : vector<8x64xf32>
    %271 = tpu.matmul %269, %270, %cst_119 {dimension_numbers = #tpu.dot_dimension_numbers<[1], [0], [0], [1], [0, 0, 1, 1], [], []>} : vector<8x32xbf16>, vector<32x64xbf16>, vector<8x64xf32> -> vector<8x64xf32>
    %c0_120 = arith.constant 0 : index
    %c0_121 = arith.constant 0 : index
    %272 = vector.load %arg22[%c0_120, %c0_121] : memref<1x64xf32, #tpu.memory_space<vmem>>, vector<1x64xf32>
    %273 = vector.broadcast %272 : vector<1x64xf32> to vector<8x64xf32>
    %274 = arith.addf %271, %273 : vector<8x64xf32>
    %cst_122 = arith.constant 0.000000e+00 : f32
    %275 = vector.broadcast %cst_122 : f32 to vector<8x64xf32>
    %276 = arith.maximumf %274, %275 : vector<8x64xf32>
    %277 = arith.truncf %276 : vector<8x64xf32> to vector<8x64xbf16>
    %c0_123 = arith.constant 0 : index
    %c0_124 = arith.constant 0 : index
    %278 = vector.load %arg23[%c0_123, %c0_124] : memref<64x32xbf16, #tpu.memory_space<vmem>>, vector<64x32xbf16>
    %cst_125 = arith.constant dense<0.000000e+00> : vector<8x32xf32>
    %279 = tpu.matmul %277, %278, %cst_125 {dimension_numbers = #tpu.dot_dimension_numbers<[1], [0], [0], [1], [0, 0, 1, 1], [], []>} : vector<8x64xbf16>, vector<64x32xbf16>, vector<8x32xf32> -> vector<8x32xf32>
    %c0_126 = arith.constant 0 : index
    %c0_127 = arith.constant 0 : index
    %280 = vector.load %arg24[%c0_126, %c0_127] : memref<1x32xf32, #tpu.memory_space<vmem>>, vector<1x32xf32>
    %281 = vector.broadcast %280 : vector<1x32xf32> to vector<8x32xf32>
    %282 = arith.addf %279, %281 : vector<8x32xf32>
    %283 = arith.addf %268, %282 : vector<8x32xf32>
    %cst_128 = arith.constant dense<0.000000e+00> : vector<8xf32>
    %284 = vector.multi_reduction <add>, %283, %cst_128 [1] : vector<8x32xf32> to vector<8xf32>
    %285 = vector.shape_cast %284 : vector<8xf32> to vector<8x1xf32>
    %cst_129 = arith.constant 3.200000e+01 : f32
    %286 = vector.broadcast %cst_129 : f32 to vector<8x1xf32>
    %287 = arith.divf %285, %286 : vector<8x1xf32>
    %288 = vector.broadcast %287 : vector<8x1xf32> to vector<8x32xf32>
    %289 = arith.subf %283, %288 : vector<8x32xf32>
    %290 = arith.mulf %289, %289 : vector<8x32xf32>
    %cst_130 = arith.constant dense<0.000000e+00> : vector<8xf32>
    %291 = vector.multi_reduction <add>, %290, %cst_130 [1] : vector<8x32xf32> to vector<8xf32>
    %292 = vector.shape_cast %291 : vector<8xf32> to vector<8x1xf32>
    %cst_131 = arith.constant 3.200000e+01 : f32
    %293 = vector.broadcast %cst_131 : f32 to vector<8x1xf32>
    %294 = arith.divf %292, %293 : vector<8x1xf32>
    %cst_132 = arith.constant 9.99999974E-6 : f32
    %295 = vector.broadcast %cst_132 : f32 to vector<8x1xf32>
    %296 = arith.addf %294, %295 : vector<8x1xf32>
    %297 = math.rsqrt %296 : vector<8x1xf32>
    %298 = vector.broadcast %297 : vector<8x1xf32> to vector<8x32xf32>
    %299 = arith.mulf %289, %298 : vector<8x32xf32>
    %c0_133 = arith.constant 0 : index
    %c0_134 = arith.constant 0 : index
    %300 = vector.load %arg29[%c0_133, %c0_134] : memref<1x32xf32, #tpu.memory_space<vmem>>, vector<1x32xf32>
    %301 = vector.broadcast %300 : vector<1x32xf32> to vector<8x32xf32>
    %302 = arith.mulf %299, %301 : vector<8x32xf32>
    %c0_135 = arith.constant 0 : index
    %c0_136 = arith.constant 0 : index
    %303 = vector.load %arg30[%c0_135, %c0_136] : memref<1x32xf32, #tpu.memory_space<vmem>>, vector<1x32xf32>
    %304 = vector.broadcast %303 : vector<1x32xf32> to vector<8x32xf32>
    %305 = arith.addf %302, %304 : vector<8x32xf32>
    %306 = vector.shape_cast %305 : vector<8x32xf32> to vector<1x8x32xf32>
    %c0_137 = arith.constant 0 : index
    %c0_138 = arith.constant 0 : index
    %c0_139 = arith.constant 0 : index
    %307 = vector.load %arg31[%c0_137, %c0_138, %c0_139] : memref<1x8x32xf32, #tpu.memory_space<vmem>>, vector<1x8x32xf32>
    tpu.vector_store %arg31[%c0_137, %c0_138, %c0_139], %306 {strides = array<i32>} : memref<1x8x32xf32, #tpu.memory_space<vmem>>, vector<1x8x32xf32>,
    return
  }
  func.func @transform_0(%arg0: i32) -> (i32, i32, i32) {
    %c0_i32 = arith.constant 0 : i32
    %c0_i32_0 = arith.constant 0 : i32
    %c0_i32_1 = arith.constant 0 : i32
    return %arg0, %c0_i32, %c0_i32_0 : i32, i32, i32
  }
  func.func @transform_1(%arg0: i32) -> (i32, i32, i32) {
    %c0_i32 = arith.constant 0 : i32
    %c0_i32_0 = arith.constant 0 : i32
    %c0_i32_1 = arith.constant 0 : i32
    return %arg0, %c0_i32, %c0_i32_0 : i32, i32, i32
  }
  func.func @transform_2(%arg0: i32) -> (i32, i32, i32) {
    %c0_i32 = arith.constant 0 : i32
    %c0_i32_0 = arith.constant 0 : i32
    %c0_i32_1 = arith.constant 0 : i32
    return %arg0, %c0_i32, %c0_i32_0 : i32, i32, i32
  }
  func.func @transform_3(%arg0: i32) -> (i32, i32, i32) {
    %c0_i32 = arith.constant 0 : i32
    %c0_i32_0 = arith.constant 0 : i32
    %c0_i32_1 = arith.constant 0 : i32
    return %arg0, %c0_i32, %c0_i32_0 : i32, i32, i32
  }
  func.func @transform_4(%arg0: i32) -> (i32, i32) {
    %c0_i32 = arith.constant 0 : i32
    %c0_i32_0 = arith.constant 0 : i32
    %c0_i32_1 = arith.constant 0 : i32
    return %c0_i32, %c0_i32_0 : i32, i32
  }
  func.func @transform_5(%arg0: i32) -> (i32, i32) {
    %c0_i32 = arith.constant 0 : i32
    %c0_i32_0 = arith.constant 0 : i32
    %c0_i32_1 = arith.constant 0 : i32
    return %c0_i32, %c0_i32_0 : i32, i32
  }
  func.func @transform_6(%arg0: i32) -> (i32, i32) {
    %c0_i32 = arith.constant 0 : i32
    %c0_i32_0 = arith.constant 0 : i32
    %c0_i32_1 = arith.constant 0 : i32
    return %c0_i32, %c0_i32_0 : i32, i32
  }
  func.func @transform_7(%arg0: i32) -> (i32, i32) {
    %c0_i32 = arith.constant 0 : i32
    %c0_i32_0 = arith.constant 0 : i32
    %c0_i32_1 = arith.constant 0 : i32
    return %c0_i32, %c0_i32_0 : i32, i32
  }
  func.func @transform_8(%arg0: i32) -> (i32, i32) {
    %c0_i32 = arith.constant 0 : i32
    %c0_i32_0 = arith.constant 0 : i32
    %c0_i32_1 = arith.constant 0 : i32
    return %c0_i32, %c0_i32_0 : i32, i32
  }
  func.func @transform_9(%arg0: i32) -> (i32, i32) {
    %c0_i32 = arith.constant 0 : i32
    %c0_i32_0 = arith.constant 0 : i32
    %c0_i32_1 = arith.constant 0 : i32
    return %c0_i32, %c0_i32_0 : i32, i32
  }
  func.func @transform_10(%arg0: i32) -> (i32, i32) {
    %c0_i32 = arith.constant 0 : i32
    %c0_i32_0 = arith.constant 0 : i32
    %c0_i32_1 = arith.constant 0 : i32
    return %c0_i32, %c0_i32_0 : i32, i32
  }
  func.func @transform_11(%arg0: i32) -> (i32, i32) {
    %c0_i32 = arith.constant 0 : i32
    %c0_i32_0 = arith.constant 0 : i32
    %c0_i32_1 = arith.constant 0 : i32
    return %c0_i32, %c0_i32_0 : i32, i32
  }
  func.func @transform_12(%arg0: i32) -> (i32, i32) {
    %c0_i32 = arith.constant 0 : i32
    %c0_i32_0 = arith.constant 0 : i32
    %c0_i32_1 = arith.constant 0 : i32
    return %c0_i32, %c0_i32_0 : i32, i32
  }
  func.func @transform_13(%arg0: i32) -> (i32, i32) {
    %c0_i32 = arith.constant 0 : i32
    %c0_i32_0 = arith.constant 0 : i32
    %c0_i32_1 = arith.constant 0 : i32
    return %c0_i32, %c0_i32_0 : i32, i32
  }
  func.func @transform_14(%arg0: i32) -> (i32, i32) {
    %c0_i32 = arith.constant 0 : i32
    %c0_i32_0 = arith.constant 0 : i32
    %c0_i32_1 = arith.constant 0 : i32
    return %c0_i32, %c0_i32_0 : i32, i32
  }
  func.func @transform_15(%arg0: i32) -> (i32, i32) {
    %c0_i32 = arith.constant 0 : i32
    %c0_i32_0 = arith.constant 0 : i32
    %c0_i32_1 = arith.constant 0 : i32
    return %c0_i32, %c0_i32_0 : i32, i32
  }
  func.func @transform_16(%arg0: i32) -> (i32, i32) {
    %c0_i32 = arith.constant 0 : i32
    %c0_i32_0 = arith.constant 0 : i32
    %c0_i32_1 = arith.constant 0 : i32
    return %c0_i32, %c0_i32_0 : i32, i32
  }
  func.func @transform_17(%arg0: i32) -> (i32, i32) {
    %c0_i32 = arith.constant 0 : i32
    %c0_i32_0 = arith.constant 0 : i32
    %c0_i32_1 = arith.constant 0 : i32
    return %c0_i32, %c0_i32_0 : i32, i32
  }
  func.func @transform_18(%arg0: i32) -> (i32, i32) {
    %c0_i32 = arith.constant 0 : i32
    %c0_i32_0 = arith.constant 0 : i32
    %c0_i32_1 = arith.constant 0 : i32
    return %c0_i32, %c0_i32_0 : i32, i32
  }
  func.func @transform_19(%arg0: i32) -> (i32, i32) {
    %c0_i32 = arith.constant 0 : i32
    %c0_i32_0 = arith.constant 0 : i32
    %c0_i32_1 = arith.constant 0 : i32
    return %c0_i32, %c0_i32_0 : i32, i32
  }
  func.func @transform_20(%arg0: i32) -> (i32, i32) {
    %c0_i32 = arith.constant 0 : i32
    %c0_i32_0 = arith.constant 0 : i32
    %c0_i32_1 = arith.constant 0 : i32
    return %c0_i32, %c0_i32_0 : i32, i32
  }
  func.func @transform_21(%arg0: i32) -> (i32, i32) {
    %c0_i32 = arith.constant 0 : i32
    %c0_i32_0 = arith.constant 0 : i32
    %c0_i32_1 = arith.constant 0 : i32
    return %c0_i32, %c0_i32_0 : i32, i32
  }
  func.func @transform_22(%arg0: i32) -> (i32, i32) {
    %c0_i32 = arith.constant 0 : i32
    %c0_i32_0 = arith.constant 0 : i32
    %c0_i32_1 = arith.constant 0 : i32
    return %c0_i32, %c0_i32_0 : i32, i32
  }
  func.func @transform_23(%arg0: i32) -> (i32, i32) {
    %c0_i32 = arith.constant 0 : i32
    %c0_i32_0 = arith.constant 0 : i32
    %c0_i32_1 = arith.constant 0 : i32
    return %c0_i32, %c0_i32_0 : i32, i32
  }
  func.func @transform_24(%arg0: i32) -> (i32, i32) {
    %c0_i32 = arith.constant 0 : i32
    %c0_i32_0 = arith.constant 0 : i32
    %c0_i32_1 = arith.constant 0 : i32
    return %c0_i32, %c0_i32_0 : i32, i32
  }
  func.func @transform_25(%arg0: i32) -> (i32, i32) {
    %c0_i32 = arith.constant 0 : i32
    %c0_i32_0 = arith.constant 0 : i32
    %c0_i32_1 = arith.constant 0 : i32
    return %c0_i32, %c0_i32_0 : i32, i32
  }
  func.func @transform_26(%arg0: i32) -> (i32, i32) {
    %c0_i32 = arith.constant 0 : i32
    %c0_i32_0 = arith.constant 0 : i32
    %c0_i32_1 = arith.constant 0 : i32
    return %c0_i32, %c0_i32_0 : i32, i32
  }
  func.func @transform_27(%arg0: i32) -> (i32, i32) {
    %c0_i32 = arith.constant 0 : i32
    %c0_i32_0 = arith.constant 0 : i32
    %c0_i32_1 = arith.constant 0 : i32
    return %c0_i32, %c0_i32_0 : i32, i32
  }
  func.func @transform_28(%arg0: i32) -> (i32, i32) {
    %c0_i32 = arith.constant 0 : i32
    %c0_i32_0 = arith.constant 0 : i32
    %c0_i32_1 = arith.constant 0 : i32
    return %c0_i32, %c0_i32_0 : i32, i32
  }
  func.func @transform_29(%arg0: i32) -> (i32, i32) {
    %c0_i32 = arith.constant 0 : i32
    %c0_i32_0 = arith.constant 0 : i32
    %c0_i32_1 = arith.constant 0 : i32
    return %c0_i32, %c0_i32_0 : i32, i32
  }
  func.func @transform_30(%arg0: i32) -> (i32, i32, i32) {
    %c0_i32 = arith.constant 0 : i32
    %c0_i32_0 = arith.constant 0 : i32
    %c0_i32_1 = arith.constant 0 : i32
    return %arg0, %c0_i32, %c0_i32_0 : i32, i32, i32
  }
}

</mosaic_0001>

<bundles_post_ra>
// kernel: tpu_custom_call.1
= control target key start
LH: loop header
LB: loop body
LE: loop exit
PB: predicated region body
PF: predicated region fallthrough
CT: control target
= control target key end

     0   :  { %s3612_s6 = smov 1   ;;  %s3613_s10 = smov 2   ;;  %s4359_s0 = inlined_call_operand.smem [shape: u32[31], index: -1, kind: input, shape index: {}] }
   0x1   :  { %s3675_s5 = sld [smem:[%s4359_s0]]   ;;  %s3614_s14 = smov 3  }
   0x2   :  { %s3680_s9 = sld [smem:[%s4359_s0 + %s3612_s6]]   ;;  %s3615_s18 = smov 4  }
   0x3   :  { %s3685_s13 = sld [smem:[%s4359_s0 + %s3613_s10]]   ;;  %s3616_s22 = smov 5  }
   0x4   :  { %s3690_s17 = sld [smem:[%s4359_s0 + %s3614_s14]]   ;;  %s3617_s26 = smov 6  }
   0x5   :  { %s3695_s21 = sld [smem:[%s4359_s0 + %s3615_s18]]   ;;  %s3618_s30 = smov 7  }
   0x6   :  { %s3700_s25 = sld [smem:[%s4359_s0 + %s3616_s22]]   ;;  %s3619_s4 = smov 8  }
   0x7   :  { %4375 = sst [smem:[#allocation41_spill]] %s3675_s5  ;;  %s3620_s10 = smov 9  }
   0x8   :  { %4376 = sst [smem:[#allocation42_spill]] %s3680_s9  ;;  %s3621_s15 = smov 10  }
   0x9   :  { %4377 = sst [smem:[#allocation43_spill]] %s3685_s13  ;;  %s3622_s20 = smov 11  }
   0xa   :  { %4378 = sst [smem:[#allocation44_spill]] %s3690_s17  ;;  %s3624_s1 = smov 13  }
   0xb   :  { %4379 = sst [smem:[#allocation45_spill]] %s3695_s21  ;;  %s3625_s7 = smov 14  }
   0xc   :  { %4380 = sst [smem:[#allocation46_spill]] %s3700_s25  ;;  %s3627_s22 = smov 16  }
   0xd   :  { %s3705_s29 = sld [smem:[%s4359_s0 + %s3617_s26]]   ;;  %s3623_s26 = smov 12  }
   0xe   :  { %s3710_s3 = sld [smem:[%s4359_s0 + %s3618_s30]]   ;;  %s3628_s28 = smov 17  }
   0xf   :  { %s3715_s8 = sld [smem:[%s4359_s0 + %s3619_s4]]  }
  0x10   :  { %s3720_s14 = sld [smem:[%s4359_s0 + %s3620_s10]]  }
  0x11   :  { %s3725_s19 = sld [smem:[%s4359_s0 + %s3621_s15]]   ;;  %s3626_s15 = smov 15  }
  0x12   :  { %s3730_s24 = sld [smem:[%s4359_s0 + %s3622_s20]]  }
  0x13   :  { %s3735_s30 = sld [smem:[%s4359_s0 + %s3623_s26]]  }
  0x14   :  { %4381 = sst [smem:[#allocation47_spill]] %s3710_s3 }
  0x15   :  { %4382 = sst [smem:[#allocation48_spill]] %s3715_s8 }
  0x16   :  { %4383 = sst [smem:[#allocation49_spill]] %s3720_s14 }
  0x17   :  { %4384 = sst [smem:[#allocation50_spill]] %s3725_s19 }
  0x18   :  { %4385 = sst [smem:[#allocation51_spill]] %s3730_s24 }
  0x19   :  { %s3740_s6 = sld [smem:[%s4359_s0 + %s3624_s1]]  }
  0x1a   :  { %s3745_s12 = sld [smem:[%s4359_s0 + %s3625_s7]]   ;;  %s3629_s7 = smov 18  }
  0x1b   :  { %s3750_s20 = sld [smem:[%s4359_s0 + %s3626_s15]]   ;;  %s3630_s15 = smov 19  }
  0x1c   :  { %s3755_s27 = sld [smem:[%s4359_s0 + %s3627_s22]]   ;;  %s3631_s22 = smov 20  }
  0x1d   :  { %s3760_s4 = sld [smem:[%s4359_s0 + %s3628_s28]]   ;;  %s3632_s28 = smov 21  }
  0x1e   :  { %s3770_s9 = sld [smem:[%s4359_s0 + %s3630_s15]]   ;;  %s3634_s15 = smov 23  }
  0x1f   :  { %4386 = sst [smem:[#allocation52_spill]] %s3740_s6 }
  0x20   :  { %4387 = sst [smem:[#allocation53_spill]] %s3745_s12 }
  0x21   :  { %s3765_s6 = sld [smem:[%s4359_s0 + %s3629_s7]]   ;;  %s3633_s7 = smov 22  }
  0x22   :  { %s3775_s24 = sld [smem:[%s4359_s0 + %s3631_s22]]   ;;  %s3635_s22 = smov 24  }
  0x23   :  { %4388 = sst [smem:[#allocation54_spill]] %s3760_s4 }
  0x24   :  { %4390 = sst [smem:[#allocation56_spill]] %s3770_s9 }
  0x25   :  { %s3780_s14 = sld [smem:[%s4359_s0 + %s3632_s28]]   ;;  %s3636_s28 = smov 25  }
  0x26   :  { %s3785_s3 = sld [smem:[%s4359_s0 + %s3633_s7]]   ;;  %s3637_s7 = smov 26  }
  0x27   :  { %4389 = sst [smem:[#allocation55_spill]] %s3765_s6 }
  0x28   :  { %s3790_s25 = sld [smem:[%s4359_s0 + %s3634_s15]]   ;;  %s3638_s15 = smov 27  }
  0x29   :  { %s3795_s5 = sld [smem:[%s4359_s0 + %s3635_s22]]   ;;  %s3639_s22 = smov 28  }
  0x2a   :  { %s3800_s17 = sld [smem:[%s4359_s0 + %s3636_s28]]   ;;  %s3640_s28 = smov 29  }
  0x2b   :  { %4391 = sst [smem:[#allocation57_spill]] %s3780_s14 }
  0x2c   :  { %4392 = sst [smem:[#allocation58_spill]] %s3785_s3 }
  0x2d   :  { %s3805_s3 = sld [smem:[%s4359_s0 + %s3637_s7]]   ;;  %s3641_s7 = smov 30  }
  0x2e   :  { %4393 = sst [smem:[#allocation59_spill]] %s3790_s25 }
  0x2f   :  { %4394 = sst [smem:[#allocation60_spill]] %s3795_s5 }
  0x30   :  { %4395 = sst [smem:[#allocation61_spill]] %s3800_s17 }
  0x31   :  { %s3810_s25 = sld [smem:[%s4359_s0 + %s3638_s15]]  }
  0x32   :  { %s3815_s5 = sld [smem:[%s4359_s0 + %s3639_s22]]  }
  0x33   :  { %4396 = sst [smem:[#allocation62_spill]] %s3805_s3 }
  0x34   :  { %s3820_s17 = sld [smem:[%s4359_s0 + %s3640_s28]]  }
  0x35   :  { %s3825_s13 = sld [smem:[%s4359_s0 + %s3641_s7]]  }
  0x37   :  { %4397 = sst [smem:[#allocation63_spill]] %s3810_s25 }
  0x38   :  { %4398 = sst [smem:[#allocation64_spill]] %s3815_s5 }
  0x3a   :  { %4399 = sst [smem:[#allocation65_spill]] %s3820_s17 }
  0x3b   :  { %4400 = sst [smem:[#allocation66_spill]] %s3825_s13 }
  0x3c   :  { %66 = vsyncpa [#allocation4], 0 }
  0x3d   :  { %68 = vsyncpa [#allocation4 + $0x1], 0 }
  0x3e   :  { %69 = vsyncpa [#allocation7], 0 }
  0x3f   :  { %71 = vsyncpa [#allocation7 + $0x1], 0 }
  0x40   :  { %72 = vsyncpa [#allocation10], 0 }
  0x41   :  { %73 = vsyncpa [#allocation13], 0 }
  0x42   :  { %74 = vsyncpa [#allocation16], 0 }
  0x43   :  { %75 = vsyncpa [#allocation19], 0 }
  0x44   :  { %76 = vsyncpa [#allocation22], 0 }
  0x45   :  { %77 = vsyncpa [#allocation25], 0 }
  0x46   :  { %78 = vsyncpa [#allocation28], 0 }
  0x47   :  { %79 = vsyncpa [#allocation5], 0 }
  0x48   :  { %81 = vsyncpa [#allocation5 + $0x1], 0  ;;  %s3827_s15 = smov 0   ;;  %s3829_s16 = smov 0  }
  0x49   :  { %s3831_s18 = smov 0   ;;  %s3833_s0 = smov 0  }
  0x4a LB: > { %s4401_s19 = sld [smem:[#allocation50_spill]]  ;;  %s3851_s23 = sadd.s32 4294967295, %s3610_s0   ;;  %s3598_s15 = sphi %s3827_s15, %s4438_s15   ;;  %s3610_s0 = sphi %s3833_s0, %s4441_s0   ;;  %s3606_s18 = sphi %s3831_s18, %s4440_s18   ;;  %s3602_s16 = sphi %s3829_s16, %s4439_s16  }
  0x4b   : > { %s4402_s14 = sld [smem:[#allocation57_spill]]  ;;  %p2555_p0 = scmp.ge.s32.totalorder %s3610_s0, 1 }
  0x4c   : > { %s4403_s12 = sld [smem:[#allocation53_spill]]  ;;  %p160_p1 = scmp.eq.s32.totalorder %s3851_s23, 0 }
  0x4d   : > { %s4404_s9 = sld [smem:[#allocation56_spill]]  ;;  %p768_p2 = scmp.lt.s32.totalorder %s3610_s0, 3 }
  0x4e   : > { %s4405_s8 = sld [smem:[#allocation48_spill]]  ;;  %s3642_s28 = smov [#allocation8]  }
  0x4f   : > { %s4406_s6 = sld [smem:[#allocation55_spill]]  ;;  %p3856_p3 = pnand %p2555_p0, %p768_p2 }
  0x50   : > { %s4407_s4 = sld [smem:[#allocation54_spill]]  ;;  %s3860_s1 = sshll.u32 %s3642_s28, 4  ;;  %s782_s1 = int_to_ptr.vmem [resolvable:$true] %s3860_s1 }
  0x51   : > { %s4408_s3 = sld [smem:[#allocation62_spill]]  ;;  %p2801_p4 = pneg %p3856_p3 }
  0x52   : > { %s4409_s21 = sld [smem:[#allocation45_spill]]  ;;  %s796_s2 = sshll.u32 %s3705_s29, 4  ;;  %s3873_s2 = int_to_ptr.hbm [resolvable:$true] %s796_s2 }
  0x53   : > { %s4410_s26 = scalar_select %p3856_p3, 1, 0 }
  0x54   : > { %p3869_p6 = pnand %p2801_p4, %p160_p1  ;;  %s830_s10 = sshll.u32 %s4401_s19, 4  ;;  %s3896_s10 = int_to_ptr.hbm [resolvable:$true] %s830_s10 }
  0x55   : > { %4411 = sst [smem:[#allocation67_spill]] %s4410_s26  ;;  %s3643_s11 = smov [#allocation9]  }
  0x56   : > { %s3876_s28 = sshll.u32 %s3643_s11, 4  ;;  %p3881_p8 = pneg %p3869_p6  ;;  %s799_s28 = int_to_ptr.vmem [resolvable:$true] %s3876_s28 }
  0x58   : > { %s779_s22 = sshll.u32 %s4409_s21, 4  ;;  %s3035_s25 = scalar_lea.hbm %s4409_s21, 16  ;;  %s3848_s22 = int_to_ptr.hbm [resolvable:$true] %s779_s22 }
  0x59   : > { %s3028_s17 = sshra.s32 %s3848_s22, 4  ;;  %s3029_s17 = int_to_ptr.hbm [resolvable:$true] %s3028_s17 }
  0x5a   : > { %s3030_s13 = scalar_lea.hbm %s3029_s17, 16  ;;  %p3036_p11 = scmp.lt.s32.totalorder %s3029_s17, %s4409_s21 }
  0x5b   : > { %p3031_p7 = scmp.ne.s32.totalorder %s3029_s17, %s3030_s13  ;;  %p3037_p12 = scmp.lt.s32.totalorder %s3035_s25, %s3030_s13 }
  0x5d   : > { %p3033_p9 = pnand %p3881_p8, %p3031_p7  ;;  %p3038_p13 = por %p3037_p12, %p3036_p11 }
  0x5f   : > { %p3034_p10 = pneg %p3033_p9 }
  0x61   : > { %p3039_p0 = pnand %p3038_p13, %p3034_p10 }
  0x63   : > { %3042 = shalt.err (!%p3039_p0)
}
  0x64   : > { %s3644_s11 = smov 64   ;;  %s3645_s26 = smov 4  }
  0x65   : > { %2804 = dma.hbm_to_vmem [thread:$0]  (!%p3869_p6), %s3848_s22, 256, %s782_s1, [#allocation7], %s3644_s11, %s3644_s11, %s3645_s26  }
  0x66   : > { %s3058_s13 = sshra.s32 %s3873_s2, 4  ;;  %s3065_s25 = scalar_lea.hbm %s3705_s29, 16  ;;  %s3059_s13 = int_to_ptr.hbm [resolvable:$true] %s3058_s13 }
  0x67   : > { %s3060_s17 = scalar_lea.hbm %s3059_s13, 16  ;;  %p3066_p9 = scmp.lt.s32.totalorder %s3059_s13, %s3705_s29 }
  0x68   : > { %p3061_p2 = scmp.ne.s32.totalorder %s3059_s13, %s3060_s17  ;;  %p3067_p10 = scmp.lt.s32.totalorder %s3065_s25, %s3060_s17 }
  0x6a   : > { %p3063_p4 = pnand %p3061_p2, %p3881_p8  ;;  %p3068_p11 = por %p3067_p10, %p3066_p9 }
  0x6c   : > { %p3064_p7 = pneg %p3063_p4 }
  0x6e   : > { %p3069_p12 = pnand %p3068_p11, %p3064_p7 }
  0x70   : > { %3072 = shalt.err (!%p3069_p12)
}
  0x71   : > { %2807 = dma.hbm_to_vmem [thread:$0]  (!%p3869_p6), %s3873_s2, 256, %s799_s28, [#allocation10], %s3644_s11, %s3644_s11, %s3645_s26  }
  0x72   : > { %s864_s22 = sshll.u32 %s4403_s12, 4  ;;  %s3646_s1 = smov [#allocation12]   ;;  %s3910_s22 = int_to_ptr.hbm [resolvable:$true] %s864_s22 }
  0x73   : > { %s832_s21 = sshll.u32 %s3646_s1, 4  ;;  %s3088_s13 = sshra.s32 %s3896_s10, 4  ;;  %s833_s21 = int_to_ptr.vmem [resolvable:$true] %s832_s21  ;;  %s3089_s13 = int_to_ptr.hbm [resolvable:$true] %s3088_s13 }
  0x74   : > { %s3090_s17 = scalar_lea.hbm %s3089_s13, 16  ;;  %s3095_s25 = scalar_lea.hbm %s4401_s19, 16 }
  0x75   : > { %p3091_p13 = scmp.ne.s32.totalorder %s3089_s13, %s3090_s17  ;;  %p3096_p4 = scmp.lt.s32.totalorder %s3089_s13, %s4401_s19 }
  0x76   : > { %p3097_p7 = scmp.lt.s32.totalorder %s3095_s25, %s3090_s17 }
  0x77   : > { %p3093_p0 = pnand %p3091_p13, %p3881_p8 }
  0x78   : > { %p3098_p9 = por %p3097_p7, %p3096_p4 }
  0x79   : > { %p3094_p2 = pneg %p3093_p0 }
  0x7b   : > { %p3099_p10 = pnand %p3098_p9, %p3094_p2 }
  0x7d   : > { %3102 = shalt.err (!%p3099_p10)
}
  0x7e   : > { %2813 = dma.hbm_to_vmem [thread:$0]  (!%p3869_p6), %s3896_s10, 256, %s833_s21, [#allocation13], %s3644_s11, %s3644_s11, %s3645_s26  }
  0x7f   : > { %s3647_s2 = smov [#allocation15]   ;;  %s890_s1 = sshll.u32 %s3755_s27, 4  ;;  %s3924_s1 = int_to_ptr.hbm [resolvable:$true] %s890_s1 }
  0x80   : > { %s866_s28 = sshll.u32 %s3647_s2, 4  ;;  %s3118_s13 = sshra.s32 %s3910_s22, 4  ;;  %s867_s28 = int_to_ptr.vmem [resolvable:$true] %s866_s28  ;;  %s3119_s13 = int_to_ptr.hbm [resolvable:$true] %s3118_s13 }
  0x81   : > { %s3120_s17 = scalar_lea.hbm %s3119_s13, 16  ;;  %s3125_s25 = scalar_lea.hbm %s4403_s12, 16 }
  0x82   : > { %p3121_p11 = scmp.ne.s32.totalorder %s3119_s13, %s3120_s17  ;;  %p3126_p0 = scmp.lt.s32.totalorder %s3119_s13, %s4403_s12 }
  0x83   : > { %p3127_p2 = scmp.lt.s32.totalorder %s3125_s25, %s3120_s17 }
  0x84   : > { %p3123_p12 = pnand %p3121_p11, %p3881_p8 }
  0x85   : > { %p3128_p4 = por %p3127_p2, %p3126_p0 }
  0x86   : > { %p3124_p13 = pneg %p3123_p12 }
  0x88   : > { %p3129_p7 = pnand %p3128_p4, %p3124_p13 }
  0x8a   : > { %3132 = shalt.err (!%p3129_p7)
}
  0x8b   : > { %2819 = dma.hbm_to_vmem [thread:$0]  (!%p3869_p6), %s3910_s22, 256, %s867_s28, [#allocation16], %s3644_s11, %s3644_s11, %s3645_s26  }
  0x8c   : > { %s916_s21 = sshll.u32 %s4406_s6, 4  ;;  %s3648_s10 = smov [#allocation18]   ;;  %s3938_s21 = int_to_ptr.hbm [resolvable:$true] %s916_s21 }
  0x8d   : > { %s892_s2 = sshll.u32 %s3648_s10, 4  ;;  %s3148_s13 = sshra.s32 %s3924_s1, 4  ;;  %s893_s2 = int_to_ptr.vmem [resolvable:$true] %s892_s2  ;;  %s3149_s13 = int_to_ptr.hbm [resolvable:$true] %s3148_s13 }
  0x8e   : > { %s3150_s17 = scalar_lea.hbm %s3149_s13, 16  ;;  %s3155_s25 = scalar_lea.hbm %s3755_s27, 16 }
  0x8f   : > { %p3151_p9 = scmp.ne.s32.totalorder %s3149_s13, %s3150_s17  ;;  %p3156_p12 = scmp.lt.s32.totalorder %s3149_s13, %s3755_s27 }
  0x90   : > { %p3157_p13 = scmp.lt.s32.totalorder %s3155_s25, %s3150_s17 }
  0x91   : > { %p3153_p10 = pnand %p3151_p9, %p3881_p8 }
  0x92   : > { %p3158_p0 = por %p3157_p13, %p3156_p12 }
  0x93   : > { %p3154_p11 = pneg %p3153_p10 }
  0x95   : > { %p3159_p2 = pnand %p3158_p0, %p3154_p11 }
  0x97   : > { %3162 = shalt.err (!%p3159_p2)
}
  0x98   : > { %2825 = dma.hbm_to_vmem [thread:$0]  (!%p3869_p6), %s3924_s1, 256, %s893_s2, [#allocation19], %s3644_s11, %s3644_s11, %s3645_s26  }
  0x99   : > { %s3649_s22 = smov [#allocation21]   ;;  %s942_s10 = sshll.u32 %s3775_s24, 4  ;;  %s3952_s10 = int_to_ptr.hbm [resolvable:$true] %s942_s10 }
  0x9a   : > { %s918_s28 = sshll.u32 %s3649_s22, 4  ;;  %s3178_s13 = sshra.s32 %s3938_s21, 4  ;;  %s919_s28 = int_to_ptr.vmem [resolvable:$true] %s918_s28  ;;  %s3179_s13 = int_to_ptr.hbm [resolvable:$true] %s3178_s13 }
  0x9b   : > { %s3180_s17 = scalar_lea.hbm %s3179_s13, 16  ;;  %s3185_s25 = scalar_lea.hbm %s4406_s6, 16 }
  0x9c   : > { %p3181_p4 = scmp.ne.s32.totalorder %s3179_s13, %s3180_s17  ;;  %p3186_p10 = scmp.lt.s32.totalorder %s3179_s13, %s4406_s6 }
  0x9d   : > { %p3187_p11 = scmp.lt.s32.totalorder %s3185_s25, %s3180_s17 }
  0x9e   : > { %p3183_p7 = pnand %p3181_p4, %p3881_p8 }
  0x9f   : > { %p3188_p12 = por %p3187_p11, %p3186_p10 }
  0xa0   : > { %p3184_p9 = pneg %p3183_p7 }
  0xa2   : > { %p3189_p13 = pnand %p3188_p12, %p3184_p9 }
  0xa4   : > { %3192 = shalt.err (!%p3189_p13)
}
  0xa5   : > { %2831 = dma.hbm_to_vmem [thread:$0]  (!%p3869_p6), %s3938_s21, 256, %s919_s28, [#allocation22], %s3644_s11, %s3644_s11, %s3645_s26  }
  0xa6   : > { %s813_s1 = sshll.u32 %s4405_s8, 4  ;;  %s3650_s2 = smov [#allocation24]   ;;  %s3966_s1 = int_to_ptr.hbm [resolvable:$true] %s813_s1 }
  0xa7   : > { %s944_s22 = sshll.u32 %s3650_s2, 4  ;;  %s3208_s13 = sshra.s32 %s3952_s10, 4  ;;  %s945_s22 = int_to_ptr.vmem [resolvable:$true] %s944_s22  ;;  %s3209_s13 = int_to_ptr.hbm [resolvable:$true] %s3208_s13 }
  0xa8   : > { %s3210_s17 = scalar_lea.hbm %s3209_s13, 16  ;;  %s3215_s25 = scalar_lea.hbm %s3775_s24, 16 }
  0xa9   : > { %p3211_p0 = scmp.ne.s32.totalorder %s3209_s13, %s3210_s17  ;;  %p3216_p7 = scmp.lt.s32.totalorder %s3209_s13, %s3775_s24 }
  0xaa   : > { %p3217_p9 = scmp.lt.s32.totalorder %s3215_s25, %s3210_s17 }
  0xab   : > { %p3213_p2 = pnand %p3211_p0, %p3881_p8 }
  0xac   : > { %p3218_p10 = por %p3217_p9, %p3216_p7 }
  0xad   : > { %p3214_p4 = pneg %p3213_p2 }
  0xaf   : > { %p3219_p11 = pnand %p3218_p10, %p3214_p4 }
  0xb1   : > { %3222 = shalt.err (!%p3219_p11)
}
  0xb2   : > { %2837 = dma.hbm_to_vmem [thread:$0]  (!%p3869_p6), %s3952_s10, 256, %s945_s22, [#allocation25], %s3644_s11, %s3644_s11, %s3645_s26  }
  0xb3   : > { %s3651_s21 = smov [#allocation11]   ;;  %s847_s2 = sshll.u32 %s3735_s30, 4  ;;  %s3980_s2 = int_to_ptr.hbm [resolvable:$true] %s847_s2 }
  0xb4   : > { %s815_s28 = sshll.u32 %s3651_s21, 4  ;;  %s3238_s13 = sshra.s32 %s3966_s1, 4  ;;  %s816_s28 = int_to_ptr.vmem [resolvable:$true] %s815_s28  ;;  %s3239_s13 = int_to_ptr.hbm [resolvable:$true] %s3238_s13 }
  0xb5   : > { %s3240_s17 = scalar_lea.hbm %s3239_s13, 16  ;;  %s3245_s25 = scalar_lea.hbm %s4405_s8, 16 }
  0xb6   : > { %p3241_p12 = scmp.ne.s32.totalorder %s3239_s13, %s3240_s17  ;;  %p3246_p2 = scmp.lt.s32.totalorder %s3239_s13, %s4405_s8 }
  0xb7   : > { %p3247_p4 = scmp.lt.s32.totalorder %s3245_s25, %s3240_s17 }
  0xb8   : > { %p3243_p13 = pnand %p3241_p12, %p3881_p8 }
  0xb9   : > { %p3248_p7 = por %p3247_p4, %p3246_p2 }
  0xba   : > { %p3244_p0 = pneg %p3243_p13 }
  0xbc   : > { %p3249_p9 = pnand %p3248_p7, %p3244_p0 }
  0xbe   : > { %3252 = shalt.err (!%p3249_p9)
}
  0xbf   : > { %2810 = dma.hbm_to_vmem [thread:$0]  (!%p3869_p6), %s3966_s1, 256, %s816_s28, [#allocation10], %s3644_s11, %s3644_s11, %s3645_s26  }
  0xc0   : > { %s879_s10 = sshll.u32 %s3750_s20, 4  ;;  %s3652_s22 = smov [#allocation14]   ;;  %s3994_s10 = int_to_ptr.hbm [resolvable:$true] %s879_s10 }
  0xc1   : > { %s849_s21 = sshll.u32 %s3652_s22, 4  ;;  %s3268_s13 = sshra.s32 %s3980_s2, 4  ;;  %s850_s21 = int_to_ptr.vmem [resolvable:$true] %s849_s21  ;;  %s3269_s13 = int_to_ptr.hbm [resolvable:$true] %s3268_s13 }
  0xc2   : > { %s3270_s17 = scalar_lea.hbm %s3269_s13, 16  ;;  %s3275_s25 = scalar_lea.hbm %s3735_s30, 16 }
  0xc3   : > { %p3271_p10 = scmp.ne.s32.totalorder %s3269_s13, %s3270_s17  ;;  %p3276_p13 = scmp.lt.s32.totalorder %s3269_s13, %s3735_s30 }
  0xc4   : > { %p3277_p0 = scmp.lt.s32.totalorder %s3275_s25, %s3270_s17 }
  0xc5   : > { %p3273_p11 = pnand %p3271_p10, %p3881_p8 }
  0xc6   : > { %p3278_p2 = por %p3277_p0, %p3276_p13 }
  0xc7   : > { %p3274_p12 = pneg %p3273_p11 }
  0xc9   : > { %p3279_p4 = pnand %p3278_p2, %p3274_p12 }
  0xcb   : > { %3282 = shalt.err (!%p3279_p4)
}
  0xcc   : > { %2816 = dma.hbm_to_vmem [thread:$0]  (!%p3869_p6), %s3980_s2, 256, %s850_s21, [#allocation13], %s3644_s11, %s3644_s11, %s3645_s26  }
  0xcd   : > { %s3653_s1 = smov [#allocation17]   ;;  %s905_s22 = sshll.u32 %s4407_s4, 4  ;;  %s4008_s22 = int_to_ptr.hbm [resolvable:$true] %s905_s22 }
  0xce   : > { %s881_s28 = sshll.u32 %s3653_s1, 4  ;;  %s3298_s13 = sshra.s32 %s3994_s10, 4  ;;  %s882_s28 = int_to_ptr.vmem [resolvable:$true] %s881_s28  ;;  %s3299_s13 = int_to_ptr.hbm [resolvable:$true] %s3298_s13 }
  0xcf   : > { %s3300_s17 = scalar_lea.hbm %s3299_s13, 1  ;;  %s3305_s25 = scalar_lea.hbm %s3750_s20, 1 }
  0xd0   : > { %p3301_p7 = scmp.ne.s32.totalorder %s3299_s13, %s3300_s17  ;;  %p3306_p11 = scmp.lt.s32.totalorder %s3299_s13, %s3750_s20 }
  0xd1   : > { %p3307_p12 = scmp.lt.s32.totalorder %s3305_s25, %s3300_s17 }
  0xd2   : > { %p3303_p9 = pnand %p3301_p7, %p3881_p8 }
  0xd3   : > { %p3308_p13 = por %p3307_p12, %p3306_p11 }
  0xd4   : > { %p3304_p10 = pneg %p3303_p9 }
  0xd6   : > { %p3309_p0 = pnand %p3308_p13, %p3304_p10 }
  0xd8   : > { %3312 = shalt.err (!%p3309_p0)
}
  0xd9   : > { %2822 = dma.hbm_to_vmem [thread:$0]  (!%p3869_p6), %s3994_s10, 16, %s882_s28, [#allocation16]  }
  0xda   : > { %s931_s26 = sshll.u32 %s4404_s9, 4  ;;  %s3654_s11 = smov [#allocation20]   ;;  %s4019_s26 = int_to_ptr.hbm [resolvable:$true] %s931_s26 }
  0xdb   : > { %s907_s2 = sshll.u32 %s3654_s11, 4  ;;  %s3328_s21 = sshra.s32 %s4008_s22, 4  ;;  %s908_s2 = int_to_ptr.vmem [resolvable:$true] %s907_s2  ;;  %s3329_s21 = int_to_ptr.hbm [resolvable:$true] %s3328_s21 }
  0xdc   : > { %s3330_s1 = scalar_lea.hbm %s3329_s21, 1  ;;  %s3335_s13 = scalar_lea.hbm %s4407_s4, 1 }
  0xdd   : > { %p3331_p2 = scmp.ne.s32.totalorder %s3329_s21, %s3330_s1  ;;  %p3336_p9 = scmp.lt.s32.totalorder %s3329_s21, %s4407_s4 }
  0xde   : > { %p3337_p10 = scmp.lt.s32.totalorder %s3335_s13, %s3330_s1 }
  0xdf   : > { %p3333_p4 = pnand %p3331_p2, %p3881_p8 }
  0xe0   : > { %p3338_p11 = por %p3337_p10, %p3336_p9 }
  0xe1   : > { %p3334_p7 = pneg %p3333_p4 }
  0xe3   : > { %p3339_p12 = pnand %p3338_p11, %p3334_p7 }
  0xe5   : > { %3342 = shalt.err (!%p3339_p12)
}
  0xe6   : > { %2828 = dma.hbm_to_vmem [thread:$0]  (!%p3869_p6), %s4008_s22, 16, %s908_s2, [#allocation19]  }
  0xe7   : > { %s3655_s10 = smov [#allocation23]   ;;  %s957_s17 = sshll.u32 %s4402_s14, 4  ;;  %s4030_s17 = int_to_ptr.hbm [resolvable:$true] %s957_s17 }
  0xe8   : > { %s933_s28 = sshll.u32 %s3655_s10, 4  ;;  %s3358_s25 = sshra.s32 %s4019_s26, 4  ;;  %s934_s28 = int_to_ptr.vmem [resolvable:$true] %s933_s28  ;;  %s3359_s25 = int_to_ptr.hbm [resolvable:$true] %s3358_s25 }
  0xe9   : > { %s3360_s11 = scalar_lea.hbm %s3359_s25, 1  ;;  %s3365_s21 = scalar_lea.hbm %s4404_s9, 1 }
  0xea   : > { %p3361_p13 = scmp.ne.s32.totalorder %s3359_s25, %s3360_s11  ;;  %p3366_p4 = scmp.lt.s32.totalorder %s3359_s25, %s4404_s9 }
  0xeb   : > { %p3367_p7 = scmp.lt.s32.totalorder %s3365_s21, %s3360_s11 }
  0xec   : > { %p3363_p0 = pnand %p3361_p13, %p3881_p8 }
  0xed   : > { %p3368_p9 = por %p3367_p7, %p3366_p4 }
  0xee   : > { %p3364_p2 = pneg %p3363_p0 }
  0xf0   : > { %p3369_p10 = pnand %p3368_p9, %p3364_p2 }
  0xf2   : > { %3372 = shalt.err (!%p3369_p10)
}
  0xf3   : > { %2834 = dma.hbm_to_vmem [thread:$0]  (!%p3869_p6), %s4019_s26, 16, %s934_s28, [#allocation22]  }
  0xf4   : > { %s981_s22 = sshll.u32 %s4408_s3, 4  ;;  %s3656_s2 = smov [#allocation26]   ;;  %s4041_s22 = int_to_ptr.hbm [resolvable:$true] %s981_s22 }
  0xf5   : > { %s959_s1 = sshll.u32 %s3656_s2, 4  ;;  %s3388_s13 = sshra.s32 %s4030_s17, 4  ;;  %s960_s1 = int_to_ptr.vmem [resolvable:$true] %s959_s1  ;;  %s3389_s13 = int_to_ptr.hbm [resolvable:$true] %s3388_s13 }
  0xf6   : > { %s3390_s10 = scalar_lea.hbm %s3389_s13, 1  ;;  %s3395_s25 = scalar_lea.hbm %s4402_s14, 1 }
  0xf7   : > { %p3391_p11 = scmp.ne.s32.totalorder %s3389_s13, %s3390_s10  ;;  %p3396_p0 = scmp.lt.s32.totalorder %s3389_s13, %s4402_s14 }
  0xf8   : > { %p3397_p2 = scmp.lt.s32.totalorder %s3395_s25, %s3390_s10 }
  0xf9   : > { %p3393_p12 = pnand %p3391_p11, %p3881_p8 }
  0xfa   : > { %p3398_p4 = por %p3397_p2, %p3396_p0 }
  0xfb   : > { %p3394_p13 = pneg %p3393_p12 }
  0xfd   : > { %p3399_p7 = pnand %p3398_p4, %p3394_p13 }
  0xff   : > { %3402 = shalt.err (!%p3399_p7)
}
 0x100   : > { %2840 = dma.hbm_to_vmem [thread:$0]  (!%p3869_p6), %s4030_s17, 16, %s960_s1, [#allocation25]  }
 0x101   : > { %s3657_s26 = smov [#allocation27]   ;;  %s3418_s11 = sshra.s32 %s4041_s22, 4  ;;  %s3419_s11 = int_to_ptr.hbm [resolvable:$true] %s3418_s11 }
 0x102   : > { %s983_s28 = sshll.u32 %s3657_s26, 4  ;;  %s3420_s21 = scalar_lea.hbm %s3419_s11, 1  ;;  %s984_s28 = int_to_ptr.vmem [resolvable:$true] %s983_s28 }
 0x103   : > { %p3421_p9 = scmp.ne.s32.totalorder %s3419_s11, %s3420_s21  ;;  %s3425_s2 = scalar_lea.hbm %s4408_s3, 1 }
 0x104   : > { %p3426_p12 = scmp.lt.s32.totalorder %s3419_s11, %s4408_s3  ;;  %p3427_p13 = scmp.lt.s32.totalorder %s3425_s2, %s3420_s21 }
 0x105   : > { %p3423_p10 = pnand %p3421_p9, %p3881_p8 }
 0x106   : > { %p3428_p0 = por %p3427_p13, %p3426_p12 }
 0x107   : > { %p3424_p11 = pneg %p3423_p10 }
 0x109   : > { %p3429_p2 = pnand %p3428_p0, %p3424_p11 }
 0x10b   : > { %3432 = shalt.err (!%p3429_p2)
}
 0x10c   : > { %2843 = dma.hbm_to_vmem [thread:$0]  (!%p3869_p6), %s4041_s22, 16, %s984_s28, [#allocation28]  }
 0x10d   : > { %s2554_s5 = sadd.s32 4294967294, %s3610_s0   ;;  %s4061_s17 = sadd.s32 1, %s3610_s0  }
 0x10e   : > { %s143_s7 = ssub.s32 %s3610_s0, %s4061_s17  ;;  %s146_s1 = sadd.s32 1, %s3606_s18 }
 0x10f   : > { %s4414_s13 = sld [smem:[#allocation43_spill]]  ;;  %p144_p8 = scmp.eq.s32.totalorder %s143_s7, 0 }
 0x110   : > { %p153_p4 = scmp.ne.s32.totalorder %s3606_s18, %s3602_s16  ;;  %p154_p7 = scmp.eq.s32.totalorder %s3610_s0, 0 }
 0x111   : > { %p159_p9 = scmp.ne.s32.totalorder %s3602_s16, %s3598_s15  ;;  %p755_p11 = scmp.eq.s32.totalorder %s3851_s23, 1 }
 0x112   : > { %s4072_s10 = scalar_select %p144_p8, %s3606_s18, %s146_s1  }
 0x113   : > { %p4074_p10 = por %p154_p7, %p153_p4  ;;  %p4080_p6 = por %p160_p1, %p159_p9 }
 0x114   : > { %p761_p12 = scmp.eq.s32.totalorder %s2554_s5, 1  ;;  %p2869_p13 = scmp.lt.s32.totalorder %s3610_s0, 2 }
 0x115   : > { %s4087_s26 = sand.u32 1, %s3606_s18   ;;  %p4089_p0 = por %p755_p11, %p153_p4 }
 0x116   : > { %p4093_p2 = por %p761_p12, %p159_p9  ;;  %s2571_s21 = sshll.u32 %s4087_s26, 3 }
 0x117   : > { %s2572_s2 = sshll.u32 %s3610_s0, 3  ;;  %s1022_s1 = scalar_lea.vmem [#allocation3], %s2571_s21 }
 0x118   : > { %s1026_s7 = scalar_lea.hbm %s4414_s13, %s2572_s2  ;;  %s1030_s5 = sshll.u32 %s1022_s1, 4  ;;  %s1031_s5 = int_to_ptr.vmem [resolvable:$true] %s1030_s5 }
 0x119   : > { %s1028_s3 = sshll.u32 %s1026_s7, 4  ;;  %p4102_p8 = pnand %p2869_p13, %p4074_p10  ;;  %s1029_s3 = int_to_ptr.hbm [resolvable:$true] %s1028_s3 }
 0x11a   : > { %s2573_s6 = sshll.u32 %s4087_s26, 4  ;;  %s1037_s8 = sand.u32 1, %s3610_s0  }
 0x11b   : > { %s1019_s9 = scalar_lea.sflag [#allocation4], %s4087_s26  ;;  %s3448_s12 = sshra.s32 %s1029_s3, 4  ;;  %s3449_s12 = int_to_ptr.hbm [resolvable:$true] %s3448_s12 }
 0x11c   : > { %s3450_s2 = scalar_lea.hbm %s3449_s12, 8  ;;  %p3452_p7 = pneg %p4102_p8 }
 0x11d   : > { %p3451_p4 = scmp.ne.s32.totalorder %s3449_s12, %s3450_s2  ;;  %s3455_s25 = scalar_lea.hbm %s4414_s13, 16 }
 0x11e   : > { %p3456_p10 = scmp.lt.s32.totalorder %s3449_s12, %s4414_s13  ;;  %p3457_p12 = scmp.lt.s32.totalorder %s3455_s25, %s3450_s2 }
 0x11f   : > { %p3453_p9 = pnand %p3452_p7, %p3451_p4 }
 0x120   : > { %p3458_p13 = por %p3457_p12, %p3456_p10 }
 0x121   : > { %p3454_p11 = pneg %p3453_p9 }
 0x123   : > { %p3459_p5 = pnand %p3458_p13, %p3454_p11 }
 0x125   : > { %3462 = shalt.err (!%p3459_p5)
}
 0x126   : > { %s4420_s26 = sld [smem:[#allocation44_spill]]  ;;  %s1041_s21 = scalar_lea.vmem [#allocation6], %s2573_s6 }
 0x127   : > { %2847 = dma.hbm_to_vmem [thread:$0]  (!%p4102_p8), %s1029_s3, 128, %s1031_s5, %s1019_s9  }
 0x128   : > { %s1049_s7 = sshll.u32 %s1041_s21, 4  ;;  %s2715_s1 = sshll.u32 %s3610_s0, 4  ;;  %s1050_s7 = int_to_ptr.vmem [resolvable:$true] %s1049_s7 }
 0x129   : > { %s1038_s12 = scalar_lea.sflag [#allocation7], %s1037_s8 }
 0x12c   : > { %s1046_s14 = scalar_lea.hbm %s4420_s26, %s2715_s1  ;;  %s3485_s13 = scalar_lea.hbm %s4420_s26, 32 }
 0x12d   : > { %s1047_s19 = sshll.u32 %s1046_s14, 4  ;;  %s1048_s19 = int_to_ptr.hbm [resolvable:$true] %s1047_s19 }
 0x12e   : > { %s3478_s2 = sshra.s32 %s1048_s19, 4  ;;  %s3479_s2 = int_to_ptr.hbm [resolvable:$true] %s3478_s2 }
 0x12f   : > { %s3480_s25 = scalar_lea.hbm %s3479_s2, 16  ;;  %p3486_p11 = scmp.lt.s32.totalorder %s3479_s2, %s4420_s26 }
 0x130   : > { %p3481_p5 = scmp.ne.s32.totalorder %s3479_s2, %s3480_s25  ;;  %p3487_p10 = scmp.lt.s32.totalorder %s3485_s13, %s3480_s25 }
 0x132   : > { %p3483_p4 = pnand %p3481_p5, %p3452_p7  ;;  %p3488_p12 = por %p3487_p10, %p3486_p11 }
 0x134   : > { %p3484_p9 = pneg %p3483_p4 }
 0x136   : > { %p3489_p13 = pnand %p3488_p12, %p3484_p9 }
 0x138   : > { %3492 = shalt.err (!%p3489_p13)
}
 0x139   : > { %s3658_s9 = smov 128   ;;  %s3659_s3 = smov 8  }
 0x13a   : > { %2850 = dma.hbm_to_vmem [thread:$0]  (!%p4102_p8), %s1048_s19, 256, %s1050_s7, %s1038_s12, %s3658_s9, %s3658_s9, %s3659_s3  }
 0x13b   : > { %1061 = sbr.rel (%p3856_p3) target bundleno = 3525 (0xdc5), region = 140  ;;  %s4130_s14 = sand.u32 (!%p3856_p3), 1, %s3602_s16  }
 0x13c   : > { %s2577_s6 = sshll.u32 (!%p3856_p3), %s4130_s14, 3  ;;  %s1064_s13 = scalar_lea.sflag (!%p3856_p3), [#allocation4], %s4130_s14 }
 0x13d   : > { %s4136_s5 = scalar_lea.vmem (!%p3856_p3), [#allocation3], %s2577_s6 }
 0x140   : > { %3553 = dma.done.wait (%p4080_p6), %s1064_s13, 128  }
 0x141   : > { %3555 = vsyncadd (%p4080_p6), %s1064_s13, 4294967168  ;;  %s1073_s19 = sand.u32 1, %s3851_s23   ;;  %s2578_s4 = sshll.u32 %s4130_s14, 4 }
 0x142   : > { %s1074_s21 = scalar_lea.sflag [#allocation7], %s1073_s19  ;;  %s4144_s7 = scalar_lea.vmem [#allocation6], %s2578_s4 }
 0x143   : > { %3557 = dma.done.wait (%p4080_p6), %s1074_s21, 256  }
 0x144   : > { %3559 = vsyncadd (%p4080_p6), %s1074_s21, 4294967040 }
 0x145   : > { %3561 = dma.done.wait (%p160_p1), [#allocation7], 256  }
 0x146   : > { %3563 = vsyncadd (%p160_p1), [#allocation7], 4294967040 }
 0x147   : > { %3565 = dma.done.wait (%p160_p1), [#allocation10], 512  }
 0x148   : > { %3567 = vsyncadd (%p160_p1), [#allocation10], 4294966784 }
 0x149   : > { %3569 = dma.done.wait (%p160_p1), [#allocation13], 512  }
 0x14a   : > { %3571 = vsyncadd (%p160_p1), [#allocation13], 4294966784 }
 0x14b   : > { %3573 = dma.done.wait (%p160_p1), [#allocation16], 272  }
 0x14c   : > { %3575 = vsyncadd (%p160_p1), [#allocation16], 4294967024 }
 0x14d   : > { %3577 = dma.done.wait (%p160_p1), [#allocation19], 272  }
 0x14e   : > { %3579 = vsyncadd (%p160_p1), [#allocation19], 4294967024 }
 0x14f   : > { %3581 = dma.done.wait (%p160_p1), [#allocation22], 272  }
 0x150   : > { %3583 = vsyncadd (%p160_p1), [#allocation22], 4294967024 }
 0x151   : > { %3585 = dma.done.wait (%p160_p1), [#allocation25], 272  }
 0x152   : > { %3587 = vsyncadd (%p160_p1), [#allocation25], 4294967024 }
 0x153   : > { %3589 = dma.done.wait (%p160_p1), [#allocation28], 16  }
 0x154   : > { %3591 = vsyncadd (%p160_p1), [#allocation28], 4294967280  ;;  %s4422_s22 = sld [smem:[#allocation41_spill]]  ;;  %p1239_p3 = scmp.lt.s32.totalorder %s3851_s23, 1  ;;  %v2718_v0 = vld [vmem:[#allocation8 + $0x8] sm:$0xff]  ;;  %v2720_v1 = vld [vmem:[#allocation9 + $0x8] sm:$0xff] }
 0x155   : > { %s4423_s25 = sld [smem:[#allocation46_spill]]  ;;  %v4191_v3 = vld [vmem:[%s4136_s5] sm:$0xff]  ;;  %1287 = vmatpush.bf16.msra.mxu0 %v2718_v0  ;;  %1321 = vmatpush.bf16.msra.mxu1 %v2720_v1  ;;  %v2717_v4 = vld [vmem:[#allocation8] sm:$0xff]  ;;  %vm1277_vm0 = vcmask 261120   ;;  %vm1367_vm1 = vcmask 64512   ;;  %s3660_s3 = smov 112  }
 0x156   : > { %s4184_s1 = scalar_select %p1239_p3, %s3851_s23, 1  ;;  %v2719_v5 = vld [vmem:[#allocation9] sm:$0xff]  ;;  %v2722_v23 = vld [vmem:[#allocation11 + $0x8] sm:$0xff]  ;;  %v2721_v36 = vld [vmem:[#allocation11] sm:$0xff]  ;;  %vm1402_vm2 = vcmask 1043456   ;;  %vm1420_vm3 = vcmask 60416  }
 0x157   : > { %s4424_s9 = sld [smem:[#allocation47_spill]]  ;;  %s3661_s8 = smov 120   ;;  %1359 = vmatpush.bf16.msra.mxu2 %v2722_v23  ;;  %vm1492_vm4 = vcmask 126016   ;;  %vm1555_vm5 = vcmask 191616   ;;  %vm1618_vm6 = vcmask 257216   ;;  %vm1842_vm11 = vcmask 130048  }
 0x158   : > { %s2594_s12 = sshll.u32 %s4184_s1, 3  ;;  %s3662_s13 = smov 104   ;;  %vm2207_vm15 = vcmask 523264  }
 0x159   : > { %1288 = vmatpush.bf16.msra.mxu0 %v2717_v4  ;;  %1322 = vmatpush.bf16.msra.mxu1 %v2719_v5  ;;  %s4425_s5 = sld [smem:[#allocation49_spill]]  ;;  %s3663_s19 = smov 8  }
 0x15a   : > { %s1242_s2 = scalar_lea.vmem %s4422_s22, %s2594_s12  ;;  %s3664_s4 = smov 24  }
 0x15b   : > { %v4188_v2 = vld [vmem:[%s1242_s2] sm:$0xff]  ;;  %1360 = vmatpush.bf16.msra.mxu2 %v2721_v36  ;;  %s3665_s21 = smov 16   ;;  %s4426_s22 = sld [smem:[#allocation51_spill]] }
 0x15c   : > { %v1255_v6 = vadd.f32 %v4191_v3, %v4188_v2  ;;  %v2972_v8 = vld [vmem:[%s4423_s25] ss:$0 sm:$0xff]  ;;  %v1329_v37 = vpack.c.bf16 %v4188_v2, %v4188_v2  ;;  %s4427_s12 = sld [smem:[#allocation42_spill]]  ;;  %s2716_s2 = sshll.u32 %s4184_s1, 4 }
 0x15d   : > { %v2973_v9 = vld [vmem:[%s4424_s9] ss:$0 sm:$0xff]  ;;  %s4429_s1 = sld [smem:[#allocation61_spill]] }
 0x15e   : > { %v1256_v7 = vpack.c.bf16 %v1255_v6, %v1255_v6  ;;  %2623 = vmatmul.msk.bf16.vlgmr.msra.gmra.mxu2 %vm1277_vm0, %v1329_v37  ;;  %s4430_s9 = sld [smem:[#allocation52_spill]] }
 0x15f   : > { %v2974_v52 = vld [vmem:[%s4425_s5] ss:$0 sm:$0xff]  ;;  %s4434_s5 = sld [smem:[#allocation64_spill]] }
 0x160   : > { %2605 = vmatmul.msk.bf16.vlgmr.msra.gmra.mxu0 %vm1277_vm0, %v1256_v7  ;;  %2614 = vmatmul.msk.bf16.vlgmr.msra.gmra.mxu1 %vm1277_vm0, %v1256_v7 }
 0x162   : > { %s1247_s25 = scalar_lea.vmem %s4427_s12, %s2716_s2  ;;  %s1238_s12 = scalar_lea.vmem [#allocation29], %s2577_s6 }
 0x163   : > { %s2271_s2 = sshll.u32 %s1238_s12, 4  ;;  %s2272_s2 = int_to_ptr.vmem [resolvable:$true] %s2271_s2 }
 0x1dd   : > { %v1290_v10 = vpop.f32.mrf.mxu0  ;;  %v1324_v11 = vpop.f32.mrf.mxu1 }
 0x1de   : > { %v1291_v12 = vadd.f32 %v2972_v8, %v1290_v10  ;;  %v1325_v13 = vadd.f32 %v2973_v9, %v1324_v11 }
 0x1e0   : > { %v1294_v14 = vpack.c.bf16 %v1291_v12, %v1291_v12  ;;  %v1328_v15 = vpack.c.bf16 %v1325_v13, %v1325_v13 }
 0x1e1   : > { %v1362_v53 = vpop.f32.mrf.mxu2 }
 0x1e2   : > { %v1423_v16 = vunpack.c.l.b16 %v1294_v14  ;;  %v1428_v17 = vunpack.c.l.b16 %v1328_v15  ;;  %v1372_v18 = vsel %vm1367_vm1, %v1328_v15, 0  ;;  %v1363_v54 = vadd.f32 %v2974_v52, %v1362_v53  ;;  %v2975_v53 = vld [vmem:[%s4426_s22] ss:$0 sm:$0xff] }
 0x1e3   : > { %1381 = vmatpush.bf16.xpose.msra.mxu3 %v1372_v18 }
 0x1e4   : > { %v1424_v19 = vpack.c.b16 %v1423_v16, %v1423_v16  ;;  %v1429_v20 = vpack.c.b16 %v1428_v17, %v1428_v17  ;;  %v1366_v55 = vpack.c.bf16 %v1363_v54, %v1363_v54 }
 0x1e5   : > { %v1292_v21 = vpop.f32.mrf.mxu0  ;;  %v1326_v22 = vpop.f32.mrf.mxu1 }
 0x1e6   : > { %1496 = vrot.lane.b32.xlu1 %v1429_v20, %s3660_s3  ;;  %1430 = vrot.lane.b32.xlu0 %v1429_v20, %s3661_s8  ;;  %v1464_v56 = vunpack.c.l.b16 %v1366_v55  ;;  %v1404_v57 = vsel %vm1402_vm2, %v1366_v55, 0 }
 0x1e7   : > { %1494 = vrot.lane.b32.xlu2 %v1424_v19, %s3660_s3  ;;  %1413 = vmatpush.bf16.msrb.mxu0 %v1404_v57 }
 0x1e8   : > { %v1465_v58 = vpack.c.b16 %v1464_v56, %v1464_v56 }
 0x1e9   : > { %v1364_v59 = vpop.f32.mrf.mxu2 }
 0x1ea   : > { %2624 = vmatmul.msk.bf16.vlgmr.msra.gmra.mxu3 %vm1367_vm1, %v1294_v14  ;;  %v3666_v59 = vmov 32.0  }
 0x1ee   : > { %1559 = vrot.lane.b32.xlu1 %v1429_v20, %s3662_s13  ;;  %1425 = vrot.lane.b32.xlu0 %v1424_v19, %s3661_s8 }
 0x1ef   : > { %1557 = vrot.lane.b32.xlu2 %v1424_v19, %s3662_s13 }
 0x241   : > { %v1495_v28 = vpop.permute.xlu2 %1494 }
 0x249   : > { %v1558_v34 = vpop.permute.xlu2 %1557 }
 0x258   : > { %v1497_v24 = vpop.permute.xlu1 %1496  ;;  %v1431_v25 = vpop.permute.xlu0 %1430 }
 0x259   : > { %v1436_v26 = vsel %vm1367_vm1, %v1431_v25, 0  ;;  %v1502_v27 = vsel %vm1367_vm1, %v1497_v24, 0 }
 0x25a   : > { %1445 = vmatpush.bf16.xpose.msrb.mxu1 %v1436_v26  ;;  %1511 = vmatpush.bf16.xpose.msrb.mxu3 %v1502_v27 }
 0x260   : > { %v1560_v29 = vpop.permute.xlu1 %1559  ;;  %v1426_v30 = vpop.permute.xlu0 %1425 }
 0x261   : > { %v1565_v31 = vsel %vm1367_vm1, %v1560_v29, 0  ;;  %2626 = vmatmul.msk.bf16.vlgmr.msrb.gmra.mxu1 %vm1367_vm1, %v1426_v30  ;;  %2628 = vmatmul.msk.bf16.vlgmr.msrb.gmra.mxu3 %vm1367_vm1, %v1495_v28 }
 0x262   : > { %1574 = vmatpush.bf16.xpose.msra.mxu1 %v1565_v31 }
 0x26d   : > { %v1383_v32 = vpop.f32.mrf.mxu3 }
 0x26e   : > { %v1387_v33 = vsel %vm1367_vm1, %v1383_v32, -inf }
 0x26f   : > { %1388 = vmax.xlane.f32.xlu1 %v1387_v33 }
 0x271   : > { %2630 = vmatmul.msk.bf16.vlgmr.msra.gmra.mxu1 %vm1367_vm1, %v1558_v34 }
 0x275   : > { %v1385_v35 = vpop.f32.mrf.mxu3 }
 0x2de   : > { %v1447_v38 = vpop.f32.mrf.mxu1 }
 0x2df   : > { %v1451_v39 = vsel %vm1367_vm1, %v1447_v38, -inf }
 0x2e0   : > { %1452 = vmax.xlane.f32.xlu0 %v1451_v39 }
 0x2e2   : > { %v1389_v40 = vpop.xlane.xlu1 %1388 }
 0x2e3   : > { %v1390_v41 = vsub.f32 %v1383_v32, %v1389_v40 }
 0x2e4   : > { %v1513_v42 = vpop.f32.mrf.mxu3 }
 0x2e5   : > { %v1391_v43 = vmul.f32 1.442695, %v1390_v41  ;;  %v1517_v51 = vsel %vm1367_vm1, %v1513_v42, -inf }
 0x2e6   : > { %v1449_v44 = vpop.f32.mrf.mxu1 }
 0x2e7   : > { %2988 = vpow2.f32 %v1391_v43 }
 0x2ec   : > { %v1515_v45 = vpop.f32.mrf.mxu3 }
 0x2ed   : > { %v2989_v46 = vpop.eup %2988 }
 0x2ee   : > { %v1576_v47 = vpop.f32.mrf.mxu1  ;;  %v1393_v48 = vsel %vm1367_vm1, %v2989_v46, 0.0 }
 0x2ef   : > { %1394 = vadd.xlane.f32.xlu1 %v1393_v48  ;;  %v1580_v49 = vsel %vm1367_vm1, %v1576_v47, -inf  ;;  %v2724_v48 = vld [vmem:[#allocation12 + $0x8] sm:$0xff] }
 0x2f0   : > { %1581 = vmax.xlane.f32.xlu2 %v1580_v49  ;;  %1650 = vmatpush.bf16.msra.mxu3 %v2724_v48  ;;  %v2723_v49 = vld [vmem:[#allocation12] sm:$0xff] }
 0x2f4   : > { %1651 = vmatpush.bf16.msra.mxu3 %v2723_v49  ;;  %v2979_v49 = vld [vmem:[%s4430_s9] ss:$0 sm:$0xff] }
 0x2f6   : > { %v1578_v50 = vpop.f32.mrf.mxu1 }
 0x2f8   : > { %1518 = vmax.xlane.f32.xlu2 %v1517_v51 }
 0x310   : > { %1466 = vrot.lane.b32.xlu2 %v1465_v58, %s3661_s8 }
 0x353   : > { %v1453_v60 = vpop.xlane.xlu0 %1452 }
 0x354   : > { %v1454_v61 = vsub.f32 %v1447_v38, %v1453_v60  ;;  %v4249_v60 = vld [vmem:[%s1247_s25] sm:$0xff] }
 0x356   : > { %v1455_v62 = vmul.f32 1.442695, %v1454_v61  ;;  %v4251_v61 = vld [vmem:[%s1247_s25 + $0x8] sm:$0xff] }
 0x358   : > { %2990 = vpow2.f32 %v1455_v62  ;;  %v2728_v62 = vld [vmem:[#allocation15 + $0x8] sm:$0xff] }
 0x359   : > { %1768 = vmatpush.bf16.msrb.mxu1 %v2728_v62  ;;  %v2730_v62 = vld [vmem:[#allocation18 + $0x8] sm:$0xff] }
 0x35e   : > { %v2991_v63 = vpop.eup %2990 }
 0x35f   : > { %v1457_v0 = vsel %vm1367_vm1, %v2991_v63, 0.0 }
 0x360   : > { %1458 = vadd.xlane.f32.xlu0 %v1457_v0  ;;  %v1254_v0 = vld [vmem:[%s4144_s7 + $0x8] sm:$0xff] }
 0x362   : > { %v1395_v1 = vpop.xlane.xlu1 %1394 }
 0x363   : > { %2992 = vrcp.f32 %v1395_v1  ;;  %v1582_v4 = vpop.xlane.xlu2 %1581 }
 0x364   : > { %v1583_v5 = vsub.f32 %v1576_v47, %v1582_v4  ;;  %v2727_v4 = vld [vmem:[#allocation15] sm:$0xff] }
 0x365   : > { %1769 = vmatpush.bf16.msrb.mxu1 %v2727_v4 }
 0x366   : > { %v1584_v6 = vmul.f32 1.442695, %v1583_v5 }
 0x368   : > { %2994 = vpow2.f32 %v1584_v6 }
 0x369   : > { %v2993_v7 = vpop.eup %2992 }
 0x36a   : > { %v1397_v8 = vmul.f32 %v2993_v7, %v2989_v46 }
 0x36b   : > { %v1519_v9 = vpop.xlane.xlu2 %1518 }
 0x36c   : > { %v1520_v10 = vsub.f32 %v1513_v42, %v1519_v9  ;;  %v1398_v11 = vpack.c.bf16 %v1397_v8, %v1397_v8 }
 0x36e   : > { %v2995_v12 = vpop.eup %2994  ;;  %v1521_v13 = vmul.f32 1.442695, %v1520_v10  ;;  %2625 = vmatmul.msk.bf16.vlgmr.msrb.gmra.mxu0 %vm1367_vm1, %v1398_v11 }
 0x36f   : > { %v1586_v14 = vsel %vm1367_vm1, %v2995_v12, 0.0 }
 0x370   : > { %2996 = vpow2.f32 %v1521_v13  ;;  %1587 = vadd.xlane.f32.xlu0 %v1586_v14 }
 0x373   : > { %v1467_v17 = vpop.permute.xlu2 %1466 }
 0x374   : > { %v1472_v18 = vsel %vm1402_vm2, %v1467_v17, 0  ;;  %v2726_v17 = vld [vmem:[#allocation14 + $0x8] sm:$0xff] }
 0x375   : > { %1481 = vmatpush.bf16.msrb.mxu2 %v1472_v18  ;;  %v2725_v18 = vld [vmem:[#allocation14] sm:$0xff] }
 0x376   : > { %v2997_v15 = vpop.eup %2996 }
 0x377   : > { %v1523_v16 = vsel %vm1367_vm1, %v2997_v15, 0.0 }
 0x378   : > { %1524 = vadd.xlane.f32.xlu1 %v1523_v16 }
 0x384   : > { %1592 = vrot.lane.b32.xlu0 %v1465_v58, %s3662_s13 }
 0x391   : > { %1529 = vrot.lane.b32.xlu1 %v1465_v58, %s3660_s3 }
 0x3d3   : > { %v1459_v19 = vpop.xlane.xlu0 %1458 }
 0x3d4   : > { %2998 = vrcp.f32 %v1459_v19 }
 0x3da   : > { %v2999_v20 = vpop.eup %2998 }
 0x3db   : > { %v1461_v21 = vmul.f32 %v2999_v20, %v2991_v63  ;;  %v1253_v63 = vld [vmem:[%s4144_s7] sm:$0xff]  ;;  %s4428_s7 = sld [smem:[#allocation60_spill]] }
 0x3dc   : > { %v1698_v1 = vadd.f32 %v1253_v63, %v4249_v60  ;;  %v2729_v63 = vld [vmem:[#allocation18] sm:$0xff] }
 0x3dd   : > { %v1462_v22 = vpack.c.bf16 %v1461_v21, %v1461_v21  ;;  %v2978_v21 = vld [vmem:[#allocation17] ss:$0 sm:$0xff] }
 0x3df   : > { %2627 = vmatmul.msk.bf16.vlgmr.msrb.gmra.mxu2 %vm1367_vm1, %v1462_v22 }
 0x3e3   : > { %v1588_v23 = vpop.xlane.xlu0 %1587 }
 0x3e4   : > { %3000 = vrcp.f32 %v1588_v23 }
 0x3ea   : > { %v3001_v26 = vpop.eup %3000 }
 0x3eb   : > { %v1415_v24 = vpop.f32.mrf.mxu0  ;;  %v1590_v28 = vmul.f32 %v3001_v26, %v2995_v12  ;;  %v1525_v29 = vpop.xlane.xlu1 %1524 }
 0x3ec   : > { %v1419_v25 = vpack.c.bf16 %v1415_v24, %v1415_v24  ;;  %3002 = vrcp.f32 %v1525_v29 }
 0x3ed   : > { %v1591_v32 = vpack.c.bf16 %v1590_v28, %v1590_v28  ;;  %3004 = vrcp.f32 %v3666_v59 }
 0x3ee   : > { %1421 = vst.msk [vmem:[#allocation2] sm:$0xf] %vm1420_vm3, %v1419_v25 }
 0x3f2   : > { %v3003_v33 = vpop.eup %3002 }
 0x3f3   : > { %v1417_v27 = vpop.f32.mrf.mxu0  ;;  %v1527_v34 = vmul.f32 %v3003_v33, %v2997_v15  ;;  %v3005_v5 = vpop.eup %3004 }
 0x3f4   : > { %v1662_v7 = vmul.f32 32.0, %v3005_v5  ;;  %vm1666_vm7 = vweird.f32 %v3005_v5 }
 0x3f5   : > { %v1528_v37 = vpack.c.bf16 %v1527_v34, %v1527_v34 }
 0x3f6   : > { %v1593_v30 = vpop.permute.xlu0 %1592  ;;  %v1663_v8 = vsub.f32 1.0, %v1662_v7 }
 0x3f7   : > { %v1598_v31 = vsel %vm1402_vm2, %v1593_v30, 0 }
 0x3f8   : > { %1607 = vmatpush.bf16.msra.mxu2 %v1598_v31  ;;  %v1664_v9 = vmul.f32 %v3005_v5, %v1663_v8 }
 0x3fa   : > { %v1665_v10 = vadd.f32 %v3005_v5, %v1664_v9 }
 0x3fb   : > { %2631 = vmatmul.msk.bf16.vlgmr.msra.gmra.mxu2 %vm1367_vm1, %v1591_v32 }
 0x3fc   : > { %v4258_v11 = vsel %vm1666_vm7, %v3005_v5, %v1665_v10  ;;  %1808 = vmatpush.bf16.msrb.mxu2 %v2730_v62 }
 0x400   : > { %1809 = vmatpush.bf16.msrb.mxu2 %v2729_v63 }
 0x403   : > { %v1530_v35 = vpop.permute.xlu1 %1529 }
 0x404   : > { %v1535_v36 = vsel %vm1402_vm2, %v1530_v35, 0 }
 0x405   : > { %1544 = vmatpush.bf16.msra.mxu0 %v1535_v36 }
 0x408   : > { %2629 = vmatmul.msk.bf16.vlgmr.msra.gmra.mxu0 %vm1367_vm1, %v1528_v37 }
 0x409   : > { %1730 = vmatpush.bf16.msrb.mxu0 %v2726_v17 }
 0x40d   : > { %1731 = vmatpush.bf16.msrb.mxu0 %v2725_v18 }
 0x462   : > { %v1483_v38 = vpop.f32.mrf.mxu2 }
 0x463   : > { %v1487_v39 = vpack.c.bf16 %v1483_v38, %v1483_v38 }
 0x465   : > { %1489 = vrot.lane.b32.xlu2 %v1487_v39, %s3663_s19  ;;  %v2976_v39 = vld [vmem:[%s4428_s7] ss:$0 sm:$0xff] }
 0x46a   : > { %v1485_v40 = vpop.f32.mrf.mxu2 }
 0x47e   : > { %v1609_v41 = vpop.f32.mrf.mxu2 }
 0x47f   : > { %v1613_v42 = vpack.c.bf16 %v1609_v41, %v1609_v41  ;;  %v2977_v41 = vld [vmem:[%s4429_s1] ss:$0 sm:$0xff] }
 0x481   : > { %1615 = vrot.lane.b32.xlu2 %v1613_v42, %s3664_s4 }
 0x485   : > { %v1546_v43 = vpop.f32.mrf.mxu0 }
 0x486   : > { %v1550_v44 = vpack.c.bf16 %v1546_v43, %v1546_v43  ;;  %v1611_v45 = vpop.f32.mrf.mxu2 }
 0x488   : > { %1552 = vrot.lane.b32.xlu0 %v1550_v44, %s3665_s21 }
 0x48d   : > { %v1548_v46 = vpop.f32.mrf.mxu0 }
 0x4bf   : > { %v1490_v47 = vpop.permute.xlu2 %1489 }
 0x4c0   : > { %1493 = vst.msk [vmem:[#allocation2] sm:$0xf] %vm1492_vm4, %v1490_v47 }
 0x4db   : > { %v1616_v51 = vpop.permute.xlu2 %1615 }
 0x4fa   : > { %v1553_v50 = vpop.permute.xlu0 %1552 }
 0x4fb   : > { %1556 = vst.msk [vmem:[#allocation2] sm:$0xf] %vm1555_vm5, %v1553_v50 }
 0x4fc   : > { %1619 = vst.msk [vmem:[#allocation2] sm:$0xf] %vm1618_vm6, %v1616_v51 }
 0x503   : > { %v1620_v52 = vld [vmem:[#allocation2] sm:$0xf] }
 0x504   : > { %2640 = vmatmul.msk.bf16.vlgmr.msra.gmra.mxu3 %vm1277_vm0, %v1620_v52 }
 0x587   : > { %v1653_v54 = vpop.f32.mrf.mxu3 }
 0x588   : > { %v1654_v55 = vadd.f32 %v2975_v53, %v1653_v54 }
 0x58a   : > { %v1657_v56 = vadd.f32 %v1654_v55, %v4188_v2  ;;  %v1699_v2 = vadd.f32 %v1254_v0, %v4251_v61 }
 0x58c   : > { %v1658_v57 = vsel %vm1277_vm0, %v1657_v56, 0.0  ;;  %v1738_v6 = vpack.c.bf16 %v1699_v2, %v1698_v1  ;;  %v1778_v1 = vpack.c.bf16 %v4251_v61, %v4249_v60 }
 0x58d   : > { %1659 = vadd.xlane.f32.xlu1 %v1658_v57 }
 0x58e   : > { %2658 = vmatmul.msk.bf16.vlgmr.msrb.gmra.mxu1 %vm1277_vm0, %v1738_v6  ;;  %2667 = vmatmul.msk.bf16.vlgmr.msrb.gmra.mxu2 %vm1277_vm0, %v1778_v1 }
 0x58f   : > { %v1655_v58 = vpop.f32.mrf.mxu3 }
 0x600   : > { %v1660_v12 = vpop.xlane.xlu1 %1659 }
 0x601   : > { %v1668_v13 = vmul.f32 %v4258_v11, %v1660_v12 }
 0x603   : > { %v1669_v14 = vsub.f32 %v1657_v56, %v1668_v13 }
 0x605   : > { %v1670_v15 = vmul.f32 %v1669_v14, %v1669_v14 }
 0x607   : > { %v1671_v16 = vsel %vm1277_vm0, %v1670_v15, 0.0 }
 0x608   : > { %1672 = vadd.xlane.f32.xlu0 %v1671_v16 }
 0x60b   : > { %v1771_v22 = vpop.f32.mrf.mxu1 }
 0x60c   : > { %v1772_v24 = vadd.f32 %v2978_v21, %v1771_v22 }
 0x60e   : > { %v1776_v25 = vpack.c.bf16 %v1772_v24, %v1772_v24 }
 0x610   : > { %v1820_v30 = vunpack.c.l.b16 %v1776_v25 }
 0x613   : > { %v1773_v26 = vpop.f32.mrf.mxu1 }
 0x614   : > { %v1774_v27 = vadd.f32 %v2978_v21, %v1773_v26  ;;  %v2980_v21 = vld [vmem:[#allocation20] ss:$0 sm:$0xff] }
 0x616   : > { %v1777_v31 = vpack.c.bf16 %v1774_v27, %v1774_v27 }
 0x618   : > { %v1821_v33 = vunpack.c.l.b16 %v1777_v31 }
 0x61a   : > { %v1822_v35 = vpack.c.b16 %v1821_v33, %v1820_v30 }
 0x61c   : > { %1884 = vrot.lane.b32.xlu2 %v1822_v35, %s3661_s8  ;;  %v1827_v37 = vsel %vm1367_vm1, %v1822_v35, 0 }
 0x61d   : > { %1836 = vmatpush.bf16.xpose.msrb.mxu3 %v1827_v37 }
 0x624   : > { %1944 = vrot.lane.b32.xlu2 %v1822_v35, %s3660_s3 }
 0x676   : > { %v1885_v47 = vpop.permute.xlu2 %1884 }
 0x677   : > { %v1890_v48 = vsel %vm1367_vm1, %v1885_v47, 0 }
 0x678   : > { %1899 = vmatpush.bf16.xpose.msra.mxu1 %v1890_v48 }
 0x67b   : > { %v1673_v19 = vpop.xlane.xlu0 %1672 }
 0x67c   : > { %v1674_v20 = vmul.f32 %v1673_v19, %v4258_v11 }
 0x67e   : > { %v1675_v23 = vadd.f32 1e-05, %v1674_v20  ;;  %v1945_v52 = vpop.permute.xlu2 %1944  ;;  %v1811_v20 = vpop.f32.mrf.mxu2 }
 0x67f   : > { %v1950_v53 = vsel %vm1367_vm1, %v1945_v52, 0  ;;  %v1812_v22 = vadd.f32 %v2980_v21, %v1811_v20  ;;  %v2981_v20 = vld [vmem:[#allocation23] ss:$0 sm:$0xff] }
 0x680   : > { %3006 = vrsqrt.f32 %v1675_v23  ;;  %vm1682_vm9 = vweird.f32 %v1675_v23  ;;  %1959 = vmatpush.bf16.xpose.msra.mxu3 %v1950_v53 }
 0x686   : > { %v3007_v28 = vpop.eup %3006  ;;  %v1813_v24 = vpop.f32.mrf.mxu2 }
 0x687   : > { %v1677_v29 = vmul.f32 %v3007_v28, %v1675_v23  ;;  %vm1683_vm8 = vweird.f32 %v3007_v28  ;;  %v1816_v23 = vpack.c.bf16 %v1812_v22, %v1812_v22  ;;  %v1814_v25 = vadd.f32 %v2980_v21, %v1813_v24 }
 0x688   : > { %vm1684_vm10 = vmor %vm1682_vm9, %vm1683_vm8 }
 0x689   : > { %v1678_v32 = vmul.f32 %v3007_v28, %v1677_v29  ;;  %v1857_v26 = vunpack.c.l.b16 %v1816_v23  ;;  %v1817_v27 = vpack.c.bf16 %v1814_v25, %v1814_v25 }
 0x68b   : > { %v1679_v34 = vmul.f32 0.5, %v1678_v32 }
 0x68d   : > { %v1680_v36 = vsub.f32 1.5, %v1679_v34 }
 0x68f   : > { %v1681_v38 = vmul.f32 %v3007_v28, %v1680_v36 }
 0x691   : > { %v1685_v40 = vsel %vm1684_vm10, %v3007_v28, %v1681_v38  ;;  %v1858_v28 = vunpack.c.l.b16 %v1817_v27 }
 0x692   : > { %v1686_v42 = vmul.f32 %v1685_v40, %v1669_v14 }
 0x693   : > { %v1859_v29 = vpack.c.b16 %v1858_v28, %v1857_v26 }
 0x694   : > { %v1691_v43 = vmul.f32 %v2976_v39, %v1686_v42 }
 0x695   : > { %1871 = vmatpush.bf16.msra.mxu0 %v1859_v29 }
 0x696   : > { %v4268_v44 = vadd.f32 %v2977_v41, %v1691_v43 }
 0x698   : > { %v1697_v45 = vadd.f32 %v4268_v44, %v4191_v3 }
 0x69a   : > { %v1700_v46 = vpack.c.bf16 %v1697_v45, %v1697_v45 }
 0x69c   : > { %2649 = vmatmul.msk.bf16.vlgmr.msrb.gmra.mxu0 %vm1277_vm0, %v1700_v46 }
 0x719   : > { %v1733_v50 = vpop.f32.mrf.mxu0 }
 0x71a   : > { %v1734_v51 = vadd.f32 %v2979_v49, %v1733_v50 }
 0x71c   : > { %v1737_v54 = vpack.c.bf16 %v1734_v51, %v1734_v51 }
 0x71e   : > { %v1880_v55 = vunpack.c.l.b16 %v1737_v54  ;;  %2668 = vmatmul.msk.bf16.vlgmr.msrb.gmra.mxu3 %vm1367_vm1, %v1737_v54 }
 0x720   : > { %v1881_v56 = vpack.c.b16 %v1880_v55, %v1880_v55 }
 0x721   : > { %v1735_v3 = vpop.f32.mrf.mxu0 }
 0x722   : > { %2002 = vrot.lane.b32.xlu1 %v1881_v56, %s3662_s13  ;;  %1882 = vrot.lane.b32.xlu2 %v1881_v56, %s3661_s8 }
 0x72a   : > { %2004 = vrot.lane.b32.xlu2 %v1822_v35, %s3662_s13 }
 0x732   : > { %1942 = vrot.lane.b32.xlu2 %v1881_v56, %s3660_s3 }
 0x77c   : > { %v1883_v57 = vpop.permute.xlu2 %1882 }
 0x77d   : > { %2670 = vmatmul.msk.bf16.vlgmr.msra.gmra.mxu1 %vm1367_vm1, %v1883_v57 }
 0x784   : > { %v2005_v58 = vpop.permute.xlu2 %2004 }
 0x785   : > { %v2010_v59 = vsel %vm1367_vm1, %v2005_v58, 0 }
 0x786   : > { %2019 = vmatpush.bf16.xpose.msrb.mxu1 %v2010_v59 }
 0x78c   : > { %v1943_v0 = vpop.permute.xlu2 %1942 }
 0x78d   : > { %2672 = vmatmul.msk.bf16.vlgmr.msra.gmra.mxu3 %vm1367_vm1, %v1943_v0 }
 0x794   : > { %v2003_v4 = vpop.permute.xlu1 %2002 }
 0x795   : > { %2674 = vmatmul.msk.bf16.vlgmr.msrb.gmra.mxu1 %vm1367_vm1, %v2003_v4 }
 0x7a1   : > { %v1838_v2 = vpop.f32.mrf.mxu3 }
 0x7a2   : > { %v1843_v5 = vsel %vm1842_vm11, %v1838_v2, -inf }
 0x7a3   : > { %1844 = vmax.xlane.f32.xlu2 %v1843_v5 }
 0x7a9   : > { %v1840_v6 = vpop.f32.mrf.mxu3 }
 0x7fa   : > { %v1901_v7 = vpop.f32.mrf.mxu1 }
 0x7fb   : > { %v1905_v8 = vsel %vm1842_vm11, %v1901_v7, -inf }
 0x7fc   : > { %1906 = vmax.xlane.f32.xlu0 %v1905_v8 }
 0x802   : > { %v1903_v9 = vpop.f32.mrf.mxu1 }
 0x810   : > { %v1961_v10 = vpop.f32.mrf.mxu3 }
 0x811   : > { %v1965_v60 = vsel %vm1842_vm11, %v1961_v10, -inf }
 0x812   : > { %v2021_v61 = vpop.f32.mrf.mxu1  ;;  %1966 = vmax.xlane.f32.xlu0 %v1965_v60 }
 0x813   : > { %v2025_v16 = vsel %vm1842_vm11, %v2021_v61, -inf }
 0x816   : > { %v1845_v12 = vpop.xlane.xlu2 %1844 }
 0x817   : > { %v1846_v13 = vsub.f32 %v1838_v2, %v1845_v12 }
 0x818   : > { %v1963_v14 = vpop.f32.mrf.mxu3 }
 0x819   : > { %v1847_v15 = vmul.f32 1.442695, %v1846_v13  ;;  %v2732_v14 = vld [vmem:[#allocation21 + $0x8] sm:$0xff] }
 0x81a   : > { %v2023_v17 = vpop.f32.mrf.mxu1  ;;  %2026 = vmax.xlane.f32.xlu0 %v2025_v16  ;;  %2092 = vmatpush.bf16.msrb.mxu3 %v2732_v14  ;;  %v2731_v16 = vld [vmem:[#allocation21] sm:$0xff] }
 0x81b   : > { %3008 = vpow2.f32 %v1847_v15 }
 0x81e   : > { %2093 = vmatpush.bf16.msrb.mxu3 %v2731_v16  ;;  %v2986_v16 = vld [vmem:[%s4434_s5] ss:$0 sm:$0xff] }
 0x821   : > { %v3009_v18 = vpop.eup %3008 }
 0x822   : > { %v1849_v19 = vsel %vm1842_vm11, %v3009_v18, 0.0 }
 0x823   : > { %1850 = vadd.xlane.f32.xlu0 %v1849_v19 }
 0x837   : > { %1917 = vrot.lane.b32.xlu0 %v1859_v29, %s3661_s8  ;;  %s4432_s8 = sld [smem:[#allocation63_spill]] }
 0x83f   : > { %2037 = vrot.lane.b32.xlu0 %v1859_v29, %s3662_s13  ;;  %s4433_s13 = sld [smem:[#allocation59_spill]] }
 0x86f   : > { %v1907_v30 = vpop.xlane.xlu0 %1906 }
 0x870   : > { %v1908_v31 = vsub.f32 %v1901_v7, %v1907_v30 }
 0x872   : > { %v1909_v32 = vmul.f32 1.442695, %v1908_v31  ;;  %v2734_v31 = vld [vmem:[#allocation24 + $0x8] sm:$0xff] }
 0x874   : > { %3010 = vpow2.f32 %v1909_v32  ;;  %v2733_v32 = vld [vmem:[#allocation24] sm:$0xff] }
 0x87a   : > { %v3011_v33 = vpop.eup %3010 }
 0x87b   : > { %v1911_v34 = vsel %vm1842_vm11, %v3011_v33, 0.0 }
 0x87c   : > { %1912 = vadd.xlane.f32.xlu1 %v1911_v34 }
 0x885   : > { %v1967_v35 = vpop.xlane.xlu0 %1966 }
 0x886   : > { %v1968_v36 = vsub.f32 %v1961_v10, %v1967_v35 }
 0x888   : > { %v1969_v37 = vmul.f32 1.442695, %v1968_v36 }
 0x88a   : > { %3012 = vpow2.f32 %v1969_v37 }
 0x88d   : > { %v2027_v38 = vpop.xlane.xlu0 %2026 }
 0x88e   : > { %v2028_v39 = vsub.f32 %v2021_v61, %v2027_v38 }
 0x890   : > { %v3013_v40 = vpop.eup %3012  ;;  %v2029_v41 = vmul.f32 1.442695, %v2028_v39 }
 0x891   : > { %v1971_v42 = vsel %vm1842_vm11, %v3013_v40, 0.0 }
 0x892   : > { %3014 = vpow2.f32 %v2029_v41  ;;  %1972 = vadd.xlane.f32.xlu2 %v1971_v42 }
 0x896   : > { %v1851_v43 = vpop.xlane.xlu0 %1850 }
 0x897   : > { %3016 = vrcp.f32 %v1851_v43  ;;  %v2982_v43 = vld [vmem:[#allocation27] ss:$0 sm:$0xff] }
 0x898   : > { %v3015_v45 = vpop.eup %3014 }
 0x899   : > { %v2031_v46 = vsel %vm1842_vm11, %v3015_v45, 0.0 }
 0x89a   : > { %2032 = vadd.xlane.f32.xlu2 %v2031_v46  ;;  %v2983_v46 = vld [vmem:[%s4432_s8] ss:$0 sm:$0xff] }
 0x89d   : > { %v3017_v47 = vpop.eup %3016 }
 0x89e   : > { %v1853_v48 = vmul.f32 %v3017_v47, %v3009_v18 }
 0x8a0   : > { %v1854_v49 = vpack.c.bf16 %v1853_v48, %v1853_v48 }
 0x8a2   : > { %2669 = vmatmul.msk.bf16.vlgmr.msra.gmra.mxu0 %vm1842_vm11, %v1854_v49 }
 0x8a9   : > { %v1918_v50 = vpop.permute.xlu0 %1917 }
 0x8aa   : > { %1930 = vmatpush.bf16.msra.mxu2 %v1918_v50 }
 0x8b1   : > { %v2038_v51 = vpop.permute.xlu0 %2037 }
 0x8b2   : > { %1977 = vrot.lane.b32.xlu2 %v1859_v29, %s3660_s3  ;;  %2050 = vmatpush.bf16.msrb.mxu2 %v2038_v51  ;;  %s4431_s3 = sld [smem:[#allocation58_spill]] }
 0x8b8   : > { %v2737_v35 = vld [vmem:[%s4431_s3 + $0x10] sm:$0xff]  ;;  %v2736_v51 = vld [vmem:[%s4431_s3 + $0x8] sm:$0xff] }
 0x8ef   : > { %v1913_v52 = vpop.xlane.xlu1 %1912 }
 0x8f0   : > { %3018 = vrcp.f32 %v1913_v52  ;;  %v2735_v52 = vld [vmem:[%s4431_s3] sm:$0xff] }
 0x8f6   : > { %v3019_v53 = vpop.eup %3018 }
 0x8f7   : > { %v1915_v54 = vmul.f32 %v3019_v53, %v3011_v33  ;;  %v2738_v33 = vld [vmem:[%s4431_s3 + $0x18] sm:$0xff]  ;;  %v2984_v53 = vld [vmem:[#allocation26] ss:$0 sm:$0xff] }
 0x8f8   : > { %2215 = vmatpush.bf16.msra.mxu1 %v2738_v33 }
 0x8f9   : > { %v1916_v55 = vpack.c.bf16 %v1915_v54, %v1915_v54 }
 0x8fb   : > { %2671 = vmatmul.msk.bf16.vlgmr.msra.gmra.mxu2 %vm1842_vm11, %v1916_v55 }
 0x8fc   : > { %2216 = vmatpush.bf16.msra.mxu1 %v2737_v35 }
 0x900   : > { %2217 = vmatpush.bf16.msra.mxu1 %v2736_v51 }
 0x904   : > { %2218 = vmatpush.bf16.msra.mxu1 %v2735_v52 }
 0x905   : > { %v1973_v56 = vpop.xlane.xlu2 %1972 }
 0x906   : > { %3020 = vrcp.f32 %v1973_v56 }
 0x90c   : > { %v3021_v57 = vpop.eup %3020 }
 0x90d   : > { %v2033_v3 = vpop.xlane.xlu2 %2032  ;;  %v1975_v58 = vmul.f32 %v3021_v57, %v3013_v40 }
 0x90e   : > { %3022 = vrcp.f32 %v2033_v3 }
 0x90f   : > { %v1976_v0 = vpack.c.bf16 %v1975_v58, %v1975_v58  ;;  %v2985_v58 = vld [vmem:[%s4433_s13] ss:$0 sm:$0xff] }
 0x914   : > { %v3023_v59 = vpop.eup %3022 }
 0x915   : > { %v2035_v62 = vmul.f32 %v3023_v59, %v3015_v45  ;;  %v1978_v63 = vpop.permute.xlu2 %1977 }
 0x916   : > { %1990 = vmatpush.bf16.msrb.mxu0 %v1978_v63 }
 0x917   : > { %v2036_v1 = vpack.c.bf16 %v2035_v62, %v2035_v62 }
 0x919   : > { %2673 = vmatmul.msk.bf16.vlgmr.msrb.gmra.mxu0 %vm1842_vm11, %v1976_v0  ;;  %2675 = vmatmul.msk.bf16.vlgmr.msrb.gmra.mxu2 %vm1842_vm11, %v2036_v1 }
 0x91a   : > { %2162 = vmatpush.bf16.msra.mxu0 %v2734_v31 }
 0x91e   : > { %2163 = vmatpush.bf16.msra.mxu0 %v2733_v32 }
 0x91f   : > { %v1873_v4 = vpop.f32.mrf.mxu0 }
 0x920   : > { %v1877_v2 = vpack.c.bf16 %v1873_v4, %v1873_v4 }
 0x922   : > { %1878 = vst.msk [vmem:[#allocation2] sm:$0xf] %vm1420_vm3, %v1877_v2 }
 0x927   : > { %v1875_v5 = vpop.f32.mrf.mxu0 }
 0x97e   : > { %v1932_v6 = vpop.f32.mrf.mxu2 }
 0x97f   : > { %v1936_v7 = vpack.c.bf16 %v1932_v6, %v1932_v6 }
 0x981   : > { %1938 = vrot.lane.b32.xlu0 %v1936_v7, %s3663_s19  ;;  %s4435_s19 = sld [smem:[#allocation66_spill]] }
 0x986   : > { %v1934_v8 = vpop.f32.mrf.mxu2 }
 0x987   : > { %s3528_s9 = scalar_lea.hbm %s4435_s19, 16 }
 0x996   : > { %v1992_v9 = vpop.f32.mrf.mxu0 }
 0x997   : > { %v1996_v10 = vpack.c.bf16 %v1992_v9, %v1992_v9 }
 0x999   : > { %1998 = vrot.lane.b32.xlu1 %v1996_v10, %s3665_s21  ;;  %s2712_s21 = sshll.u32 %s3851_s23, 3  ;;  %s2259_s23 = scalar_lea.sflag [#allocation5], %s4130_s14 }
 0x99a   : > { %s2269_s22 = scalar_lea.hbm %s4435_s19, %s2712_s21 }
 0x99b   : > { %s2273_s25 = sshll.u32 %s2269_s22, 4  ;;  %s2274_s25 = int_to_ptr.hbm [resolvable:$true] %s2273_s25 }
 0x99c   : > { %v2052_v60 = vpop.f32.mrf.mxu2  ;;  %s3522_s7 = sshra.s32 %s2274_s25, 4  ;;  %s3523_s7 = int_to_ptr.hbm [resolvable:$true] %s3522_s7 }
 0x99d   : > { %v2056_v61 = vpack.c.bf16 %v2052_v60, %v2052_v60  ;;  %s3524_s1 = scalar_lea.hbm %s3523_s7, 8  ;;  %p3529_p7 = scmp.lt.s32.totalorder %s3523_s7, %s4435_s19 }
 0x99e   : > { %v1994_v12 = vpop.f32.mrf.mxu0  ;;  %p3525_p1 = scmp.ne.s32.totalorder %s3523_s7, %s3524_s1  ;;  %p3530_p5 = scmp.lt.s32.totalorder %s3528_s9, %s3524_s1 }
 0x99f   : > { %2058 = vrot.lane.b32.xlu0 %v2056_v61, %s3664_s4  ;;  %s4436_s4 = sld [smem:[#allocation65_spill]] }
 0x9a0   : > { %p3526_p6 = pnand %p3525_p1, %p4089_p0  ;;  %p3531_p4 = por %p3530_p5, %p3529_p7 }
 0x9a2   : > { %p3527_p8 = pneg %p3526_p6 }
 0x9a4   : > { %v2054_v13 = vpop.f32.mrf.mxu2  ;;  %p3532_p9 = pnand %p3531_p4, %p3527_p8 }
 0x9f3   : > { %v1939_v15 = vpop.permute.xlu0 %1938 }
 0x9f4   : > { %1941 = vst.msk [vmem:[#allocation2] sm:$0xf] %vm1492_vm4, %v1939_v15 }
 0xa0b   : > { %v1999_v17 = vpop.permute.xlu1 %1998 }
 0xa0c   : > { %2001 = vst.msk [vmem:[#allocation2] sm:$0xf] %vm1555_vm5, %v1999_v17 }
 0xa11   : > { %v2059_v18 = vpop.permute.xlu0 %2058 }
 0xa12   : > { %2061 = vst.msk [vmem:[#allocation2] sm:$0xf] %vm1618_vm6, %v2059_v18  ;;  %v2987_v18 = vld [vmem:[%s4436_s4] ss:$0 sm:$0xff] }
 0xa19   : > { %v2062_v19 = vld [vmem:[#allocation2] sm:$0xf] }
 0xa1a   : > { %2684 = vmatmul.msk.bf16.vlgmr.msrb.gmra.mxu3 %vm1277_vm0, %v2062_v19 }
 0xa9d   : > { %v2095_v21 = vpop.f32.mrf.mxu3 }
 0xa9e   : > { %v2096_v22 = vadd.f32 %v2981_v20, %v2095_v21 }
 0xaa0   : > { %v2099_v23 = vadd.f32 %v2096_v22, %v4268_v44 }
 0xaa2   : > { %v2100_v24 = vsel %vm1277_vm0, %v2099_v23, 0.0 }
 0xaa3   : > { %2101 = vadd.xlane.f32.xlu0 %v2100_v24 }
 0xaa5   : > { %v2097_v25 = vpop.f32.mrf.mxu3 }
 0xb16   : > { %v2102_v26 = vpop.xlane.xlu0 %2101 }
 0xb17   : > { %v2103_v27 = vmul.f32 %v2102_v26, %v4258_v11 }
 0xb19   : > { %v2104_v28 = vsub.f32 %v2099_v23, %v2103_v27 }
 0xb1b   : > { %v2105_v29 = vmul.f32 %v2104_v28, %v2104_v28 }
 0xb1d   : > { %v2106_v30 = vsel %vm1277_vm0, %v2105_v29, 0.0 }
 0xb1e   : > { %2107 = vadd.xlane.f32.xlu2 %v2106_v30 }
 0xb91   : > { %v2108_v34 = vpop.xlane.xlu2 %2107 }
 0xb92   : > { %v2109_v44 = vmul.f32 %v2108_v34, %v4258_v11 }
 0xb94   : > { %v2110_v36 = vadd.f32 1e-05, %v2109_v44 }
 0xb96   : > { %3024 = vrsqrt.f32 %v2110_v36  ;;  %vm2117_vm13 = vweird.f32 %v2110_v36 }
 0xb9c   : > { %v3025_v37 = vpop.eup %3024 }
 0xb9d   : > { %v2112_v38 = vmul.f32 %v3025_v37, %v2110_v36  ;;  %vm2118_vm12 = vweird.f32 %v3025_v37 }
 0xb9e   : > { %vm2119_vm14 = vmor %vm2117_vm13, %vm2118_vm12 }
 0xb9f   : > { %v2113_v39 = vmul.f32 %v3025_v37, %v2112_v38 }
 0xba1   : > { %v2114_v40 = vmul.f32 0.5, %v2113_v39 }
 0xba3   : > { %v2115_v41 = vsub.f32 1.5, %v2114_v40 }
 0xba5   : > { %v2116_v42 = vmul.f32 %v3025_v37, %v2115_v41 }
 0xba7   : > { %v2120_v45 = vsel %vm2119_vm14, %v3025_v37, %v2116_v42 }
 0xba8   : > { %v2121_v47 = vmul.f32 %v2120_v45, %v2104_v28 }
 0xbaa   : > { %v2126_v48 = vmul.f32 %v2982_v43, %v2121_v47 }
 0xbac   : > { %v2131_v49 = vadd.f32 %v2983_v46, %v2126_v48 }
 0xbae   : > { %v2132_v50 = vpack.c.bf16 %v2131_v49, %v2131_v49 }
 0xbb0   : > { %2693 = vmatmul.msk.bf16.vlgmr.msra.gmra.mxu0 %vm1277_vm0, %v2132_v50 }
 0xc2d   : > { %v2165_v54 = vpop.f32.mrf.mxu0 }
 0xc2e   : > { %v2166_v55 = vadd.f32 %v2984_v53, %v2165_v54 }
 0xc30   : > { %v2169_v56 = vmax.f32 %v2166_v55, 0.0 }
 0xc32   : > { %v2170_v3 = vpack.c.bf16 %v2169_v56, %v2169_v56 }
 0xc34   : > { %2710 = vmatmul.msk.bf16.vlgmr.msra.gmra.mxu1 %vm2207_vm15, %v2170_v3 }
 0xc35   : > { %v2167_v57 = vpop.f32.mrf.mxu0 }
 0xcb1   : > { %v2220_v59 = vpop.f32.mrf.mxu1 }
 0xcb2   : > { %v2221_v62 = vadd.f32 %v2985_v58, %v2220_v59 }
 0xcb4   : > { %v2224_v63 = vadd.f32 %v2221_v62, %v2131_v49 }
 0xcb6   : > { %v2225_v0 = vsel %vm1277_vm0, %v2224_v63, 0.0 }
 0xcb7   : > { %2226 = vadd.xlane.f32.xlu1 %v2225_v0 }
 0xcb9   : > { %v2222_v1 = vpop.f32.mrf.mxu1 }
 0xd2a   : > { %v2227_v4 = vpop.xlane.xlu1 %2226 }
 0xd2b   : > { %v2228_v2 = vmul.f32 %v2227_v4, %v4258_v11 }
 0xd2d   : > { %v2229_v5 = vsub.f32 %v2224_v63, %v2228_v2 }
 0xd2f   : > { %v2230_v6 = vmul.f32 %v2229_v5, %v2229_v5 }
 0xd31   : > { %v2231_v7 = vsel %vm1277_vm0, %v2230_v6, 0.0 }
 0xd32   : > { %2232 = vadd.xlane.f32.xlu0 %v2231_v7 }
 0xda5   : > { %v2233_v8 = vpop.xlane.xlu0 %2232 }
 0xda6   : > { %v2234_v9 = vmul.f32 %v2233_v8, %v4258_v11 }
 0xda8   : > { %v2235_v10 = vadd.f32 1e-05, %v2234_v9 }
 0xdaa   : > { %3026 = vrsqrt.f32 %v2235_v10  ;;  %vm2242_vm2 = vweird.f32 %v2235_v10 }
 0xdb0   : > { %v3027_v60 = vpop.eup %3026 }
 0xdb1   : > { %v2237_v61 = vmul.f32 %v3027_v60, %v2235_v10  ;;  %vm2243_vm1 = vweird.f32 %v3027_v60 }
 0xdb2   : > { %vm2244_vm3 = vmor %vm2242_vm2, %vm2243_vm1 }
 0xdb3   : > { %v2238_v12 = vmul.f32 %v3027_v60, %v2237_v61 }
 0xdb5   : > { %v2239_v13 = vmul.f32 0.5, %v2238_v12 }
 0xdb7   : > { %v2240_v14 = vsub.f32 1.5, %v2239_v13 }
 0xdb9   : > { %v2241_v15 = vmul.f32 %v3027_v60, %v2240_v14 }
 0xdbb   : > { %v2245_v17 = vsel %vm2244_vm3, %v3027_v60, %v2241_v15 }
 0xdbc   : > { %v2246_v11 = vmul.f32 %v2245_v17, %v2229_v5 }
 0xdbe   : > { %v2251_v19 = vmul.f32 %v2986_v16, %v2246_v11 }
 0xdc0   : > { %v2256_v20 = vadd.f32 %v2987_v18, %v2251_v19 }
 0xdc2   : > { %2257 = vst.msk [vmem:[%s1238_s12] sm:$0xff] %vm1277_vm0, %v2256_v20 }
 0xdc3   : > { %3535 = shalt.err (!%p3532_p9)
}
 0xdc4   : > { %2799 = dma.vmem_to_hbm [thread:$0]  (%p4089_p0), %s2272_s2, 128, %s2274_s25, %s2259_s23  }
 0xdc5 PF: > { %s2285_s14 = sand.u32 1, %s3598_s15   ;;  %p4437_p11 = scmp.ge.s32.totalorder %s3610_s0, 2 }
 0xdc6   : > { %s2286_s6 = scalar_lea.sflag [#allocation5], %s2285_s14 }
 0xdc7   : > { %p2852_p10 = pnand %p4437_p11, %p4093_p2 }
 0xdc9   : > { %p2853_p12 = pneg %p2852_p10 }
 0xdcb   : > { %3593 = dma.done.wait (%p2853_p12), %s2286_s6, 128  }
 0xdcc   : > { %3595 = vsyncadd (%p2853_p12), %s2286_s6, 4294967168  ;;  %p84_p13 = scmp.ge.s32.totalorder %s4061_s17, 4   ;;  %s4438_s15 = smov %s3602_s16 }
 0xdcd   : > { %s4439_s16 = smov %s3606_s18  ;;  %s4440_s18 = smov %s4072_s10 }
 0xdce   : > { %s4441_s0 = smov %s4061_s17  ;;  %86 = sbr.rel (!%p84_p13) target bundleno = 74 (0x4a), region = 290 }
 0xdd3   :  { %2292 = vsyncpa [#allocation4], 1 }
 0xdd4   :  { %2294 = vsyncpa [#allocation4 + $0x1], 1 }
 0xdd5   :  { %2295 = vsyncpa [#allocation7], 1 }
 0xdd6   :  { %2297 = vsyncpa [#allocation7 + $0x1], 1 }
 0xdd7   :  { %2298 = vsyncpa [#allocation10], 1 }
 0xdd8   :  { %2299 = vsyncpa [#allocation13], 1 }
 0xdd9   :  { %2300 = vsyncpa [#allocation16], 1 }
 0xdda   :  { %2301 = vsyncpa [#allocation19], 1 }
 0xddb   :  { %2302 = vsyncpa [#allocation22], 1 }
 0xddc   :  { %2303 = vsyncpa [#allocation25], 1 }
 0xddd   :  { %2304 = vsyncpa [#allocation28], 1 }
 0xdde   :  { %2305 = vsyncpa [#allocation5], 1 }
 0xddf   :  { %2307 = vsyncpa [#allocation5 + $0x1], 1 }

// kernel: tpu_custom_call.1
= control target key start
LH: loop header
LB: loop body
LE: loop exit
PB: predicated region body
PF: predicated region fallthrough
CT: control target
= control target key end

     0   :  { %s3612_s6 = smov 1   ;;  %s3613_s10 = smov 2   ;;  %s4359_s0 = inlined_call_operand.smem [shape: u32[31], index: -1, kind: input, shape index: {}] }
   0x1   :  { %s3675_s5 = sld [smem:[%s4359_s0]]   ;;  %s3614_s14 = smov 3  }
   0x2   :  { %s3680_s9 = sld [smem:[%s4359_s0 + %s3612_s6]]   ;;  %s3615_s18 = smov 4  }
   0x3   :  { %s3685_s13 = sld [smem:[%s4359_s0 + %s3613_s10]]   ;;  %s3616_s22 = smov 5  }
   0x4   :  { %s3690_s17 = sld [smem:[%s4359_s0 + %s3614_s14]]   ;;  %s3617_s26 = smov 6  }
   0x5   :  { %s3695_s21 = sld [smem:[%s4359_s0 + %s3615_s18]]   ;;  %s3618_s30 = smov 7  }
   0x6   :  { %s3700_s25 = sld [smem:[%s4359_s0 + %s3616_s22]]   ;;  %s3619_s4 = smov 8  }
   0x7   :  { %4375 = sst [smem:[#allocation41_spill]] %s3675_s5  ;;  %s3620_s10 = smov 9  }
   0x8   :  { %4376 = sst [smem:[#allocation42_spill]] %s3680_s9  ;;  %s3621_s15 = smov 10  }
   0x9   :  { %4377 = sst [smem:[#allocation43_spill]] %s3685_s13  ;;  %s3622_s20 = smov 11  }
   0xa   :  { %4378 = sst [smem:[#allocation44_spill]] %s3690_s17  ;;  %s3624_s1 = smov 13  }
   0xb   :  { %4379 = sst [smem:[#allocation45_spill]] %s3695_s21  ;;  %s3625_s7 = smov 14  }
   0xc   :  { %4380 = sst [smem:[#allocation46_spill]] %s3700_s25  ;;  %s3627_s22 = smov 16  }
   0xd   :  { %s3705_s29 = sld [smem:[%s4359_s0 + %s3617_s26]]   ;;  %s3623_s26 = smov 12  }
   0xe   :  { %s3710_s3 = sld [smem:[%s4359_s0 + %s3618_s30]]   ;;  %s3628_s28 = smov 17  }
   0xf   :  { %s3715_s8 = sld [smem:[%s4359_s0 + %s3619_s4]]  }
  0x10   :  { %s3720_s14 = sld [smem:[%s4359_s0 + %s3620_s10]]  }
  0x11   :  { %s3725_s19 = sld [smem:[%s4359_s0 + %s3621_s15]]   ;;  %s3626_s15 = smov 15  }
  0x12   :  { %s3730_s24 = sld [smem:[%s4359_s0 + %s3622_s20]]  }
  0x13   :  { %s3735_s30 = sld [smem:[%s4359_s0 + %s3623_s26]]  }
  0x14   :  { %4381 = sst [smem:[#allocation47_spill]] %s3710_s3 }
  0x15   :  { %4382 = sst [smem:[#allocation48_spill]] %s3715_s8 }
  0x16   :  { %4383 = sst [smem:[#allocation49_spill]] %s3720_s14 }
  0x17   :  { %4384 = sst [smem:[#allocation50_spill]] %s3725_s19 }
  0x18   :  { %4385 = sst [smem:[#allocation51_spill]] %s3730_s24 }
  0x19   :  { %s3740_s6 = sld [smem:[%s4359_s0 + %s3624_s1]]  }
  0x1a   :  { %s3745_s12 = sld [smem:[%s4359_s0 + %s3625_s7]]   ;;  %s3629_s7 = smov 18  }
  0x1b   :  { %s3750_s20 = sld [smem:[%s4359_s0 + %s3626_s15]]   ;;  %s3630_s15 = smov 19  }
  0x1c   :  { %s3755_s27 = sld [smem:[%s4359_s0 + %s3627_s22]]   ;;  %s3631_s22 = smov 20  }
  0x1d   :  { %s3760_s4 = sld [smem:[%s4359_s0 + %s3628_s28]]   ;;  %s3632_s28 = smov 21  }
  0x1e   :  { %s3770_s9 = sld [smem:[%s4359_s0 + %s3630_s15]]   ;;  %s3634_s15 = smov 23  }
  0x1f   :  { %4386 = sst [smem:[#allocation52_spill]] %s3740_s6 }
  0x20   :  { %4387 = sst [smem:[#allocation53_spill]] %s3745_s12 }
  0x21   :  { %s3765_s6 = sld [smem:[%s4359_s0 + %s3629_s7]]   ;;  %s3633_s7 = smov 22  }
  0x22   :  { %s3775_s24 = sld [smem:[%s4359_s0 + %s3631_s22]]   ;;  %s3635_s22 = smov 24  }
  0x23   :  { %4388 = sst [smem:[#allocation54_spill]] %s3760_s4 }
  0x24   :  { %4390 = sst [smem:[#allocation56_spill]] %s3770_s9 }
  0x25   :  { %s3780_s14 = sld [smem:[%s4359_s0 + %s3632_s28]]   ;;  %s3636_s28 = smov 25  }
  0x26   :  { %s3785_s3 = sld [smem:[%s4359_s0 + %s3633_s7]]   ;;  %s3637_s7 = smov 26  }
  0x27   :  { %4389 = sst [smem:[#allocation55_spill]] %s3765_s6 }
  0x28   :  { %s3790_s25 = sld [smem:[%s4359_s0 + %s3634_s15]]   ;;  %s3638_s15 = smov 27  }
  0x29   :  { %s3795_s5 = sld [smem:[%s4359_s0 + %s3635_s22]]   ;;  %s3639_s22 = smov 28  }
  0x2a   :  { %s3800_s17 = sld [smem:[%s4359_s0 + %s3636_s28]]   ;;  %s3640_s28 = smov 29  }
  0x2b   :  { %4391 = sst [smem:[#allocation57_spill]] %s3780_s14 }
  0x2c   :  { %4392 = sst [smem:[#allocation58_spill]] %s3785_s3 }
  0x2d   :  { %s3805_s3 = sld [smem:[%s4359_s0 + %s3637_s7]]   ;;  %s3641_s7 = smov 30  }
  0x2e   :  { %4393 = sst [smem:[#allocation59_spill]] %s3790_s25 }
  0x2f   :  { %4394 = sst [smem:[#allocation60_spill]] %s3795_s5 }
  0x30   :  { %4395 = sst [smem:[#allocation61_spill]] %s3800_s17 }
  0x31   :  { %s3810_s25 = sld [smem:[%s4359_s0 + %s3638_s15]]  }
  0x32   :  { %s3815_s5 = sld [smem:[%s4359_s0 + %s3639_s22]]  }
  0x33   :  { %4396 = sst [smem:[#allocation62_spill]] %s3805_s3 }
  0x34   :  { %s3820_s17 = sld [smem:[%s4359_s0 + %s3640_s28]]  }
  0x35   :  { %s3825_s13 = sld [smem:[%s4359_s0 + %s3641_s7]]  }
  0x37   :  { %4397 = sst [smem:[#allocation63_spill]] %s3810_s25 }
  0x38   :  { %4398 = sst [smem:[#allocation64_spill]] %s3815_s5 }
  0x3a   :  { %4399 = sst [smem:[#allocation65_spill]] %s3820_s17 }
  0x3b   :  { %4400 = sst [smem:[#allocation66_spill]] %s3825_s13 }
  0x3c   :  { %66 = vsyncpa [#allocation4], 0 }
  0x3d   :  { %68 = vsyncpa [#allocation4 + $0x1], 0 }
  0x3e   :  { %69 = vsyncpa [#allocation7], 0 }
  0x3f   :  { %71 = vsyncpa [#allocation7 + $0x1], 0 }
  0x40   :  { %72 = vsyncpa [#allocation10], 0 }
  0x41   :  { %73 = vsyncpa [#allocation13], 0 }
  0x42   :  { %74 = vsyncpa [#allocation16], 0 }
  0x43   :  { %75 = vsyncpa [#allocation19], 0 }
  0x44   :  { %76 = vsyncpa [#allocation22], 0 }
  0x45   :  { %77 = vsyncpa [#allocation25], 0 }
  0x46   :  { %78 = vsyncpa [#allocation28], 0 }
  0x47   :  { %79 = vsyncpa [#allocation5], 0 }
  0x48   :  { %81 = vsyncpa [#allocation5 + $0x1], 0  ;;  %s3827_s15 = smov 0   ;;  %s3829_s16 = smov 0  }
  0x49   :  { %s3831_s18 = smov 0   ;;  %s3833_s0 = smov 0  }
  0x4a LB: > { %s4401_s19 = sld [smem:[#allocation50_spill]]  ;;  %s3851_s23 = sadd.s32 4294967295, %s3610_s0   ;;  %s3598_s15 = sphi %s3827_s15, %s4438_s15   ;;  %s3610_s0 = sphi %s3833_s0, %s4441_s0   ;;  %s3606_s18 = sphi %s3831_s18, %s4440_s18   ;;  %s3602_s16 = sphi %s3829_s16, %s4439_s16  }
  0x4b   : > { %s4402_s14 = sld [smem:[#allocation57_spill]]  ;;  %p2555_p0 = scmp.ge.s32.totalorder %s3610_s0, 1 }
  0x4c   : > { %s4403_s12 = sld [smem:[#allocation53_spill]]  ;;  %p160_p1 = scmp.eq.s32.totalorder %s3851_s23, 0 }
  0x4d   : > { %s4404_s9 = sld [smem:[#allocation56_spill]]  ;;  %p768_p2 = scmp.lt.s32.totalorder %s3610_s0, 3 }
  0x4e   : > { %s4405_s8 = sld [smem:[#allocation48_spill]]  ;;  %s3642_s28 = smov [#allocation8]  }
  0x4f   : > { %s4406_s6 = sld [smem:[#allocation55_spill]]  ;;  %p3856_p3 = pnand %p2555_p0, %p768_p2 }
  0x50   : > { %s4407_s4 = sld [smem:[#allocation54_spill]]  ;;  %s3860_s1 = sshll.u32 %s3642_s28, 4  ;;  %s782_s1 = int_to_ptr.vmem [resolvable:$true] %s3860_s1 }
  0x51   : > { %s4408_s3 = sld [smem:[#allocation62_spill]]  ;;  %p2801_p4 = pneg %p3856_p3 }
  0x52   : > { %s4409_s21 = sld [smem:[#allocation45_spill]]  ;;  %s796_s2 = sshll.u32 %s3705_s29, 4  ;;  %s3873_s2 = int_to_ptr.hbm [resolvable:$true] %s796_s2 }
  0x53   : > { %s4410_s26 = scalar_select %p3856_p3, 1, 0 }
  0x54   : > { %p3869_p6 = pnand %p2801_p4, %p160_p1  ;;  %s830_s10 = sshll.u32 %s4401_s19, 4  ;;  %s3896_s10 = int_to_ptr.hbm [resolvable:$true] %s830_s10 }
  0x55   : > { %4411 = sst [smem:[#allocation67_spill]] %s4410_s26  ;;  %s3643_s11 = smov [#allocation9]  }
  0x56   : > { %s3876_s28 = sshll.u32 %s3643_s11, 4  ;;  %p3881_p8 = pneg %p3869_p6  ;;  %s799_s28 = int_to_ptr.vmem [resolvable:$true] %s3876_s28 }
  0x58   : > { %s779_s22 = sshll.u32 %s4409_s21, 4  ;;  %s3035_s25 = scalar_lea.hbm %s4409_s21, 16  ;;  %s3848_s22 = int_to_ptr.hbm [resolvable:$true] %s779_s22 }
  0x59   : > { %s3028_s17 = sshra.s32 %s3848_s22, 4  ;;  %s3029_s17 = int_to_ptr.hbm [resolvable:$true] %s3028_s17 }
  0x5a   : > { %s3030_s13 = scalar_lea.hbm %s3029_s17, 16  ;;  %p3036_p11 = scmp.lt.s32.totalorder %s3029_s17, %s4409_s21 }
  0x5b   : > { %p3031_p7 = scmp.ne.s32.totalorder %s3029_s17, %s3030_s13  ;;  %p3037_p12 = scmp.lt.s32.totalorder %s3035_s25, %s3030_s13 }
  0x5d   : > { %p3033_p9 = pnand %p3881_p8, %p3031_p7  ;;  %p3038_p13 = por %p3037_p12, %p3036_p11 }
  0x5f   : > { %p3034_p10 = pneg %p3033_p9 }
  0x61   : > { %p3039_p0 = pnand %p3038_p13, %p3034_p10 }
  0x63   : > { %3042 = shalt.err (!%p3039_p0)
}
  0x64   : > { %s3644_s11 = smov 64   ;;  %s3645_s26 = smov 4  }
  0x65   : > { %2804 = dma.hbm_to_vmem [thread:$0]  (!%p3869_p6), %s3848_s22, 256, %s782_s1, [#allocation7], %s3644_s11, %s3644_s11, %s3645_s26  }
  0x66   : > { %s3058_s13 = sshra.s32 %s3873_s2, 4  ;;  %s3065_s25 = scalar_lea.hbm %s3705_s29, 16  ;;  %s3059_s13 = int_to_ptr.hbm [resolvable:$true] %s3058_s13 }
  0x67   : > { %s3060_s17 = scalar_lea.hbm %s3059_s13, 16  ;;  %p3066_p9 = scmp.lt.s32.totalorder %s3059_s13, %s3705_s29 }
  0x68   : > { %p3061_p2 = scmp.ne.s32.totalorder %s3059_s13, %s3060_s17  ;;  %p3067_p10 = scmp.lt.s32.totalorder %s3065_s25, %s3060_s17 }
  0x6a   : > { %p3063_p4 = pnand %p3061_p2, %p3881_p8  ;;  %p3068_p11 = por %p3067_p10, %p3066_p9 }
  0x6c   : > { %p3064_p7 = pneg %p3063_p4 }
  0x6e   : > { %p3069_p12 = pnand %p3068_p11, %p3064_p7 }
  0x70   : > { %3072 = shalt.err (!%p3069_p12)
}
  0x71   : > { %2807 = dma.hbm_to_vmem [thread:$0]  (!%p3869_p6), %s3873_s2, 256, %s799_s28, [#allocation10], %s3644_s11, %s3644_s11, %s3645_s26  }
  0x72   : > { %s864_s22 = sshll.u32 %s4403_s12, 4  ;;  %s3646_s1 = smov [#allocation12]   ;;  %s3910_s22 = int_to_ptr.hbm [resolvable:$true] %s864_s22 }
  0x73   : > { %s832_s21 = sshll.u32 %s3646_s1, 4  ;;  %s3088_s13 = sshra.s32 %s3896_s10, 4  ;;  %s833_s21 = int_to_ptr.vmem [resolvable:$true] %s832_s21  ;;  %s3089_s13 = int_to_ptr.hbm [resolvable:$true] %s3088_s13 }
  0x74   : > { %s3090_s17 = scalar_lea.hbm %s3089_s13, 16  ;;  %s3095_s25 = scalar_lea.hbm %s4401_s19, 16 }
  0x75   : > { %p3091_p13 = scmp.ne.s32.totalorder %s3089_s13, %s3090_s17  ;;  %p3096_p4 = scmp.lt.s32.totalorder %s3089_s13, %s4401_s19 }
  0x76   : > { %p3097_p7 = scmp.lt.s32.totalorder %s3095_s25, %s3090_s17 }
  0x77   : > { %p3093_p0 = pnand %p3091_p13, %p3881_p8 }
  0x78   : > { %p3098_p9 = por %p3097_p7, %p3096_p4 }
  0x79   : > { %p3094_p2 = pneg %p3093_p0 }
  0x7b   : > { %p3099_p10 = pnand %p3098_p9, %p3094_p2 }
  0x7d   : > { %3102 = shalt.err (!%p3099_p10)
}
  0x7e   : > { %2813 = dma.hbm_to_vmem [thread:$0]  (!%p3869_p6), %s3896_s10, 256, %s833_s21, [#allocation13], %s3644_s11, %s3644_s11, %s3645_s26  }
  0x7f   : > { %s3647_s2 = smov [#allocation15]   ;;  %s890_s1 = sshll.u32 %s3755_s27, 4  ;;  %s3924_s1 = int_to_ptr.hbm [resolvable:$true] %s890_s1 }
  0x80   : > { %s866_s28 = sshll.u32 %s3647_s2, 4  ;;  %s3118_s13 = sshra.s32 %s3910_s22, 4  ;;  %s867_s28 = int_to_ptr.vmem [resolvable:$true] %s866_s28  ;;  %s3119_s13 = int_to_ptr.hbm [resolvable:$true] %s3118_s13 }
  0x81   : > { %s3120_s17 = scalar_lea.hbm %s3119_s13, 16  ;;  %s3125_s25 = scalar_lea.hbm %s4403_s12, 16 }
  0x82   : > { %p3121_p11 = scmp.ne.s32.totalorder %s3119_s13, %s3120_s17  ;;  %p3126_p0 = scmp.lt.s32.totalorder %s3119_s13, %s4403_s12 }
  0x83   : > { %p3127_p2 = scmp.lt.s32.totalorder %s3125_s25, %s3120_s17 }
  0x84   : > { %p3123_p12 = pnand %p3121_p11, %p3881_p8 }
  0x85   : > { %p3128_p4 = por %p3127_p2, %p3126_p0 }
  0x86   : > { %p3124_p13 = pneg %p3123_p12 }
  0x88   : > { %p3129_p7 = pnand %p3128_p4, %p3124_p13 }
  0x8a   : > { %3132 = shalt.err (!%p3129_p7)
}
  0x8b   : > { %2819 = dma.hbm_to_vmem [thread:$0]  (!%p3869_p6), %s3910_s22, 256, %s867_s28, [#allocation16], %s3644_s11, %s3644_s11, %s3645_s26  }
  0x8c   : > { %s916_s21 = sshll.u32 %s4406_s6, 4  ;;  %s3648_s10 = smov [#allocation18]   ;;  %s3938_s21 = int_to_ptr.hbm [resolvable:$true] %s916_s21 }
  0x8d   : > { %s892_s2 = sshll.u32 %s3648_s10, 4  ;;  %s3148_s13 = sshra.s32 %s3924_s1, 4  ;;  %s893_s2 = int_to_ptr.vmem [resolvable:$true] %s892_s2  ;;  %s3149_s13 = int_to_ptr.hbm [resolvable:$true] %s3148_s13 }
  0x8e   : > { %s3150_s17 = scalar_lea.hbm %s3149_s13, 16  ;;  %s3155_s25 = scalar_lea.hbm %s3755_s27, 16 }
  0x8f   : > { %p3151_p9 = scmp.ne.s32.totalorder %s3149_s13, %s3150_s17  ;;  %p3156_p12 = scmp.lt.s32.totalorder %s3149_s13, %s3755_s27 }
  0x90   : > { %p3157_p13 = scmp.lt.s32.totalorder %s3155_s25, %s3150_s17 }
  0x91   : > { %p3153_p10 = pnand %p3151_p9, %p3881_p8 }
  0x92   : > { %p3158_p0 = por %p3157_p13, %p3156_p12 }
  0x93   : > { %p3154_p11 = pneg %p3153_p10 }
  0x95   : > { %p3159_p2 = pnand %p3158_p0, %p3154_p11 }
  0x97   : > { %3162 = shalt.err (!%p3159_p2)
}
  0x98   : > { %2825 = dma.hbm_to_vmem [thread:$0]  (!%p3869_p6), %s3924_s1, 256, %s893_s2, [#allocation19], %s3644_s11, %s3644_s11, %s3645_s26  }
  0x99   : > { %s3649_s22 = smov [#allocation21]   ;;  %s942_s10 = sshll.u32 %s3775_s24, 4  ;;  %s3952_s10 = int_to_ptr.hbm [resolvable:$true] %s942_s10 }
  0x9a   : > { %s918_s28 = sshll.u32 %s3649_s22, 4  ;;  %s3178_s13 = sshra.s32 %s3938_s21, 4  ;;  %s919_s28 = int_to_ptr.vmem [resolvable:$true] %s918_s28  ;;  %s3179_s13 = int_to_ptr.hbm [resolvable:$true] %s3178_s13 }
  0x9b   : > { %s3180_s17 = scalar_lea.hbm %s3179_s13, 16  ;;  %s3185_s25 = scalar_lea.hbm %s4406_s6, 16 }
  0x9c   : > { %p3181_p4 = scmp.ne.s32.totalorder %s3179_s13, %s3180_s17  ;;  %p3186_p10 = scmp.lt.s32.totalorder %s3179_s13, %s4406_s6 }
  0x9d   : > { %p3187_p11 = scmp.lt.s32.totalorder %s3185_s25, %s3180_s17 }
  0x9e   : > { %p3183_p7 = pnand %p3181_p4, %p3881_p8 }
  0x9f   : > { %p3188_p12 = por %p3187_p11, %p3186_p10 }
  0xa0   : > { %p3184_p9 = pneg %p3183_p7 }
  0xa2   : > { %p3189_p13 = pnand %p3188_p12, %p3184_p9 }
  0xa4   : > { %3192 = shalt.err (!%p3189_p13)
}
  0xa5   : > { %2831 = dma.hbm_to_vmem [thread:$0]  (!%p3869_p6), %s3938_s21, 256, %s919_s28, [#allocation22], %s3644_s11, %s3644_s11, %s3645_s26  }
  0xa6   : > { %s813_s1 = sshll.u32 %s4405_s8, 4  ;;  %s3650_s2 = smov [#allocation24]   ;;  %s3966_s1 = int_to_ptr.hbm [resolvable:$true] %s813_s1 }
  0xa7   : > { %s944_s22 = sshll.u32 %s3650_s2, 4  ;;  %s3208_s13 = sshra.s32 %s3952_s10, 4  ;;  %s945_s22 = int_to_ptr.vmem [resolvable:$true] %s944_s22  ;;  %s3209_s13 = int_to_ptr.hbm [resolvable:$true] %s3208_s13 }
  0xa8   : > { %s3210_s17 = scalar_lea.hbm %s3209_s13, 16  ;;  %s3215_s25 = scalar_lea.hbm %s3775_s24, 16 }
  0xa9   : > { %p3211_p0 = scmp.ne.s32.totalorder %s3209_s13, %s3210_s17  ;;  %p3216_p7 = scmp.lt.s32.totalorder %s3209_s13, %s3775_s24 }
  0xaa   : > { %p3217_p9 = scmp.lt.s32.totalorder %s3215_s25, %s3210_s17 }
  0xab   : > { %p3213_p2 = pnand %p3211_p0, %p3881_p8 }
  0xac   : > { %p3218_p10 = por %p3217_p9, %p3216_p7 }
  0xad   : > { %p3214_p4 = pneg %p3213_p2 }
  0xaf   : > { %p3219_p11 = pnand %p3218_p10, %p3214_p4 }
  0xb1   : > { %3222 = shalt.err (!%p3219_p11)
}
  0xb2   : > { %2837 = dma.hbm_to_vmem [thread:$0]  (!%p3869_p6), %s3952_s10, 256, %s945_s22, [#allocation25], %s3644_s11, %s3644_s11, %s3645_s26  }
  0xb3   : > { %s3651_s21 = smov [#allocation11]   ;;  %s847_s2 = sshll.u32 %s3735_s30, 4  ;;  %s3980_s2 = int_to_ptr.hbm [resolvable:$true] %s847_s2 }
  0xb4   : > { %s815_s28 = sshll.u32 %s3651_s21, 4  ;;  %s3238_s13 = sshra.s32 %s3966_s1, 4  ;;  %s816_s28 = int_to_ptr.vmem [resolvable:$true] %s815_s28  ;;  %s3239_s13 = int_to_ptr.hbm [resolvable:$true] %s3238_s13 }
  0xb5   : > { %s3240_s17 = scalar_lea.hbm %s3239_s13, 16  ;;  %s3245_s25 = scalar_lea.hbm %s4405_s8, 16 }
  0xb6   : > { %p3241_p12 = scmp.ne.s32.totalorder %s3239_s13, %s3240_s17  ;;  %p3246_p2 = scmp.lt.s32.totalorder %s3239_s13, %s4405_s8 }
  0xb7   : > { %p3247_p4 = scmp.lt.s32.totalorder %s3245_s25, %s3240_s17 }
  0xb8   : > { %p3243_p13 = pnand %p3241_p12, %p3881_p8 }
  0xb9   : > { %p3248_p7 = por %p3247_p4, %p3246_p2 }
  0xba   : > { %p3244_p0 = pneg %p3243_p13 }
  0xbc   : > { %p3249_p9 = pnand %p3248_p7, %p3244_p0 }
  0xbe   : > { %3252 = shalt.err (!%p3249_p9)
}
  0xbf   : > { %2810 = dma.hbm_to_vmem [thread:$0]  (!%p3869_p6), %s3966_s1, 256, %s816_s28, [#allocation10], %s3644_s11, %s3644_s11, %s3645_s26  }
  0xc0   : > { %s879_s10 = sshll.u32 %s3750_s20, 4  ;;  %s3652_s22 = smov [#allocation14]   ;;  %s3994_s10 = int_to_ptr.hbm [resolvable:$true] %s879_s10 }
  0xc1   : > { %s849_s21 = sshll.u32 %s3652_s22, 4  ;;  %s3268_s13 = sshra.s32 %s3980_s2, 4  ;;  %s850_s21 = int_to_ptr.vmem [resolvable:$true] %s849_s21  ;;  %s3269_s13 = int_to_ptr.hbm [resolvable:$true] %s3268_s13 }
  0xc2   : > { %s3270_s17 = scalar_lea.hbm %s3269_s13, 16  ;;  %s3275_s25 = scalar_lea.hbm %s3735_s30, 16 }
  0xc3   : > { %p3271_p10 = scmp.ne.s32.totalorder %s3269_s13, %s3270_s17  ;;  %p3276_p13 = scmp.lt.s32.totalorder %s3269_s13, %s3735_s30 }
  0xc4   : > { %p3277_p0 = scmp.lt.s32.totalorder %s3275_s25, %s3270_s17 }
  0xc5   : > { %p3273_p11 = pnand %p3271_p10, %p3881_p8 }
  0xc6   : > { %p3278_p2 = por %p3277_p0, %p3276_p13 }
  0xc7   : > { %p3274_p12 = pneg %p3273_p11 }
  0xc9   : > { %p3279_p4 = pnand %p3278_p2, %p3274_p12 }
  0xcb   : > { %3282 = shalt.err (!%p3279_p4)
}
  0xcc   : > { %2816 = dma.hbm_to_vmem [thread:$0]  (!%p3869_p6), %s3980_s2, 256, %s850_s21, [#allocation13], %s3644_s11, %s3644_s11, %s3645_s26  }
  0xcd   : > { %s3653_s1 = smov [#allocation17]   ;;  %s905_s22 = sshll.u32 %s4407_s4, 4  ;;  %s4008_s22 = int_to_ptr.hbm [resolvable:$true] %s905_s22 }
  0xce   : > { %s881_s28 = sshll.u32 %s3653_s1, 4  ;;  %s3298_s13 = sshra.s32 %s3994_s10, 4  ;;  %s882_s28 = int_to_ptr.vmem [resolvable:$true] %s881_s28  ;;  %s3299_s13 = int_to_ptr.hbm [resolvable:$true] %s3298_s13 }
  0xcf   : > { %s3300_s17 = scalar_lea.hbm %s3299_s13, 1  ;;  %s3305_s25 = scalar_lea.hbm %s3750_s20, 1 }
  0xd0   : > { %p3301_p7 = scmp.ne.s32.totalorder %s3299_s13, %s3300_s17  ;;  %p3306_p11 = scmp.lt.s32.totalorder %s3299_s13, %s3750_s20 }
  0xd1   : > { %p3307_p12 = scmp.lt.s32.totalorder %s3305_s25, %s3300_s17 }
  0xd2   : > { %p3303_p9 = pnand %p3301_p7, %p3881_p8 }
  0xd3   : > { %p3308_p13 = por %p3307_p12, %p3306_p11 }
  0xd4   : > { %p3304_p10 = pneg %p3303_p9 }
  0xd6   : > { %p3309_p0 = pnand %p3308_p13, %p3304_p10 }
  0xd8   : > { %3312 = shalt.err (!%p3309_p0)
}
  0xd9   : > { %2822 = dma.hbm_to_vmem [thread:$0]  (!%p3869_p6), %s3994_s10, 16, %s882_s28, [#allocation16]  }
  0xda   : > { %s931_s26 = sshll.u32 %s4404_s9, 4  ;;  %s3654_s11 = smov [#allocation20]   ;;  %s4019_s26 = int_to_ptr.hbm [resolvable:$true] %s931_s26 }
  0xdb   : > { %s907_s2 = sshll.u32 %s3654_s11, 4  ;;  %s3328_s21 = sshra.s32 %s4008_s22, 4  ;;  %s908_s2 = int_to_ptr.vmem [resolvable:$true] %s907_s2  ;;  %s3329_s21 = int_to_ptr.hbm [resolvable:$true] %s3328_s21 }
  0xdc   : > { %s3330_s1 = scalar_lea.hbm %s3329_s21, 1  ;;  %s3335_s13 = scalar_lea.hbm %s4407_s4, 1 }
  0xdd   : > { %p3331_p2 = scmp.ne.s32.totalorder %s3329_s21, %s3330_s1  ;;  %p3336_p9 = scmp.lt.s32.totalorder %s3329_s21, %s4407_s4 }
  0xde   : > { %p3337_p10 = scmp.lt.s32.totalorder %s3335_s13, %s3330_s1 }
  0xdf   : > { %p3333_p4 = pnand %p3331_p2, %p3881_p8 }
  0xe0   : > { %p3338_p11 = por %p3337_p10, %p3336_p9 }
  0xe1   : > { %p3334_p7 = pneg %p3333_p4 }
  0xe3   : > { %p3339_p12 = pnand %p3338_p11, %p3334_p7 }
  0xe5   : > { %3342 = shalt.err (!%p3339_p12)
}
  0xe6   : > { %2828 = dma.hbm_to_vmem [thread:$0]  (!%p3869_p6), %s4008_s22, 16, %s908_s2, [#allocation19]  }
  0xe7   : > { %s3655_s10 = smov [#allocation23]   ;;  %s957_s17 = sshll.u32 %s4402_s14, 4  ;;  %s4030_s17 = int_to_ptr.hbm [resolvable:$true] %s957_s17 }
  0xe8   : > { %s933_s28 = sshll.u32 %s3655_s10, 4  ;;  %s3358_s25 = sshra.s32 %s4019_s26, 4  ;;  %s934_s28 = int_to_ptr.vmem [resolvable:$true] %s933_s28  ;;  %s3359_s25 = int_to_ptr.hbm [resolvable:$true] %s3358_s25 }
  0xe9   : > { %s3360_s11 = scalar_lea.hbm %s3359_s25, 1  ;;  %s3365_s21 = scalar_lea.hbm %s4404_s9, 1 }
  0xea   : > { %p3361_p13 = scmp.ne.s32.totalorder %s3359_s25, %s3360_s11  ;;  %p3366_p4 = scmp.lt.s32.totalorder %s3359_s25, %s4404_s9 }
  0xeb   : > { %p3367_p7 = scmp.lt.s32.totalorder %s3365_s21, %s3360_s11 }
  0xec   : > { %p3363_p0 = pnand %p3361_p13, %p3881_p8 }
  0xed   : > { %p3368_p9 = por %p3367_p7, %p3366_p4 }
  0xee   : > { %p3364_p2 = pneg %p3363_p0 }
  0xf0   : > { %p3369_p10 = pnand %p3368_p9, %p3364_p2 }
  0xf2   : > { %3372 = shalt.err (!%p3369_p10)
}
  0xf3   : > { %2834 = dma.hbm_to_vmem [thread:$0]  (!%p3869_p6), %s4019_s26, 16, %s934_s28, [#allocation22]  }
  0xf4   : > { %s981_s22 = sshll.u32 %s4408_s3, 4  ;;  %s3656_s2 = smov [#allocation26]   ;;  %s4041_s22 = int_to_ptr.hbm [resolvable:$true] %s981_s22 }
  0xf5   : > { %s959_s1 = sshll.u32 %s3656_s2, 4  ;;  %s3388_s13 = sshra.s32 %s4030_s17, 4  ;;  %s960_s1 = int_to_ptr.vmem [resolvable:$true] %s959_s1  ;;  %s3389_s13 = int_to_ptr.hbm [resolvable:$true] %s3388_s13 }
  0xf6   : > { %s3390_s10 = scalar_lea.hbm %s3389_s13, 1  ;;  %s3395_s25 = scalar_lea.hbm %s4402_s14, 1 }
  0xf7   : > { %p3391_p11 = scmp.ne.s32.totalorder %s3389_s13, %s3390_s10  ;;  %p3396_p0 = scmp.lt.s32.totalorder %s3389_s13, %s4402_s14 }
  0xf8   : > { %p3397_p2 = scmp.lt.s32.totalorder %s3395_s25, %s3390_s10 }
  0xf9   : > { %p3393_p12 = pnand %p3391_p11, %p3881_p8 }
  0xfa   : > { %p3398_p4 = por %p3397_p2, %p3396_p0 }
  0xfb   : > { %p3394_p13 = pneg %p3393_p12 }
  0xfd   : > { %p3399_p7 = pnand %p3398_p4, %p3394_p13 }
  0xff   : > { %3402 = shalt.err (!%p3399_p7)
}
 0x100   : > { %2840 = dma.hbm_to_vmem [thread:$0]  (!%p3869_p6), %s4030_s17, 16, %s960_s1, [#allocation25]  }
 0x101   : > { %s3657_s26 = smov [#allocation27]   ;;  %s3418_s11 = sshra.s32 %s4041_s22, 4  ;;  %s3419_s11 = int_to_ptr.hbm [resolvable:$true] %s3418_s11 }
 0x102   : > { %s983_s28 = sshll.u32 %s3657_s26, 4  ;;  %s3420_s21 = scalar_lea.hbm %s3419_s11, 1  ;;  %s984_s28 = int_to_ptr.vmem [resolvable:$true] %s983_s28 }
 0x103   : > { %p3421_p9 = scmp.ne.s32.totalorder %s3419_s11, %s3420_s21  ;;  %s3425_s2 = scalar_lea.hbm %s4408_s3, 1 }
 0x104   : > { %p3426_p12 = scmp.lt.s32.totalorder %s3419_s11, %s4408_s3  ;;  %p3427_p13 = scmp.lt.s32.totalorder %s3425_s2, %s3420_s21 }
 0x105   : > { %p3423_p10 = pnand %p3421_p9, %p3881_p8 }
 0x106   : > { %p3428_p0 = por %p3427_p13, %p3426_p12 }
 0x107   : > { %p3424_p11 = pneg %p3423_p10 }
 0x109   : > { %p3429_p2 = pnand %p3428_p0, %p3424_p11 }
 0x10b   : > { %3432 = shalt.err (!%p3429_p2)
}
 0x10c   : > { %2843 = dma.hbm_to_vmem [thread:$0]  (!%p3869_p6), %s4041_s22, 16, %s984_s28, [#allocation28]  }
 0x10d   : > { %s2554_s5 = sadd.s32 4294967294, %s3610_s0   ;;  %s4061_s17 = sadd.s32 1, %s3610_s0  }
 0x10e   : > { %s143_s7 = ssub.s32 %s3610_s0, %s4061_s17  ;;  %s146_s1 = sadd.s32 1, %s3606_s18 }
 0x10f   : > { %s4414_s13 = sld [smem:[#allocation43_spill]]  ;;  %p144_p8 = scmp.eq.s32.totalorder %s143_s7, 0 }
 0x110   : > { %p153_p4 = scmp.ne.s32.totalorder %s3606_s18, %s3602_s16  ;;  %p154_p7 = scmp.eq.s32.totalorder %s3610_s0, 0 }
 0x111   : > { %p159_p9 = scmp.ne.s32.totalorder %s3602_s16, %s3598_s15  ;;  %p755_p11 = scmp.eq.s32.totalorder %s3851_s23, 1 }
 0x112   : > { %s4072_s10 = scalar_select %p144_p8, %s3606_s18, %s146_s1  }
 0x113   : > { %p4074_p10 = por %p154_p7, %p153_p4  ;;  %p4080_p6 = por %p160_p1, %p159_p9 }
 0x114   : > { %p761_p12 = scmp.eq.s32.totalorder %s2554_s5, 1  ;;  %p2869_p13 = scmp.lt.s32.totalorder %s3610_s0, 2 }
 0x115   : > { %s4087_s26 = sand.u32 1, %s3606_s18   ;;  %p4089_p0 = por %p755_p11, %p153_p4 }
 0x116   : > { %p4093_p2 = por %p761_p12, %p159_p9  ;;  %s2571_s21 = sshll.u32 %s4087_s26, 3 }
 0x117   : > { %s2572_s2 = sshll.u32 %s3610_s0, 3  ;;  %s1022_s1 = scalar_lea.vmem [#allocation3], %s2571_s21 }
 0x118   : > { %s1026_s7 = scalar_lea.hbm %s4414_s13, %s2572_s2  ;;  %s1030_s5 = sshll.u32 %s1022_s1, 4  ;;  %s1031_s5 = int_to_ptr.vmem [resolvable:$true] %s1030_s5 }
 0x119   : > { %s1028_s3 = sshll.u32 %s1026_s7, 4  ;;  %p4102_p8 = pnand %p2869_p13, %p4074_p10  ;;  %s1029_s3 = int_to_ptr.hbm [resolvable:$true] %s1028_s3 }
 0x11a   : > { %s2573_s6 = sshll.u32 %s4087_s26, 4  ;;  %s1037_s8 = sand.u32 1, %s3610_s0  }
 0x11b   : > { %s1019_s9 = scalar_lea.sflag [#allocation4], %s4087_s26  ;;  %s3448_s12 = sshra.s32 %s1029_s3, 4  ;;  %s3449_s12 = int_to_ptr.hbm [resolvable:$true] %s3448_s12 }
 0x11c   : > { %s3450_s2 = scalar_lea.hbm %s3449_s12, 8  ;;  %p3452_p7 = pneg %p4102_p8 }
 0x11d   : > { %p3451_p4 = scmp.ne.s32.totalorder %s3449_s12, %s3450_s2  ;;  %s3455_s25 = scalar_lea.hbm %s4414_s13, 16 }
 0x11e   : > { %p3456_p10 = scmp.lt.s32.totalorder %s3449_s12, %s4414_s13  ;;  %p3457_p12 = scmp.lt.s32.totalorder %s3455_s25, %s3450_s2 }
 0x11f   : > { %p3453_p9 = pnand %p3452_p7, %p3451_p4 }
 0x120   : > { %p3458_p13 = por %p3457_p12, %p3456_p10 }
 0x121   : > { %p3454_p11 = pneg %p3453_p9 }
 0x123   : > { %p3459_p5 = pnand %p3458_p13, %p3454_p11 }
 0x125   : > { %3462 = shalt.err (!%p3459_p5)
}
 0x126   : > { %s4420_s26 = sld [smem:[#allocation44_spill]]  ;;  %s1041_s21 = scalar_lea.vmem [#allocation6], %s2573_s6 }
 0x127   : > { %2847 = dma.hbm_to_vmem [thread:$0]  (!%p4102_p8), %s1029_s3, 128, %s1031_s5, %s1019_s9  }
 0x128   : > { %s1049_s7 = sshll.u32 %s1041_s21, 4  ;;  %s2715_s1 = sshll.u32 %s3610_s0, 4  ;;  %s1050_s7 = int_to_ptr.vmem [resolvable:$true] %s1049_s7 }
 0x129   : > { %s1038_s12 = scalar_lea.sflag [#allocation7], %s1037_s8 }
 0x12c   : > { %s1046_s14 = scalar_lea.hbm %s4420_s26, %s2715_s1  ;;  %s3485_s13 = scalar_lea.hbm %s4420_s26, 32 }
 0x12d   : > { %s1047_s19 = sshll.u32 %s1046_s14, 4  ;;  %s1048_s19 = int_to_ptr.hbm [resolvable:$true] %s1047_s19 }
 0x12e   : > { %s3478_s2 = sshra.s32 %s1048_s19, 4  ;;  %s3479_s2 = int_to_ptr.hbm [resolvable:$true] %s3478_s2 }
 0x12f   : > { %s3480_s25 = scalar_lea.hbm %s3479_s2, 16  ;;  %p3486_p11 = scmp.lt.s32.totalorder %s3479_s2, %s4420_s26 }
 0x130   : > { %p3481_p5 = scmp.ne.s32.totalorder %s3479_s2, %s3480_s25  ;;  %p3487_p10 = scmp.lt.s32.totalorder %s3485_s13, %s3480_s25 }
 0x132   : > { %p3483_p4 = pnand %p3481_p5, %p3452_p7  ;;  %p3488_p12 = por %p3487_p10, %p3486_p11 }
 0x134   : > { %p3484_p9 = pneg %p3483_p4 }
 0x136   : > { %p3489_p13 = pnand %p3488_p12, %p3484_p9 }
 0x138   : > { %3492 = shalt.err (!%p3489_p13)
}
 0x139   : > { %s3658_s9 = smov 128   ;;  %s3659_s3 = smov 8  }
 0x13a   : > { %2850 = dma.hbm_to_vmem [thread:$0]  (!%p4102_p8), %s1048_s19, 256, %s1050_s7, %s1038_s12, %s3658_s9, %s3658_s9, %s3659_s3  }
 0x13b   : > { %1061 = sbr.rel (%p3856_p3) target bundleno = 3525 (0xdc5), region = 140  ;;  %s4130_s14 = sand.u32 (!%p3856_p3), 1, %s3602_s16  }
 0x13c   : > { %s2577_s6 = sshll.u32 (!%p3856_p3), %s4130_s14, 3  ;;  %s1064_s13 = scalar_lea.sflag (!%p3856_p3), [#allocation4], %s4130_s14 }
 0x13d   : > { %s4136_s5 = scalar_lea.vmem (!%p3856_p3), [#allocation3], %s2577_s6 }
 0x140   : > { %3553 = dma.done.wait (%p4080_p6), %s1064_s13, 128  }
 0x141   : > { %3555 = vsyncadd (%p4080_p6), %s1064_s13, 4294967168  ;;  %s1073_s19 = sand.u32 1, %s3851_s23   ;;  %s2578_s4 = sshll.u32 %s4130_s14, 4 }
 0x142   : > { %s1074_s21 = scalar_lea.sflag [#allocation7], %s1073_s19  ;;  %s4144_s7 = scalar_lea.vmem [#allocation6], %s2578_s4 }
 0x143   : > { %3557 = dma.done.wait (%p4080_p6), %s1074_s21, 256  }
 0x144   : > { %3559 = vsyncadd (%p4080_p6), %s1074_s21, 4294967040 }
 0x145   : > { %3561 = dma.done.wait (%p160_p1), [#allocation7], 256  }
 0x146   : > { %3563 = vsyncadd (%p160_p1), [#allocation7], 4294967040 }
 0x147   : > { %3565 = dma.done.wait (%p160_p1), [#allocation10], 512  }
 0x148   : > { %3567 = vsyncadd (%p160_p1), [#allocation10], 4294966784 }
 0x149   : > { %3569 = dma.done.wait (%p160_p1), [#allocation13], 512  }
 0x14a   : > { %3571 = vsyncadd (%p160_p1), [#allocation13], 4294966784 }
 0x14b   : > { %3573 = dma.done.wait (%p160_p1), [#allocation16], 272  }
 0x14c   : > { %3575 = vsyncadd (%p160_p1), [#allocation16], 4294967024 }
 0x14d   : > { %3577 = dma.done.wait (%p160_p1), [#allocation19], 272  }
 0x14e   : > { %3579 = vsyncadd (%p160_p1), [#allocation19], 4294967024 }
 0x14f   : > { %3581 = dma.done.wait (%p160_p1), [#allocation22], 272  }
 0x150   : > { %3583 = vsyncadd (%p160_p1), [#allocation22], 4294967024 }
 0x151   : > { %3585 = dma.done.wait (%p160_p1), [#allocation25], 272  }
 0x152   : > { %3587 = vsyncadd (%p160_p1), [#allocation25], 4294967024 }
 0x153   : > { %3589 = dma.done.wait (%p160_p1), [#allocation28], 16  }
 0x154   : > { %3591 = vsyncadd (%p160_p1), [#allocation28], 4294967280  ;;  %s4422_s22 = sld [smem:[#allocation41_spill]]  ;;  %p1239_p3 = scmp.lt.s32.totalorder %s3851_s23, 1  ;;  %v2718_v0 = vld [vmem:[#allocation8 + $0x8] sm:$0xff]  ;;  %v2720_v1 = vld [vmem:[#allocation9 + $0x8] sm:$0xff] }
 0x155   : > { %s4423_s25 = sld [smem:[#allocation46_spill]]  ;;  %v4191_v3 = vld [vmem:[%s4136_s5] sm:$0xff]  ;;  %1287 = vmatpush.bf16.msra.mxu0 %v2718_v0  ;;  %1321 = vmatpush.bf16.msra.mxu1 %v2720_v1  ;;  %v2717_v4 = vld [vmem:[#allocation8] sm:$0xff]  ;;  %vm1277_vm0 = vcmask 261120   ;;  %vm1367_vm1 = vcmask 64512   ;;  %s3660_s3 = smov 112  }
 0x156   : > { %s4184_s1 = scalar_select %p1239_p3, %s3851_s23, 1  ;;  %v2719_v5 = vld [vmem:[#allocation9] sm:$0xff]  ;;  %v2722_v23 = vld [vmem:[#allocation11 + $0x8] sm:$0xff]  ;;  %v2721_v36 = vld [vmem:[#allocation11] sm:$0xff]  ;;  %vm1402_vm2 = vcmask 1043456   ;;  %vm1420_vm3 = vcmask 60416  }
 0x157   : > { %s4424_s9 = sld [smem:[#allocation47_spill]]  ;;  %s3661_s8 = smov 120   ;;  %1359 = vmatpush.bf16.msra.mxu2 %v2722_v23  ;;  %vm1492_vm4 = vcmask 126016   ;;  %vm1555_vm5 = vcmask 191616   ;;  %vm1618_vm6 = vcmask 257216   ;;  %vm1842_vm11 = vcmask 130048  }
 0x158   : > { %s2594_s12 = sshll.u32 %s4184_s1, 3  ;;  %s3662_s13 = smov 104   ;;  %vm2207_vm15 = vcmask 523264  }
 0x159   : > { %1288 = vmatpush.bf16.msra.mxu0 %v2717_v4  ;;  %1322 = vmatpush.bf16.msra.mxu1 %v2719_v5  ;;  %s4425_s5 = sld [smem:[#allocation49_spill]]  ;;  %s3663_s19 = smov 8  }
 0x15a   : > { %s1242_s2 = scalar_lea.vmem %s4422_s22, %s2594_s12  ;;  %s3664_s4 = smov 24  }
 0x15b   : > { %v4188_v2 = vld [vmem:[%s1242_s2] sm:$0xff]  ;;  %1360 = vmatpush.bf16.msra.mxu2 %v2721_v36  ;;  %s3665_s21 = smov 16   ;;  %s4426_s22 = sld [smem:[#allocation51_spill]] }
 0x15c   : > { %v1255_v6 = vadd.f32 %v4191_v3, %v4188_v2  ;;  %v2972_v8 = vld [vmem:[%s4423_s25] ss:$0 sm:$0xff]  ;;  %v1329_v37 = vpack.c.bf16 %v4188_v2, %v4188_v2  ;;  %s4427_s12 = sld [smem:[#allocation42_spill]]  ;;  %s2716_s2 = sshll.u32 %s4184_s1, 4 }
 0x15d   : > { %v2973_v9 = vld [vmem:[%s4424_s9] ss:$0 sm:$0xff]  ;;  %s4429_s1 = sld [smem:[#allocation61_spill]] }
 0x15e   : > { %v1256_v7 = vpack.c.bf16 %v1255_v6, %v1255_v6  ;;  %2623 = vmatmul.msk.bf16.vlgmr.msra.gmra.mxu2 %vm1277_vm0, %v1329_v37  ;;  %s4430_s9 = sld [smem:[#allocation52_spill]] }
 0x15f   : > { %v2974_v52 = vld [vmem:[%s4425_s5] ss:$0 sm:$0xff]  ;;  %s4434_s5 = sld [smem:[#allocation64_spill]] }
 0x160   : > { %2605 = vmatmul.msk.bf16.vlgmr.msra.gmra.mxu0 %vm1277_vm0, %v1256_v7  ;;  %2614 = vmatmul.msk.bf16.vlgmr.msra.gmra.mxu1 %vm1277_vm0, %v1256_v7 }
 0x162   : > { %s1247_s25 = scalar_lea.vmem %s4427_s12, %s2716_s2  ;;  %s1238_s12 = scalar_lea.vmem [#allocation29], %s2577_s6 }
 0x163   : > { %s2271_s2 = sshll.u32 %s1238_s12, 4  ;;  %s2272_s2 = int_to_ptr.vmem [resolvable:$true] %s2271_s2 }
 0x1dd   : > { %v1290_v10 = vpop.f32.mrf.mxu0  ;;  %v1324_v11 = vpop.f32.mrf.mxu1 }
 0x1de   : > { %v1291_v12 = vadd.f32 %v2972_v8, %v1290_v10  ;;  %v1325_v13 = vadd.f32 %v2973_v9, %v1324_v11 }
 0x1e0   : > { %v1294_v14 = vpack.c.bf16 %v1291_v12, %v1291_v12  ;;  %v1328_v15 = vpack.c.bf16 %v1325_v13, %v1325_v13 }
 0x1e1   : > { %v1362_v53 = vpop.f32.mrf.mxu2 }
 0x1e2   : > { %v1423_v16 = vunpack.c.l.b16 %v1294_v14  ;;  %v1428_v17 = vunpack.c.l.b16 %v1328_v15  ;;  %v1372_v18 = vsel %vm1367_vm1, %v1328_v15, 0  ;;  %v1363_v54 = vadd.f32 %v2974_v52, %v1362_v53  ;;  %v2975_v53 = vld [vmem:[%s4426_s22] ss:$0 sm:$0xff] }
 0x1e3   : > { %1381 = vmatpush.bf16.xpose.msra.mxu3 %v1372_v18 }
 0x1e4   : > { %v1424_v19 = vpack.c.b16 %v1423_v16, %v1423_v16  ;;  %v1429_v20 = vpack.c.b16 %v1428_v17, %v1428_v17  ;;  %v1366_v55 = vpack.c.bf16 %v1363_v54, %v1363_v54 }
 0x1e5   : > { %v1292_v21 = vpop.f32.mrf.mxu0  ;;  %v1326_v22 = vpop.f32.mrf.mxu1 }
 0x1e6   : > { %1496 = vrot.lane.b32.xlu1 %v1429_v20, %s3660_s3  ;;  %1430 = vrot.lane.b32.xlu0 %v1429_v20, %s3661_s8  ;;  %v1464_v56 = vunpack.c.l.b16 %v1366_v55  ;;  %v1404_v57 = vsel %vm1402_vm2, %v1366_v55, 0 }
 0x1e7   : > { %1494 = vrot.lane.b32.xlu2 %v1424_v19, %s3660_s3  ;;  %1413 = vmatpush.bf16.msrb.mxu0 %v1404_v57 }
 0x1e8   : > { %v1465_v58 = vpack.c.b16 %v1464_v56, %v1464_v56 }
 0x1e9   : > { %v1364_v59 = vpop.f32.mrf.mxu2 }
 0x1ea   : > { %2624 = vmatmul.msk.bf16.vlgmr.msra.gmra.mxu3 %vm1367_vm1, %v1294_v14  ;;  %v3666_v59 = vmov 32.0  }
 0x1ee   : > { %1559 = vrot.lane.b32.xlu1 %v1429_v20, %s3662_s13  ;;  %1425 = vrot.lane.b32.xlu0 %v1424_v19, %s3661_s8 }
 0x1ef   : > { %1557 = vrot.lane.b32.xlu2 %v1424_v19, %s3662_s13 }
 0x241   : > { %v1495_v28 = vpop.permute.xlu2 %1494 }
 0x249   : > { %v1558_v34 = vpop.permute.xlu2 %1557 }
 0x258   : > { %v1497_v24 = vpop.permute.xlu1 %1496  ;;  %v1431_v25 = vpop.permute.xlu0 %1430 }
 0x259   : > { %v1436_v26 = vsel %vm1367_vm1, %v1431_v25, 0  ;;  %v1502_v27 = vsel %vm1367_vm1, %v1497_v24, 0 }
 0x25a   : > { %1445 = vmatpush.bf16.xpose.msrb.mxu1 %v1436_v26  ;;  %1511 = vmatpush.bf16.xpose.msrb.mxu3 %v1502_v27 }
 0x260   : > { %v1560_v29 = vpop.permute.xlu1 %1559  ;;  %v1426_v30 = vpop.permute.xlu0 %1425 }
 0x261   : > { %v1565_v31 = vsel %vm1367_vm1, %v1560_v29, 0  ;;  %2626 = vmatmul.msk.bf16.vlgmr.msrb.gmra.mxu1 %vm1367_vm1, %v1426_v30  ;;  %2628 = vmatmul.msk.bf16.vlgmr.msrb.gmra.mxu3 %vm1367_vm1, %v1495_v28 }
 0x262   : > { %1574 = vmatpush.bf16.xpose.msra.mxu1 %v1565_v31 }
 0x26d   : > { %v1383_v32 = vpop.f32.mrf.mxu3 }
 0x26e   : > { %v1387_v33 = vsel %vm1367_vm1, %v1383_v32, -inf }
 0x26f   : > { %1388 = vmax.xlane.f32.xlu1 %v1387_v33 }
 0x271   : > { %2630 = vmatmul.msk.bf16.vlgmr.msra.gmra.mxu1 %vm1367_vm1, %v1558_v34 }
 0x275   : > { %v1385_v35 = vpop.f32.mrf.mxu3 }
 0x2de   : > { %v1447_v38 = vpop.f32.mrf.mxu1 }
 0x2df   : > { %v1451_v39 = vsel %vm1367_vm1, %v1447_v38, -inf }
 0x2e0   : > { %1452 = vmax.xlane.f32.xlu0 %v1451_v39 }
 0x2e2   : > { %v1389_v40 = vpop.xlane.xlu1 %1388 }
 0x2e3   : > { %v1390_v41 = vsub.f32 %v1383_v32, %v1389_v40 }
 0x2e4   : > { %v1513_v42 = vpop.f32.mrf.mxu3 }
 0x2e5   : > { %v1391_v43 = vmul.f32 1.442695, %v1390_v41  ;;  %v1517_v51 = vsel %vm1367_vm1, %v1513_v42, -inf }
 0x2e6   : > { %v1449_v44 = vpop.f32.mrf.mxu1 }
 0x2e7   : > { %2988 = vpow2.f32 %v1391_v43 }
 0x2ec   : > { %v1515_v45 = vpop.f32.mrf.mxu3 }
 0x2ed   : > { %v2989_v46 = vpop.eup %2988 }
 0x2ee   : > { %v1576_v47 = vpop.f32.mrf.mxu1  ;;  %v1393_v48 = vsel %vm1367_vm1, %v2989_v46, 0.0 }
 0x2ef   : > { %1394 = vadd.xlane.f32.xlu1 %v1393_v48  ;;  %v1580_v49 = vsel %vm1367_vm1, %v1576_v47, -inf  ;;  %v2724_v48 = vld [vmem:[#allocation12 + $0x8] sm:$0xff] }
 0x2f0   : > { %1581 = vmax.xlane.f32.xlu2 %v1580_v49  ;;  %1650 = vmatpush.bf16.msra.mxu3 %v2724_v48  ;;  %v2723_v49 = vld [vmem:[#allocation12] sm:$0xff] }
 0x2f4   : > { %1651 = vmatpush.bf16.msra.mxu3 %v2723_v49  ;;  %v2979_v49 = vld [vmem:[%s4430_s9] ss:$0 sm:$0xff] }
 0x2f6   : > { %v1578_v50 = vpop.f32.mrf.mxu1 }
 0x2f8   : > { %1518 = vmax.xlane.f32.xlu2 %v1517_v51 }
 0x310   : > { %1466 = vrot.lane.b32.xlu2 %v1465_v58, %s3661_s8 }
 0x353   : > { %v1453_v60 = vpop.xlane.xlu0 %1452 }
 0x354   : > { %v1454_v61 = vsub.f32 %v1447_v38, %v1453_v60  ;;  %v4249_v60 = vld [vmem:[%s1247_s25] sm:$0xff] }
 0x356   : > { %v1455_v62 = vmul.f32 1.442695, %v1454_v61  ;;  %v4251_v61 = vld [vmem:[%s1247_s25 + $0x8] sm:$0xff] }
 0x358   : > { %2990 = vpow2.f32 %v1455_v62  ;;  %v2728_v62 = vld [vmem:[#allocation15 + $0x8] sm:$0xff] }
 0x359   : > { %1768 = vmatpush.bf16.msrb.mxu1 %v2728_v62  ;;  %v2730_v62 = vld [vmem:[#allocation18 + $0x8] sm:$0xff] }
 0x35e   : > { %v2991_v63 = vpop.eup %2990 }
 0x35f   : > { %v1457_v0 = vsel %vm1367_vm1, %v2991_v63, 0.0 }
 0x360   : > { %1458 = vadd.xlane.f32.xlu0 %v1457_v0  ;;  %v1254_v0 = vld [vmem:[%s4144_s7 + $0x8] sm:$0xff] }
 0x362   : > { %v1395_v1 = vpop.xlane.xlu1 %1394 }
 0x363   : > { %2992 = vrcp.f32 %v1395_v1  ;;  %v1582_v4 = vpop.xlane.xlu2 %1581 }
 0x364   : > { %v1583_v5 = vsub.f32 %v1576_v47, %v1582_v4  ;;  %v2727_v4 = vld [vmem:[#allocation15] sm:$0xff] }
 0x365   : > { %1769 = vmatpush.bf16.msrb.mxu1 %v2727_v4 }
 0x366   : > { %v1584_v6 = vmul.f32 1.442695, %v1583_v5 }
 0x368   : > { %2994 = vpow2.f32 %v1584_v6 }
 0x369   : > { %v2993_v7 = vpop.eup %2992 }
 0x36a   : > { %v1397_v8 = vmul.f32 %v2993_v7, %v2989_v46 }
 0x36b   : > { %v1519_v9 = vpop.xlane.xlu2 %1518 }
 0x36c   : > { %v1520_v10 = vsub.f32 %v1513_v42, %v1519_v9  ;;  %v1398_v11 = vpack.c.bf16 %v1397_v8, %v1397_v8 }
 0x36e   : > { %v2995_v12 = vpop.eup %2994  ;;  %v1521_v13 = vmul.f32 1.442695, %v1520_v10  ;;  %2625 = vmatmul.msk.bf16.vlgmr.msrb.gmra.mxu0 %vm1367_vm1, %v1398_v11 }
 0x36f   : > { %v1586_v14 = vsel %vm1367_vm1, %v2995_v12, 0.0 }
 0x370   : > { %2996 = vpow2.f32 %v1521_v13  ;;  %1587 = vadd.xlane.f32.xlu0 %v1586_v14 }
 0x373   : > { %v1467_v17 = vpop.permute.xlu2 %1466 }
 0x374   : > { %v1472_v18 = vsel %vm1402_vm2, %v1467_v17, 0  ;;  %v2726_v17 = vld [vmem:[#allocation14 + $0x8] sm:$0xff] }
 0x375   : > { %1481 = vmatpush.bf16.msrb.mxu2 %v1472_v18  ;;  %v2725_v18 = vld [vmem:[#allocation14] sm:$0xff] }
 0x376   : > { %v2997_v15 = vpop.eup %2996 }
 0x377   : > { %v1523_v16 = vsel %vm1367_vm1, %v2997_v15, 0.0 }
 0x378   : > { %1524 = vadd.xlane.f32.xlu1 %v1523_v16 }
 0x384   : > { %1592 = vrot.lane.b32.xlu0 %v1465_v58, %s3662_s13 }
 0x391   : > { %1529 = vrot.lane.b32.xlu1 %v1465_v58, %s3660_s3 }
 0x3d3   : > { %v1459_v19 = vpop.xlane.xlu0 %1458 }
 0x3d4   : > { %2998 = vrcp.f32 %v1459_v19 }
 0x3da   : > { %v2999_v20 = vpop.eup %2998 }
 0x3db   : > { %v1461_v21 = vmul.f32 %v2999_v20, %v2991_v63  ;;  %v1253_v63 = vld [vmem:[%s4144_s7] sm:$0xff]  ;;  %s4428_s7 = sld [smem:[#allocation60_spill]] }
 0x3dc   : > { %v1698_v1 = vadd.f32 %v1253_v63, %v4249_v60  ;;  %v2729_v63 = vld [vmem:[#allocation18] sm:$0xff] }
 0x3dd   : > { %v1462_v22 = vpack.c.bf16 %v1461_v21, %v1461_v21  ;;  %v2978_v21 = vld [vmem:[#allocation17] ss:$0 sm:$0xff] }
 0x3df   : > { %2627 = vmatmul.msk.bf16.vlgmr.msrb.gmra.mxu2 %vm1367_vm1, %v1462_v22 }
 0x3e3   : > { %v1588_v23 = vpop.xlane.xlu0 %1587 }
 0x3e4   : > { %3000 = vrcp.f32 %v1588_v23 }
 0x3ea   : > { %v3001_v26 = vpop.eup %3000 }
 0x3eb   : > { %v1415_v24 = vpop.f32.mrf.mxu0  ;;  %v1590_v28 = vmul.f32 %v3001_v26, %v2995_v12  ;;  %v1525_v29 = vpop.xlane.xlu1 %1524 }
 0x3ec   : > { %v1419_v25 = vpack.c.bf16 %v1415_v24, %v1415_v24  ;;  %3002 = vrcp.f32 %v1525_v29 }
 0x3ed   : > { %v1591_v32 = vpack.c.bf16 %v1590_v28, %v1590_v28  ;;  %3004 = vrcp.f32 %v3666_v59 }
 0x3ee   : > { %1421 = vst.msk [vmem:[#allocation2] sm:$0xf] %vm1420_vm3, %v1419_v25 }
 0x3f2   : > { %v3003_v33 = vpop.eup %3002 }
 0x3f3   : > { %v1417_v27 = vpop.f32.mrf.mxu0  ;;  %v1527_v34 = vmul.f32 %v3003_v33, %v2997_v15  ;;  %v3005_v5 = vpop.eup %3004 }
 0x3f4   : > { %v1662_v7 = vmul.f32 32.0, %v3005_v5  ;;  %vm1666_vm7 = vweird.f32 %v3005_v5 }
 0x3f5   : > { %v1528_v37 = vpack.c.bf16 %v1527_v34, %v1527_v34 }
 0x3f6   : > { %v1593_v30 = vpop.permute.xlu0 %1592  ;;  %v1663_v8 = vsub.f32 1.0, %v1662_v7 }
 0x3f7   : > { %v1598_v31 = vsel %vm1402_vm2, %v1593_v30, 0 }
 0x3f8   : > { %1607 = vmatpush.bf16.msra.mxu2 %v1598_v31  ;;  %v1664_v9 = vmul.f32 %v3005_v5, %v1663_v8 }
 0x3fa   : > { %v1665_v10 = vadd.f32 %v3005_v5, %v1664_v9 }
 0x3fb   : > { %2631 = vmatmul.msk.bf16.vlgmr.msra.gmra.mxu2 %vm1367_vm1, %v1591_v32 }
 0x3fc   : > { %v4258_v11 = vsel %vm1666_vm7, %v3005_v5, %v1665_v10  ;;  %1808 = vmatpush.bf16.msrb.mxu2 %v2730_v62 }
 0x400   : > { %1809 = vmatpush.bf16.msrb.mxu2 %v2729_v63 }
 0x403   : > { %v1530_v35 = vpop.permute.xlu1 %1529 }
 0x404   : > { %v1535_v36 = vsel %vm1402_vm2, %v1530_v35, 0 }
 0x405   : > { %1544 = vmatpush.bf16.msra.mxu0 %v1535_v36 }
 0x408   : > { %2629 = vmatmul.msk.bf16.vlgmr.msra.gmra.mxu0 %vm1367_vm1, %v1528_v37 }
 0x409   : > { %1730 = vmatpush.bf16.msrb.mxu0 %v2726_v17 }
 0x40d   : > { %1731 = vmatpush.bf16.msrb.mxu0 %v2725_v18 }
 0x462   : > { %v1483_v38 = vpop.f32.mrf.mxu2 }
 0x463   : > { %v1487_v39 = vpack.c.bf16 %v1483_v38, %v1483_v38 }
 0x465   : > { %1489 = vrot.lane.b32.xlu2 %v1487_v39, %s3663_s19  ;;  %v2976_v39 = vld [vmem:[%s4428_s7] ss:$0 sm:$0xff] }
 0x46a   : > { %v1485_v40 = vpop.f32.mrf.mxu2 }
 0x47e   : > { %v1609_v41 = vpop.f32.mrf.mxu2 }
 0x47f   : > { %v1613_v42 = vpack.c.bf16 %v1609_v41, %v1609_v41  ;;  %v2977_v41 = vld [vmem:[%s4429_s1] ss:$0 sm:$0xff] }
 0x481   : > { %1615 = vrot.lane.b32.xlu2 %v1613_v42, %s3664_s4 }
 0x485   : > { %v1546_v43 = vpop.f32.mrf.mxu0 }
 0x486   : > { %v1550_v44 = vpack.c.bf16 %v1546_v43, %v1546_v43  ;;  %v1611_v45 = vpop.f32.mrf.mxu2 }
 0x488   : > { %1552 = vrot.lane.b32.xlu0 %v1550_v44, %s3665_s21 }
 0x48d   : > { %v1548_v46 = vpop.f32.mrf.mxu0 }
 0x4bf   : > { %v1490_v47 = vpop.permute.xlu2 %1489 }
 0x4c0   : > { %1493 = vst.msk [vmem:[#allocation2] sm:$0xf] %vm1492_vm4, %v1490_v47 }
 0x4db   : > { %v1616_v51 = vpop.permute.xlu2 %1615 }
 0x4fa   : > { %v1553_v50 = vpop.permute.xlu0 %1552 }
 0x4fb   : > { %1556 = vst.msk [vmem:[#allocation2] sm:$0xf] %vm1555_vm5, %v1553_v50 }
 0x4fc   : > { %1619 = vst.msk [vmem:[#allocation2] sm:$0xf] %vm1618_vm6, %v1616_v51 }
 0x503   : > { %v1620_v52 = vld [vmem:[#allocation2] sm:$0xf] }
 0x504   : > { %2640 = vmatmul.msk.bf16.vlgmr.msra.gmra.mxu3 %vm1277_vm0, %v1620_v52 }
 0x587   : > { %v1653_v54 = vpop.f32.mrf.mxu3 }
 0x588   : > { %v1654_v55 = vadd.f32 %v2975_v53, %v1653_v54 }
 0x58a   : > { %v1657_v56 = vadd.f32 %v1654_v55, %v4188_v2  ;;  %v1699_v2 = vadd.f32 %v1254_v0, %v4251_v61 }
 0x58c   : > { %v1658_v57 = vsel %vm1277_vm0, %v1657_v56, 0.0  ;;  %v1738_v6 = vpack.c.bf16 %v1699_v2, %v1698_v1  ;;  %v1778_v1 = vpack.c.bf16 %v4251_v61, %v4249_v60 }
 0x58d   : > { %1659 = vadd.xlane.f32.xlu1 %v1658_v57 }
 0x58e   : > { %2658 = vmatmul.msk.bf16.vlgmr.msrb.gmra.mxu1 %vm1277_vm0, %v1738_v6  ;;  %2667 = vmatmul.msk.bf16.vlgmr.msrb.gmra.mxu2 %vm1277_vm0, %v1778_v1 }
 0x58f   : > { %v1655_v58 = vpop.f32.mrf.mxu3 }
 0x600   : > { %v1660_v12 = vpop.xlane.xlu1 %1659 }
 0x601   : > { %v1668_v13 = vmul.f32 %v4258_v11, %v1660_v12 }
 0x603   : > { %v1669_v14 = vsub.f32 %v1657_v56, %v1668_v13 }
 0x605   : > { %v1670_v15 = vmul.f32 %v1669_v14, %v1669_v14 }
 0x607   : > { %v1671_v16 = vsel %vm1277_vm0, %v1670_v15, 0.0 }
 0x608   : > { %1672 = vadd.xlane.f32.xlu0 %v1671_v16 }
 0x60b   : > { %v1771_v22 = vpop.f32.mrf.mxu1 }
 0x60c   : > { %v1772_v24 = vadd.f32 %v2978_v21, %v1771_v22 }
 0x60e   : > { %v1776_v25 = vpack.c.bf16 %v1772_v24, %v1772_v24 }
 0x610   : > { %v1820_v30 = vunpack.c.l.b16 %v1776_v25 }
 0x613   : > { %v1773_v26 = vpop.f32.mrf.mxu1 }
 0x614   : > { %v1774_v27 = vadd.f32 %v2978_v21, %v1773_v26  ;;  %v2980_v21 = vld [vmem:[#allocation20] ss:$0 sm:$0xff] }
 0x616   : > { %v1777_v31 = vpack.c.bf16 %v1774_v27, %v1774_v27 }
 0x618   : > { %v1821_v33 = vunpack.c.l.b16 %v1777_v31 }
 0x61a   : > { %v1822_v35 = vpack.c.b16 %v1821_v33, %v1820_v30 }
 0x61c   : > { %1884 = vrot.lane.b32.xlu2 %v1822_v35, %s3661_s8  ;;  %v1827_v37 = vsel %vm1367_vm1, %v1822_v35, 0 }
 0x61d   : > { %1836 = vmatpush.bf16.xpose.msrb.mxu3 %v1827_v37 }
 0x624   : > { %1944 = vrot.lane.b32.xlu2 %v1822_v35, %s3660_s3 }
 0x676   : > { %v1885_v47 = vpop.permute.xlu2 %1884 }
 0x677   : > { %v1890_v48 = vsel %vm1367_vm1, %v1885_v47, 0 }
 0x678   : > { %1899 = vmatpush.bf16.xpose.msra.mxu1 %v1890_v48 }
 0x67b   : > { %v1673_v19 = vpop.xlane.xlu0 %1672 }
 0x67c   : > { %v1674_v20 = vmul.f32 %v1673_v19, %v4258_v11 }
 0x67e   : > { %v1675_v23 = vadd.f32 1e-05, %v1674_v20  ;;  %v1945_v52 = vpop.permute.xlu2 %1944  ;;  %v1811_v20 = vpop.f32.mrf.mxu2 }
 0x67f   : > { %v1950_v53 = vsel %vm1367_vm1, %v1945_v52, 0  ;;  %v1812_v22 = vadd.f32 %v2980_v21, %v1811_v20  ;;  %v2981_v20 = vld [vmem:[#allocation23] ss:$0 sm:$0xff] }
 0x680   : > { %3006 = vrsqrt.f32 %v1675_v23  ;;  %vm1682_vm9 = vweird.f32 %v1675_v23  ;;  %1959 = vmatpush.bf16.xpose.msra.mxu3 %v1950_v53 }
 0x686   : > { %v3007_v28 = vpop.eup %3006  ;;  %v1813_v24 = vpop.f32.mrf.mxu2 }
 0x687   : > { %v1677_v29 = vmul.f32 %v3007_v28, %v1675_v23  ;;  %vm1683_vm8 = vweird.f32 %v3007_v28  ;;  %v1816_v23 = vpack.c.bf16 %v1812_v22, %v1812_v22  ;;  %v1814_v25 = vadd.f32 %v2980_v21, %v1813_v24 }
 0x688   : > { %vm1684_vm10 = vmor %vm1682_vm9, %vm1683_vm8 }
 0x689   : > { %v1678_v32 = vmul.f32 %v3007_v28, %v1677_v29  ;;  %v1857_v26 = vunpack.c.l.b16 %v1816_v23  ;;  %v1817_v27 = vpack.c.bf16 %v1814_v25, %v1814_v25 }
 0x68b   : > { %v1679_v34 = vmul.f32 0.5, %v1678_v32 }
 0x68d   : > { %v1680_v36 = vsub.f32 1.5, %v1679_v34 }
 0x68f   : > { %v1681_v38 = vmul.f32 %v3007_v28, %v1680_v36 }
 0x691   : > { %v1685_v40 = vsel %vm1684_vm10, %v3007_v28, %v1681_v38  ;;  %v1858_v28 = vunpack.c.l.b16 %v1817_v27 }
 0x692   : > { %v1686_v42 = vmul.f32 %v1685_v40, %v1669_v14 }
 0x693   : > { %v1859_v29 = vpack.c.b16 %v1858_v28, %v1857_v26 }
 0x694   : > { %v1691_v43 = vmul.f32 %v2976_v39, %v1686_v42 }
 0x695   : > { %1871 = vmatpush.bf16.msra.mxu0 %v1859_v29 }
 0x696   : > { %v4268_v44 = vadd.f32 %v2977_v41, %v1691_v43 }
 0x698   : > { %v1697_v45 = vadd.f32 %v4268_v44, %v4191_v3 }
 0x69a   : > { %v1700_v46 = vpack.c.bf16 %v1697_v45, %v1697_v45 }
 0x69c   : > { %2649 = vmatmul.msk.bf16.vlgmr.msrb.gmra.mxu0 %vm1277_vm0, %v1700_v46 }
 0x719   : > { %v1733_v50 = vpop.f32.mrf.mxu0 }
 0x71a   : > { %v1734_v51 = vadd.f32 %v2979_v49, %v1733_v50 }
 0x71c   : > { %v1737_v54 = vpack.c.bf16 %v1734_v51, %v1734_v51 }
 0x71e   : > { %v1880_v55 = vunpack.c.l.b16 %v1737_v54  ;;  %2668 = vmatmul.msk.bf16.vlgmr.msrb.gmra.mxu3 %vm1367_vm1, %v1737_v54 }
 0x720   : > { %v1881_v56 = vpack.c.b16 %v1880_v55, %v1880_v55 }
 0x721   : > { %v1735_v3 = vpop.f32.mrf.mxu0 }
 0x722   : > { %2002 = vrot.lane.b32.xlu1 %v1881_v56, %s3662_s13  ;;  %1882 = vrot.lane.b32.xlu2 %v1881_v56, %s3661_s8 }
 0x72a   : > { %2004 = vrot.lane.b32.xlu2 %v1822_v35, %s3662_s13 }
 0x732   : > { %1942 = vrot.lane.b32.xlu2 %v1881_v56, %s3660_s3 }
 0x77c   : > { %v1883_v57 = vpop.permute.xlu2 %1882 }
 0x77d   : > { %2670 = vmatmul.msk.bf16.vlgmr.msra.gmra.mxu1 %vm1367_vm1, %v1883_v57 }
 0x784   : > { %v2005_v58 = vpop.permute.xlu2 %2004 }
 0x785   : > { %v2010_v59 = vsel %vm1367_vm1, %v2005_v58, 0 }
 0x786   : > { %2019 = vmatpush.bf16.xpose.msrb.mxu1 %v2010_v59 }
 0x78c   : > { %v1943_v0 = vpop.permute.xlu2 %1942 }
 0x78d   : > { %2672 = vmatmul.msk.bf16.vlgmr.msra.gmra.mxu3 %vm1367_vm1, %v1943_v0 }
 0x794   : > { %v2003_v4 = vpop.permute.xlu1 %2002 }
 0x795   : > { %2674 = vmatmul.msk.bf16.vlgmr.msrb.gmra.mxu1 %vm1367_vm1, %v2003_v4 }
 0x7a1   : > { %v1838_v2 = vpop.f32.mrf.mxu3 }
 0x7a2   : > { %v1843_v5 = vsel %vm1842_vm11, %v1838_v2, -inf }
 0x7a3   : > { %1844 = vmax.xlane.f32.xlu2 %v1843_v5 }
 0x7a9   : > { %v1840_v6 = vpop.f32.mrf.mxu3 }
 0x7fa   : > { %v1901_v7 = vpop.f32.mrf.mxu1 }
 0x7fb   : > { %v1905_v8 = vsel %vm1842_vm11, %v1901_v7, -inf }
 0x7fc   : > { %1906 = vmax.xlane.f32.xlu0 %v1905_v8 }
 0x802   : > { %v1903_v9 = vpop.f32.mrf.mxu1 }
 0x810   : > { %v1961_v10 = vpop.f32.mrf.mxu3 }
 0x811   : > { %v1965_v60 = vsel %vm1842_vm11, %v1961_v10, -inf }
 0x812   : > { %v2021_v61 = vpop.f32.mrf.mxu1  ;;  %1966 = vmax.xlane.f32.xlu0 %v1965_v60 }
 0x813   : > { %v2025_v16 = vsel %vm1842_vm11, %v2021_v61, -inf }
 0x816   : > { %v1845_v12 = vpop.xlane.xlu2 %1844 }
 0x817   : > { %v1846_v13 = vsub.f32 %v1838_v2, %v1845_v12 }
 0x818   : > { %v1963_v14 = vpop.f32.mrf.mxu3 }
 0x819   : > { %v1847_v15 = vmul.f32 1.442695, %v1846_v13  ;;  %v2732_v14 = vld [vmem:[#allocation21 + $0x8] sm:$0xff] }
 0x81a   : > { %v2023_v17 = vpop.f32.mrf.mxu1  ;;  %2026 = vmax.xlane.f32.xlu0 %v2025_v16  ;;  %2092 = vmatpush.bf16.msrb.mxu3 %v2732_v14  ;;  %v2731_v16 = vld [vmem:[#allocation21] sm:$0xff] }
 0x81b   : > { %3008 = vpow2.f32 %v1847_v15 }
 0x81e   : > { %2093 = vmatpush.bf16.msrb.mxu3 %v2731_v16  ;;  %v2986_v16 = vld [vmem:[%s4434_s5] ss:$0 sm:$0xff] }
 0x821   : > { %v3009_v18 = vpop.eup %3008 }
 0x822   : > { %v1849_v19 = vsel %vm1842_vm11, %v3009_v18, 0.0 }
 0x823   : > { %1850 = vadd.xlane.f32.xlu0 %v1849_v19 }
 0x837   : > { %1917 = vrot.lane.b32.xlu0 %v1859_v29, %s3661_s8  ;;  %s4432_s8 = sld [smem:[#allocation63_spill]] }
 0x83f   : > { %2037 = vrot.lane.b32.xlu0 %v1859_v29, %s3662_s13  ;;  %s4433_s13 = sld [smem:[#allocation59_spill]] }
 0x86f   : > { %v1907_v30 = vpop.xlane.xlu0 %1906 }
 0x870   : > { %v1908_v31 = vsub.f32 %v1901_v7, %v1907_v30 }
 0x872   : > { %v1909_v32 = vmul.f32 1.442695, %v1908_v31  ;;  %v2734_v31 = vld [vmem:[#allocation24 + $0x8] sm:$0xff] }
 0x874   : > { %3010 = vpow2.f32 %v1909_v32  ;;  %v2733_v32 = vld [vmem:[#allocation24] sm:$0xff] }
 0x87a   : > { %v3011_v33 = vpop.eup %3010 }
 0x87b   : > { %v1911_v34 = vsel %vm1842_vm11, %v3011_v33, 0.0 }
 0x87c   : > { %1912 = vadd.xlane.f32.xlu1 %v1911_v34 }
 0x885   : > { %v1967_v35 = vpop.xlane.xlu0 %1966 }
 0x886   : > { %v1968_v36 = vsub.f32 %v1961_v10, %v1967_v35 }
 0x888   : > { %v1969_v37 = vmul.f32 1.442695, %v1968_v36 }
 0x88a   : > { %3012 = vpow2.f32 %v1969_v37 }
 0x88d   : > { %v2027_v38 = vpop.xlane.xlu0 %2026 }
 0x88e   : > { %v2028_v39 = vsub.f32 %v2021_v61, %v2027_v38 }
 0x890   : > { %v3013_v40 = vpop.eup %3012  ;;  %v2029_v41 = vmul.f32 1.442695, %v2028_v39 }
 0x891   : > { %v1971_v42 = vsel %vm1842_vm11, %v3013_v40, 0.0 }
 0x892   : > { %3014 = vpow2.f32 %v2029_v41  ;;  %1972 = vadd.xlane.f32.xlu2 %v1971_v42 }
 0x896   : > { %v1851_v43 = vpop.xlane.xlu0 %1850 }
 0x897   : > { %3016 = vrcp.f32 %v1851_v43  ;;  %v2982_v43 = vld [vmem:[#allocation27] ss:$0 sm:$0xff] }
 0x898   : > { %v3015_v45 = vpop.eup %3014 }
 0x899   : > { %v2031_v46 = vsel %vm1842_vm11, %v3015_v45, 0.0 }
 0x89a   : > { %2032 = vadd.xlane.f32.xlu2 %v2031_v46  ;;  %v2983_v46 = vld [vmem:[%s4432_s8] ss:$0 sm:$0xff] }
 0x89d   : > { %v3017_v47 = vpop.eup %3016 }
 0x89e   : > { %v1853_v48 = vmul.f32 %v3017_v47, %v3009_v18 }
 0x8a0   : > { %v1854_v49 = vpack.c.bf16 %v1853_v48, %v1853_v48 }
 0x8a2   : > { %2669 = vmatmul.msk.bf16.vlgmr.msra.gmra.mxu0 %vm1842_vm11, %v1854_v49 }
 0x8a9   : > { %v1918_v50 = vpop.permute.xlu0 %1917 }
 0x8aa   : > { %1930 = vmatpush.bf16.msra.mxu2 %v1918_v50 }
 0x8b1   : > { %v2038_v51 = vpop.permute.xlu0 %2037 }
 0x8b2   : > { %1977 = vrot.lane.b32.xlu2 %v1859_v29, %s3660_s3  ;;  %2050 = vmatpush.bf16.msrb.mxu2 %v2038_v51  ;;  %s4431_s3 = sld [smem:[#allocation58_spill]] }
 0x8b8   : > { %v2737_v35 = vld [vmem:[%s4431_s3 + $0x10] sm:$0xff]  ;;  %v2736_v51 = vld [vmem:[%s4431_s3 + $0x8] sm:$0xff] }
 0x8ef   : > { %v1913_v52 = vpop.xlane.xlu1 %1912 }
 0x8f0   : > { %3018 = vrcp.f32 %v1913_v52  ;;  %v2735_v52 = vld [vmem:[%s4431_s3] sm:$0xff] }
 0x8f6   : > { %v3019_v53 = vpop.eup %3018 }
 0x8f7   : > { %v1915_v54 = vmul.f32 %v3019_v53, %v3011_v33  ;;  %v2738_v33 = vld [vmem:[%s4431_s3 + $0x18] sm:$0xff]  ;;  %v2984_v53 = vld [vmem:[#allocation26] ss:$0 sm:$0xff] }
 0x8f8   : > { %2215 = vmatpush.bf16.msra.mxu1 %v2738_v33 }
 0x8f9   : > { %v1916_v55 = vpack.c.bf16 %v1915_v54, %v1915_v54 }
 0x8fb   : > { %2671 = vmatmul.msk.bf16.vlgmr.msra.gmra.mxu2 %vm1842_vm11, %v1916_v55 }
 0x8fc   : > { %2216 = vmatpush.bf16.msra.mxu1 %v2737_v35 }
 0x900   : > { %2217 = vmatpush.bf16.msra.mxu1 %v2736_v51 }
 0x904   : > { %2218 = vmatpush.bf16.msra.mxu1 %v2735_v52 }
 0x905   : > { %v1973_v56 = vpop.xlane.xlu2 %1972 }
 0x906   : > { %3020 = vrcp.f32 %v1973_v56 }
 0x90c   : > { %v3021_v57 = vpop.eup %3020 }
 0x90d   : > { %v2033_v3 = vpop.xlane.xlu2 %2032  ;;  %v1975_v58 = vmul.f32 %v3021_v57, %v3013_v40 }
 0x90e   : > { %3022 = vrcp.f32 %v2033_v3 }
 0x90f   : > { %v1976_v0 = vpack.c.bf16 %v1975_v58, %v1975_v58  ;;  %v2985_v58 = vld [vmem:[%s4433_s13] ss:$0 sm:$0xff] }
 0x914   : > { %v3023_v59 = vpop.eup %3022 }
 0x915   : > { %v2035_v62 = vmul.f32 %v3023_v59, %v3015_v45  ;;  %v1978_v63 = vpop.permute.xlu2 %1977 }
 0x916   : > { %1990 = vmatpush.bf16.msrb.mxu0 %v1978_v63 }
 0x917   : > { %v2036_v1 = vpack.c.bf16 %v2035_v62, %v2035_v62 }
 0x919   : > { %2673 = vmatmul.msk.bf16.vlgmr.msrb.gmra.mxu0 %vm1842_vm11, %v1976_v0  ;;  %2675 = vmatmul.msk.bf16.vlgmr.msrb.gmra.mxu2 %vm1842_vm11, %v2036_v1 }
 0x91a   : > { %2162 = vmatpush.bf16.msra.mxu0 %v2734_v31 }
 0x91e   : > { %2163 = vmatpush.bf16.msra.mxu0 %v2733_v32 }
 0x91f   : > { %v1873_v4 = vpop.f32.mrf.mxu0 }
 0x920   : > { %v1877_v2 = vpack.c.bf16 %v1873_v4, %v1873_v4 }
 0x922   : > { %1878 = vst.msk [vmem:[#allocation2] sm:$0xf] %vm1420_vm3, %v1877_v2 }
 0x927   : > { %v1875_v5 = vpop.f32.mrf.mxu0 }
 0x97e   : > { %v1932_v6 = vpop.f32.mrf.mxu2 }
 0x97f   : > { %v1936_v7 = vpack.c.bf16 %v1932_v6, %v1932_v6 }
 0x981   : > { %1938 = vrot.lane.b32.xlu0 %v1936_v7, %s3663_s19  ;;  %s4435_s19 = sld [smem:[#allocation66_spill]] }
 0x986   : > { %v1934_v8 = vpop.f32.mrf.mxu2 }
 0x987   : > { %s3528_s9 = scalar_lea.hbm %s4435_s19, 16 }
 0x996   : > { %v1992_v9 = vpop.f32.mrf.mxu0 }
 0x997   : > { %v1996_v10 = vpack.c.bf16 %v1992_v9, %v1992_v9 }
 0x999   : > { %1998 = vrot.lane.b32.xlu1 %v1996_v10, %s3665_s21  ;;  %s2712_s21 = sshll.u32 %s3851_s23, 3  ;;  %s2259_s23 = scalar_lea.sflag [#allocation5], %s4130_s14 }
 0x99a   : > { %s2269_s22 = scalar_lea.hbm %s4435_s19, %s2712_s21 }
 0x99b   : > { %s2273_s25 = sshll.u32 %s2269_s22, 4  ;;  %s2274_s25 = int_to_ptr.hbm [resolvable:$true] %s2273_s25 }
 0x99c   : > { %v2052_v60 = vpop.f32.mrf.mxu2  ;;  %s3522_s7 = sshra.s32 %s2274_s25, 4  ;;  %s3523_s7 = int_to_ptr.hbm [resolvable:$true] %s3522_s7 }
 0x99d   : > { %v2056_v61 = vpack.c.bf16 %v2052_v60, %v2052_v60  ;;  %s3524_s1 = scalar_lea.hbm %s3523_s7, 8  ;;  %p3529_p7 = scmp.lt.s32.totalorder %s3523_s7, %s4435_s19 }
 0x99e   : > { %v1994_v12 = vpop.f32.mrf.mxu0  ;;  %p3525_p1 = scmp.ne.s32.totalorder %s3523_s7, %s3524_s1  ;;  %p3530_p5 = scmp.lt.s32.totalorder %s3528_s9, %s3524_s1 }
 0x99f   : > { %2058 = vrot.lane.b32.xlu0 %v2056_v61, %s3664_s4  ;;  %s4436_s4 = sld [smem:[#allocation65_spill]] }
 0x9a0   : > { %p3526_p6 = pnand %p3525_p1, %p4089_p0  ;;  %p3531_p4 = por %p3530_p5, %p3529_p7 }
 0x9a2   : > { %p3527_p8 = pneg %p3526_p6 }
 0x9a4   : > { %v2054_v13 = vpop.f32.mrf.mxu2  ;;  %p3532_p9 = pnand %p3531_p4, %p3527_p8 }
 0x9f3   : > { %v1939_v15 = vpop.permute.xlu0 %1938 }
 0x9f4   : > { %1941 = vst.msk [vmem:[#allocation2] sm:$0xf] %vm1492_vm4, %v1939_v15 }
 0xa0b   : > { %v1999_v17 = vpop.permute.xlu1 %1998 }
 0xa0c   : > { %2001 = vst.msk [vmem:[#allocation2] sm:$0xf] %vm1555_vm5, %v1999_v17 }
 0xa11   : > { %v2059_v18 = vpop.permute.xlu0 %2058 }
 0xa12   : > { %2061 = vst.msk [vmem:[#allocation2] sm:$0xf] %vm1618_vm6, %v2059_v18  ;;  %v2987_v18 = vld [vmem:[%s4436_s4] ss:$0 sm:$0xff] }
 0xa19   : > { %v2062_v19 = vld [vmem:[#allocation2] sm:$0xf] }
 0xa1a   : > { %2684 = vmatmul.msk.bf16.vlgmr.msrb.gmra.mxu3 %vm1277_vm0, %v2062_v19 }
 0xa9d   : > { %v2095_v21 = vpop.f32.mrf.mxu3 }
 0xa9e   : > { %v2096_v22 = vadd.f32 %v2981_v20, %v2095_v21 }
 0xaa0   : > { %v2099_v23 = vadd.f32 %v2096_v22, %v4268_v44 }
 0xaa2   : > { %v2100_v24 = vsel %vm1277_vm0, %v2099_v23, 0.0 }
 0xaa3   : > { %2101 = vadd.xlane.f32.xlu0 %v2100_v24 }
 0xaa5   : > { %v2097_v25 = vpop.f32.mrf.mxu3 }
 0xb16   : > { %v2102_v26 = vpop.xlane.xlu0 %2101 }
 0xb17   : > { %v2103_v27 = vmul.f32 %v2102_v26, %v4258_v11 }
 0xb19   : > { %v2104_v28 = vsub.f32 %v2099_v23, %v2103_v27 }
 0xb1b   : > { %v2105_v29 = vmul.f32 %v2104_v28, %v2104_v28 }
 0xb1d   : > { %v2106_v30 = vsel %vm1277_vm0, %v2105_v29, 0.0 }
 0xb1e   : > { %2107 = vadd.xlane.f32.xlu2 %v2106_v30 }
 0xb91   : > { %v2108_v34 = vpop.xlane.xlu2 %2107 }
 0xb92   : > { %v2109_v44 = vmul.f32 %v2108_v34, %v4258_v11 }
 0xb94   : > { %v2110_v36 = vadd.f32 1e-05, %v2109_v44 }
 0xb96   : > { %3024 = vrsqrt.f32 %v2110_v36  ;;  %vm2117_vm13 = vweird.f32 %v2110_v36 }
 0xb9c   : > { %v3025_v37 = vpop.eup %3024 }
 0xb9d   : > { %v2112_v38 = vmul.f32 %v3025_v37, %v2110_v36  ;;  %vm2118_vm12 = vweird.f32 %v3025_v37 }
 0xb9e   : > { %vm2119_vm14 = vmor %vm2117_vm13, %vm2118_vm12 }
 0xb9f   : > { %v2113_v39 = vmul.f32 %v3025_v37, %v2112_v38 }
 0xba1   : > { %v2114_v40 = vmul.f32 0.5, %v2113_v39 }
 0xba3   : > { %v2115_v41 = vsub.f32 1.5, %v2114_v40 }
 0xba5   : > { %v2116_v42 = vmul.f32 %v3025_v37, %v2115_v41 }
 0xba7   : > { %v2120_v45 = vsel %vm2119_vm14, %v3025_v37, %v2116_v42 }
 0xba8   : > { %v2121_v47 = vmul.f32 %v2120_v45, %v2104_v28 }
 0xbaa   : > { %v2126_v48 = vmul.f32 %v2982_v43, %v2121_v47 }
 0xbac   : > { %v2131_v49 = vadd.f32 %v2983_v46, %v2126_v48 }
 0xbae   : > { %v2132_v50 = vpack.c.bf16 %v2131_v49, %v2131_v49 }
 0xbb0   : > { %2693 = vmatmul.msk.bf16.vlgmr.msra.gmra.mxu0 %vm1277_vm0, %v2132_v50 }
 0xc2d   : > { %v2165_v54 = vpop.f32.mrf.mxu0 }
 0xc2e   : > { %v2166_v55 = vadd.f32 %v2984_v53, %v2165_v54 }
 0xc30   : > { %v2169_v56 = vmax.f32 %v2166_v55, 0.0 }
 0xc32   : > { %v2170_v3 = vpack.c.bf16 %v2169_v56, %v2169_v56 }
 0xc34   : > { %2710 = vmatmul.msk.bf16.vlgmr.msra.gmra.mxu1 %vm2207_vm15, %v2170_v3 }
 0xc35   : > { %v2167_v57 = vpop.f32.mrf.mxu0 }
 0xcb1   : > { %v2220_v59 = vpop.f32.mrf.mxu1 }
 0xcb2   : > { %v2221_v62 = vadd.f32 %v2985_v58, %v2220_v59 }
 0xcb4   : > { %v2224_v63 = vadd.f32 %v2221_v62, %v2131_v49 }
 0xcb6   : > { %v2225_v0 = vsel %vm1277_vm0, %v2224_v63, 0.0 }
 0xcb7   : > { %2226 = vadd.xlane.f32.xlu1 %v2225_v0 }
 0xcb9   : > { %v2222_v1 = vpop.f32.mrf.mxu1 }
 0xd2a   : > { %v2227_v4 = vpop.xlane.xlu1 %2226 }
 0xd2b   : > { %v2228_v2 = vmul.f32 %v2227_v4, %v4258_v11 }
 0xd2d   : > { %v2229_v5 = vsub.f32 %v2224_v63, %v2228_v2 }
 0xd2f   : > { %v2230_v6 = vmul.f32 %v2229_v5, %v2229_v5 }
 0xd31   : > { %v2231_v7 = vsel %vm1277_vm0, %v2230_v6, 0.0 }
 0xd32   : > { %2232 = vadd.xlane.f32.xlu0 %v2231_v7 }
 0xda5   : > { %v2233_v8 = vpop.xlane.xlu0 %2232 }
 0xda6   : > { %v2234_v9 = vmul.f32 %v2233_v8, %v4258_v11 }
 0xda8   : > { %v2235_v10 = vadd.f32 1e-05, %v2234_v9 }
 0xdaa   : > { %3026 = vrsqrt.f32 %v2235_v10  ;;  %vm2242_vm2 = vweird.f32 %v2235_v10 }
 0xdb0   : > { %v3027_v60 = vpop.eup %3026 }
 0xdb1   : > { %v2237_v61 = vmul.f32 %v3027_v60, %v2235_v10  ;;  %vm2243_vm1 = vweird.f32 %v3027_v60 }
 0xdb2   : > { %vm2244_vm3 = vmor %vm2242_vm2, %vm2243_vm1 }
 0xdb3   : > { %v2238_v12 = vmul.f32 %v3027_v60, %v2237_v61 }
 0xdb5   : > { %v2239_v13 = vmul.f32 0.5, %v2238_v12 }
 0xdb7   : > { %v2240_v14 = vsub.f32 1.5, %v2239_v13 }
 0xdb9   : > { %v2241_v15 = vmul.f32 %v3027_v60, %v2240_v14 }
 0xdbb   : > { %v2245_v17 = vsel %vm2244_vm3, %v3027_v60, %v2241_v15 }
 0xdbc   : > { %v2246_v11 = vmul.f32 %v2245_v17, %v2229_v5 }
 0xdbe   : > { %v2251_v19 = vmul.f32 %v2986_v16, %v2246_v11 }
 0xdc0   : > { %v2256_v20 = vadd.f32 %v2987_v18, %v2251_v19 }
 0xdc2   : > { %2257 = vst.msk [vmem:[%s1238_s12] sm:$0xff] %vm1277_vm0, %v2256_v20 }
 0xdc3   : > { %3535 = shalt.err (!%p3532_p9)
}
 0xdc4   : > { %2799 = dma.vmem_to_hbm [thread:$0]  (%p4089_p0), %s2272_s2, 128, %s2274_s25, %s2259_s23  }
 0xdc5 PF: > { %s2285_s14 = sand.u32 1, %s3598_s15   ;;  %p4437_p11 = scmp.ge.s32.totalorder %s3610_s0, 2 }
 0xdc6   : > { %s2286_s6 = scalar_lea.sflag [#allocation5], %s2285_s14 }
 0xdc7   : > { %p2852_p10 = pnand %p4437_p11, %p4093_p2 }
 0xdc9   : > { %p2853_p12 = pneg %p2852_p10 }
 0xdcb   : > { %3593 = dma.done.wait (%p2853_p12), %s2286_s6, 128  }
 0xdcc   : > { %3595 = vsyncadd (%p2853_p12), %s2286_s6, 4294967168  ;;  %p84_p13 = scmp.ge.s32.totalorder %s4061_s17, 4   ;;  %s4438_s15 = smov %s3602_s16 }
 0xdcd   : > { %s4439_s16 = smov %s3606_s18  ;;  %s4440_s18 = smov %s4072_s10 }
 0xdce   : > { %s4441_s0 = smov %s4061_s17  ;;  %86 = sbr.rel (!%p84_p13) target bundleno = 74 (0x4a), region = 290 }
 0xdd3   :  { %2292 = vsyncpa [#allocation4], 1 }
 0xdd4   :  { %2294 = vsyncpa [#allocation4 + $0x1], 1 }
 0xdd5   :  { %2295 = vsyncpa [#allocation7], 1 }
 0xdd6   :  { %2297 = vsyncpa [#allocation7 + $0x1], 1 }
 0xdd7   :  { %2298 = vsyncpa [#allocation10], 1 }
 0xdd8   :  { %2299 = vsyncpa [#allocation13], 1 }
 0xdd9   :  { %2300 = vsyncpa [#allocation16], 1 }
 0xdda   :  { %2301 = vsyncpa [#allocation19], 1 }
 0xddb   :  { %2302 = vsyncpa [#allocation22], 1 }
 0xddc   :  { %2303 = vsyncpa [#allocation25], 1 }
 0xddd   :  { %2304 = vsyncpa [#allocation28], 1 }
 0xdde   :  { %2305 = vsyncpa [#allocation5], 1 }
 0xddf   :  { %2307 = vsyncpa [#allocation5 + $0x1], 1 }

</bundles_post_ra>
